<compile_context>
chip_gen: v7x
topology: tpu7x:2x2x1
jax: 0.10.0
libtpu: 0.0.40
codegen_flags: <defaults>
</compile_context>

<pallas_src>
import numpy as np
import jax
import jax.numpy as jnp
from jax.experimental import pallas as pl
from jax.experimental.pallas import tpu as pltpu

BN_EPS = 1e-5
LANE = 128          # lane width: pad Cout up to a multiple of this
SUBLANE = 16        # bf16 sublane packing: keep tap offsets / row pitch aligned to this

_CompilerParams = getattr(pltpu, "CompilerParams", None)
if _CompilerParams is None:                      # older jax fallback
    _CompilerParams = getattr(pltpu, "TPUCompilerParams")


def round_up(x, m):
    return ((x + m - 1) // m) * m


def _compiler_params(dim_sem, per_step_bytes):
    """Derive vmem_limit_bytes from the real per-step block bytes, with headroom."""
    cap = 64 * 1024 * 1024                       # conservative default (v7x per-TC VMEM)
    try:
        cap = int(pltpu.get_tpu_info().vmem_capacity_bytes)
    except Exception:
        pass
    limit = int(min(max(4 * per_step_bytes, 16 * 1024 * 1024), int(0.6 * cap)))
    return _CompilerParams(dimension_semantics=dim_sem, vmem_limit_bytes=limit)


# ----------------------------------------------------------------------------
# Pallas kernels
# ----------------------------------------------------------------------------
def upsample_kernel(ah_ref, awt_ref, x_ref, o_ref):
    # ah_ref : (OH, H) row-interp matrix; awt_ref: (W, OW) col-interp matrix (transposed)
    # x_ref  : (Cb, H, W)  block of Cb (n, c) planes;  o_ref: (Cb, OH, OW)
    ah = ah_ref[...]
    awt = awt_ref[...]
    for b in range(x_ref.shape[0]):              # static unrolled loop over the plane block
        t = jnp.dot(ah, x_ref[b], preferred_element_type=jnp.float32)       # (OH, W)
        o_ref[b] = jnp.dot(t, awt, preferred_element_type=jnp.float32)      # (OH, OW)


def conv3x3_kernel(xcol_ref, w_ref, mask_ref, o_ref, s_ref, sq_ref):
    # xcol_ref: (1, Lp, 3*Cin) bf16 -- padded image flattened to rows of pitch Wp with the
    #           three dx column shifts stacked along the channel (lane) dim.
    # w_ref   : (3, 3*Cin, CB) bf16 -- weights per dy, dx folded into the contraction.
    # mask_ref: (L, 1) f32 column-validity mask (1 where the output column is real).
    # o_ref   : (1, L, CB) f32 padded output slab; s/sq: (1, 1, CB) BN sums over valid pixels.
    _, L, cb = o_ref.shape
    Lp = xcol_ref.shape[1]
    Wp = (Lp - L) // 2                           # Lp = (H+2)*Wp, L = H*Wp

    acc = jnp.zeros((L, cb), jnp.float32)
    for dy in range(3):
        off = dy * Wp                            # static, multiple of 16 -> aligned slice
        acc = acc + jnp.dot(xcol_ref[0, off:off + L, :], w_ref[dy],
                            preferred_element_type=jnp.float32)
    o_ref[0] = acc                               # lane-dense (CB=128) unmasked stores

    m = mask_ref[...]                            # (L, 1) broadcast over lanes
    am = acc * m
    s_ref[0] = jnp.sum(am, axis=0, keepdims=True)
    sq_ref[0] = jnp.sum(am * acc, axis=0, keepdims=True)


def bn_relu_kernel(y_ref, scale_ref, shift_ref, o_ref):
    # y_ref: (1, L, Cp) f32; scale/shift: (1, 1, Cp)
    o_ref[...] = jnp.maximum(y_ref[...] * scale_ref[...] + shift_ref[...], 0.0)


# ----------------------------------------------------------------------------
# Wrappers
# ----------------------------------------------------------------------------
def make_align_corners_matrix(in_size, out_size):
    """Row-stochastic (out_size, in_size) 1D linear-interp matrix, align_corners=True."""
    if in_size == 1:
        return np.ones((out_size, in_size), np.float32)
    i = np.arange(out_size, dtype=np.float64)
    src = i * (in_size - 1) / (out_size - 1)
    lo = np.minimum(np.floor(src).astype(np.int64), in_size - 1)
    hi = np.minimum(lo + 1, in_size - 1)
    frac = (src - lo).astype(np.float32)
    A = np.zeros((out_size, in_size), np.float32)
    A[np.arange(out_size), lo] += 1.0 - frac
    A[np.arange(out_size), hi] += frac
    return A


def bilinear_upsample_x2(x_nchw, planes_per_step=16):
    """nn.Upsample(scale_factor=2, mode='bilinear', align_corners=True), NCHW in/out."""
    N, C, H, W = x_nchw.shape
    OH, OW = 2 * H, 2 * W
    A_h = jnp.asarray(make_align_corners_matrix(H, OH), jnp.float32)    # (OH, H)
    A_wT = jnp.asarray(make_align_corners_matrix(W, OW).T, jnp.float32)  # (W, OW)

    P = N * C
    Cb = max(1, min(planes_per_step, P))
    Pp = round_up(P, Cb)
    xf = x_nchw.astype(jnp.float32).reshape(P, H, W)
    if Pp != P:
        xf = jnp.pad(xf, ((0, Pp - P), (0, 0), (0, 0)))

    step_bytes = 4 * (Cb * H * W + Cb * OH * OW + OH * H + W * OW)
    out = pl.pallas_call(
        upsample_kernel,
        out_shape=jax.ShapeDtypeStruct((Pp, OH, OW), jnp.float32),
        grid=(Pp // Cb,),
        in_specs=[pl.BlockSpec((OH, H), lambda i: (0, 0)),
                  pl.BlockSpec((W, OW), lambda i: (0, 0)),
                  pl.BlockSpec((Cb, H, W), lambda i: (i, 0, 0))],
        out_specs=pl.BlockSpec((Cb, OH, OW), lambda i: (i, 0, 0)),
        compiler_params=_compiler_params(("parallel",), step_bytes),
    )(A_h, A_wT, xf)
    return out[:P].reshape(N, C, OH, OW)


def build_xcol(xs, Wp):
    """Concat inputs along channels, zero-pad to the (H+2, Wp) halo layout, flatten, and
    stack the three dx column shifts along the channel dim (im2col over dx), in bf16."""
    x = xs[0] if len(xs) == 1 else jnp.concatenate(xs, axis=-1)
    N, H, W, C = x.shape
    Lp = (H + 2) * Wp
    xp = jnp.pad(x.astype(jnp.float32), ((0, 0), (1, 1), (1, Wp - W - 1), (0, 0)))
    flat = jnp.pad(xp.reshape(N, Lp, C), ((0, 0), (0, 2), (0, 0)))
    xcol = jnp.concatenate([flat[:, dx:dx + Lp, :] for dx in range(3)], axis=-1)
    return xcol.astype(jnp.bfloat16)


def prep_weights(w_hwio, Cp):
    """(3,3,Cin,Cout) HWIO -> (3, 3*Cin, Cp) bf16 (dx folded into contraction, Cout padded)."""
    w = jnp.asarray(w_hwio, jnp.float32)
    kh, kw, Cin, Cout = w.shape
    w = w.reshape(kh, kw * Cin, Cout)
    w = jnp.pad(w, ((0, 0), (0, 0), (0, Cp - Cout)))
    return w.astype(jnp.bfloat16)


def make_valid_mask(H, W, Wp):
    col = (np.arange(Wp) < W).astype(np.float32)
    return jnp.asarray(np.tile(col, H).reshape(H * Wp, 1))


def conv3x3_stats(xcol, w3, mask, H, Wp, Cp, cb=LANE):
    """3x3 'same' conv (bias-free) on the im2col'd input; also emits per-image channel
    sum / sum-of-squares over valid pixels for the two-pass BatchNorm."""
    N, Lp, K3 = xcol.shape
    L = H * Wp
    assert Lp == (H + 2) * Wp
    n_j = Cp // cb

    in_bytes = Lp * K3 * 2 + 3 * K3 * cb * 2 + L * 4
    out_bytes = L * cb * 4 + 2 * cb * 4
    step_bytes = 2 * (in_bytes + out_bytes) + L * cb * 4   # double-buffered blocks + f32 acc

    y, s, sq = pl.pallas_call(
        conv3x3_kernel,
        out_shape=(jax.ShapeDtypeStruct((N, L, Cp), jnp.float32),
                   jax.ShapeDtypeStruct((N, 1, Cp), jnp.float32),
                   jax.ShapeDtypeStruct((N, 1, Cp), jnp.float32)),
        grid=(N, n_j),
        in_specs=[pl.BlockSpec((1, Lp, K3), lambda n, j: (n, 0, 0)),
                  pl.BlockSpec((3, K3, cb), lambda n, j: (0, 0, j)),
                  pl.BlockSpec((L, 1), lambda n, j: (0, 0))],
        out_specs=(pl.BlockSpec((1, L, cb), lambda n, j: (n, 0, j)),
                   pl.BlockSpec((1, 1, cb), lambda n, j: (n, 0, j)),
                   pl.BlockSpec((1, 1, cb), lambda n, j: (n, 0, j))),
        compiler_params=_compiler_params(("parallel", "parallel"), step_bytes),
    )(xcol, w3, mask)
    return y, s, sq


def bn_scale_shift(s, sq, gamma, beta, count, Cp):
    mean = jnp.sum(s, axis=(0, 1)) / count                     # (Cp,)
    var = jnp.maximum(jnp.sum(sq, axis=(0, 1)) / count - mean * mean, 0.0)
    g = jnp.pad(jnp.asarray(gamma, jnp.float32), (0, Cp - gamma.shape[0]))
    b = jnp.pad(jnp.asarray(beta, jnp.float32), (0, Cp - beta.shape[0]))
    scale = g * jax.lax.rsqrt(var + BN_EPS)
    shift = b - mean * scale
    return scale, shift


def bn_relu_apply(y, scale, shift):
    N, L, Cp = y.shape
    step_bytes = 4 * L * Cp * 4 + 2 * Cp * 4
    return pl.pallas_call(
        bn_relu_kernel,
        out_shape=jax.ShapeDtypeStruct((N, L, Cp), jnp.float32),
        grid=(N,),
        in_specs=[pl.BlockSpec((1, L, Cp), lambda n: (n, 0, 0)),
                  pl.BlockSpec((1, 1, Cp), lambda n: (0, 0, 0)),
                  pl.BlockSpec((1, 1, Cp), lambda n: (0, 0, 0))],
        out_specs=pl.BlockSpec((1, L, Cp), lambda n: (n, 0, 0)),
        compiler_params=_compiler_params(("parallel",), step_bytes),
    )(y, scale.reshape(1, 1, Cp), shift.reshape(1, 1, Cp))


def upconv_forward_impl(x1_nchw, x2_nchw, params):
    """UpConv.forward (bilinear=True). x1, x2 are NCHW; returns NCHW."""
    N, C1, H1, W1 = x1_nchw.shape
    _, C2, H2, W2 = x2_nchw.shape
    out_ch = params["w1"].shape[-1]

    # 1) bilinear x2 upsample (Pallas, plane-blocked grid)
    x1u = bilinear_upsample_x2(x1_nchw)                         # (N, C1, 2H1, 2W1) f32

    # 2) NHWC + diffY/diffX pad (wrapper XLA; fused into the im2col build below)
    x1u = jnp.transpose(x1u, (0, 2, 3, 1))
    x2 = jnp.transpose(x2_nchw, (0, 2, 3, 1)).astype(jnp.float32)
    OH, OW = 2 * H1, 2 * W1
    dY, dX = H2 - OH, W2 - OW
    x1u = jnp.pad(x1u, ((0, 0), (dY // 2, dY - dY // 2), (dX // 2, dX - dX // 2), (0, 0)))

    H, W = H2, W2
    Wp = round_up(W + 2, SUBLANE)
    Cp = round_up(out_ch, LANE)
    mask = make_valid_mask(H, W, Wp)
    cnt = float(N * H * W)

    # --- stage 1: conv(cat[x2, x1u]) -> BN stats (torch.cat fused into the im2col pass)
    xcol1 = build_xcol([x2, x1u], Wp)
    y1, s1, sq1 = conv3x3_stats(xcol1, prep_weights(params["w1"], Cp), mask, H, Wp, Cp)
    sc1, sh1 = bn_scale_shift(s1, sq1, params["g1"], params["be1"], cnt, Cp)
    # stage-1 BN apply + ReLU, fused by XLA into the slice/pad/shift pass that builds
    # conv2's im2col input (one HBM round-trip of the intermediate instead of two).
    a1 = y1.reshape(N, H, Wp, Cp)[:, :, :W, :out_ch]
    a1 = jnp.maximum(a1 * sc1[:out_ch] + sh1[:out_ch], 0.0)

    # --- stage 2: conv -> BN stats -> BN+ReLU (Pallas) for the final output
    xcol2 = build_xcol([a1], Wp)
    y2, s2, sq2 = conv3x3_stats(xcol2, prep_weights(params["w2"], Cp), mask, H, Wp, Cp)
    sc2, sh2 = bn_scale_shift(s2, sq2, params["g2"], params["be2"], cnt, Cp)
    out = bn_relu_apply(y2, sc2, sh2)                           # (N, H*Wp, Cp)

    out = out.reshape(N, H, Wp, Cp)[:, :, :W, :out_ch]          # strip junk cols / pad chans
    return jnp.transpose(out, (0, 3, 1, 2))                     # back to NCHW


upconv_forward = jax.jit(upconv_forward_impl)


# ----------------------------------------------------------------------------
# Pure-JAX reference (includes the conv bias to demonstrate that dropping it
# under training-mode BatchNorm is numerically identical)
# ----------------------------------------------------------------------------
def _ref_conv_bn_relu(x, w, b, g, be):
    y = jax.lax.conv_general_dilated(
        x, w, (1, 1), ((1, 1), (1, 1)),
        dimension_numbers=("NHWC", "HWIO", "NHWC"))
    y = y + b
    mean = jnp.mean(y, axis=(0, 1, 2))
    var = jnp.mean((y - mean) ** 2, axis=(0, 1, 2))
    y = (y - mean) * jax.lax.rsqrt(var + BN_EPS) * g + be
    return jnp.maximum(y, 0.0)


def ref_forward(x1_nchw, x2_nchw, params):
    x1 = jnp.transpose(x1_nchw, (0, 2, 3, 1))
    x2 = jnp.transpose(x2_nchw, (0, 2, 3, 1))
    _, H1, W1, _ = x1.shape
    _, H2, W2, _ = x2.shape
    OH, OW = 2 * H1, 2 * W1
    A_h = jnp.asarray(make_align_corners_matrix(H1, OH))
    A_w = jnp.asarray(make_align_corners_matrix(W1, OW))
    x1u = jnp.einsum("ph,qw,nhwc->npqc", A_h, A_w, x1)
    dY, dX = H2 - OH, W2 - OW
    x1u = jnp.pad(x1u, ((0, 0), (dY // 2, dY - dY // 2), (dX // 2, dX - dX // 2), (0, 0)))
    x = jnp.concatenate([x2, x1u], axis=-1)
    y = _ref_conv_bn_relu(x, params["w1"], params["b1"], params["g1"], params["be1"])
    y = _ref_conv_bn_relu(y, params["w2"], params["b2"], params["g2"], params["be2"])
    return jnp.transpose(y, (0, 3, 1, 2))


# ----------------------------------------------------------------------------
# Main
# ----------------------------------------------------------------------------
if __name__ == "__main__":
    key = jax.random.PRNGKey(0)
    ks = jax.random.split(key, 12)

    # x1: low-res feature map, x2: skip connection; in_channels = C1 + C2 after concat.
    N, C1, H1, W1 = 2, 4, 8, 8
    C2, H2, W2 = 4, 16, 16
    in_ch = C1 + C2      # 8
    out_ch = 4

    x1 = jax.random.normal(ks[0], (N, C1, H1, W1), jnp.float32)
    x2 = jax.random.normal(ks[1], (N, C2, H2, W2), jnp.float32)

    params = {
        # conv1: in_ch -> out_ch, HWIO weights
        "w1": 0.2 * jax.random.normal(ks[2], (3, 3, in_ch, out_ch), jnp.float32),
        "b1": 0.1 * jax.random.normal(ks[3], (out_ch,), jnp.float32),
        "g1": 1.0 + 0.1 * jax.random.normal(ks[4], (out_ch,), jnp.float32),
        "be1": 0.1 * jax.random.normal(ks[5], (out_ch,), jnp.float32),
        # conv2: out_ch -> out_ch
        "w2": 0.2 * jax.random.normal(ks[6], (3, 3, out_ch, out_ch), jnp.float32),
        "b2": 0.1 * jax.random.normal(ks[7], (out_ch,), jnp.float32),
        "g2": 1.0 + 0.1 * jax.random.normal(ks[8], (out_ch,), jnp.float32),
        "be2": 0.1 * jax.random.normal(ks[9], (out_ch,), jnp.float32),
    }

    out = jax.block_until_ready(upconv_forward(x1, x2, params))
    ref = jax.block_until_ready(ref_forward(x1, x2, params))

    assert out.shape == (N, out_ch, H2, W2), out.shape
    # bf16 MXU inputs with f32 accumulation -> slightly looser tolerance than pure f32.
    assert np.allclose(np.asarray(out), np.asarray(ref), atol=5e-2, rtol=5e-2), (
        "Pallas UpConv output does not match reference")

    print("KERNEL_OK")
</pallas_src>

<mosaic_0001>
module attributes {stable_mosaic.version = 11 : i64} {
  func.func @upsample_kernel(%arg0: i32, %arg1: memref<16x8xf32, #tpu.memory_space<vmem>>, %arg2: memref<8x16xf32, #tpu.memory_space<vmem>>, %arg3: memref<8x8x8xf32, #tpu.memory_space<vmem>>, %arg4: memref<8x16x16xf32, #tpu.memory_space<vmem>>) attributes {dimension_semantics = [#tpu.dimension_semantics<parallel>], iteration_bounds = array<i64: 1>, scalar_prefetch = 0 : i64, scratch_operands = 0 : i64, tpu.core_type = #tpu.core_type<tc>, window_params = [{pipeline_mode = #tpu.pipeline_mode<synchronous>, transform_indices = @transform_0, window_bounds = array<i64: 16, 8>}, {pipeline_mode = #tpu.pipeline_mode<synchronous>, transform_indices = @transform_1, window_bounds = array<i64: 8, 16>}, {transform_indices = @transform_2, window_bounds = array<i64: 8, 8, 8>}, {transform_indices = @transform_3, window_bounds = array<i64: 8, 16, 16>}]} {
    %c0 = arith.constant 0 : index
    %c0_0 = arith.constant 0 : index
    %0 = vector.load %arg1[%c0, %c0_0] : memref<16x8xf32, #tpu.memory_space<vmem>>, vector<16x8xf32>
    %c0_1 = arith.constant 0 : index
    %c0_2 = arith.constant 0 : index
    %1 = vector.load %arg2[%c0_1, %c0_2] : memref<8x16xf32, #tpu.memory_space<vmem>>, vector<8x16xf32>
    %c0_3 = arith.constant 0 : index
    %c0_4 = arith.constant 0 : index
    %c0_5 = arith.constant 0 : index
    %2 = vector.load %arg3[%c0_3, %c0_4, %c0_5] : memref<8x8x8xf32, #tpu.memory_space<vmem>>, vector<1x8x8xf32>
    %3 = vector.shape_cast %2 : vector<1x8x8xf32> to vector<8x8xf32>
    %cst = arith.constant dense<0.000000e+00> : vector<16x8xf32>
    %4 = tpu.matmul %0, %3, %cst {dimension_numbers = #tpu.dot_dimension_numbers<[1], [0], [0], [1], [0, 0, 1, 1], [], []>} : vector<16x8xf32>, vector<8x8xf32>, vector<16x8xf32> -> vector<16x8xf32>
    %cst_6 = arith.constant dense<0.000000e+00> : vector<16x16xf32>
    %5 = tpu.matmul %4, %1, %cst_6 {dimension_numbers = #tpu.dot_dimension_numbers<[1], [0], [0], [1], [0, 0, 1, 1], [], []>} : vector<16x8xf32>, vector<8x16xf32>, vector<16x16xf32> -> vector<16x16xf32>
    %c0_7 = arith.constant 0 : index
    %c0_8 = arith.constant 0 : index
    %c0_9 = arith.constant 0 : index
    %6 = vector.load %arg4[%c0_7, %c0_8, %c0_9] : memref<8x16x16xf32, #tpu.memory_space<vmem>>, vector<1x16x16xf32>
    %7 = vector.shape_cast %6 : vector<1x16x16xf32> to vector<16x16xf32>
    %8 = vector.shape_cast %5 : vector<16x16xf32> to vector<1x16x16xf32>
    tpu.vector_store %arg4[%c0_7, %c0_8, %c0_9], %8 {strides = array<i32>} : memref<8x16x16xf32, #tpu.memory_space<vmem>>, vector<1x16x16xf32>,
    %c1 = arith.constant 1 : index
    %c0_10 = arith.constant 0 : index
    %c0_11 = arith.constant 0 : index
    %9 = vector.load %arg3[%c1, %c0_10, %c0_11] : memref<8x8x8xf32, #tpu.memory_space<vmem>>, vector<1x8x8xf32>
    %10 = vector.shape_cast %9 : vector<1x8x8xf32> to vector<8x8xf32>
    %cst_12 = arith.constant dense<0.000000e+00> : vector<16x8xf32>
    %11 = tpu.matmul %0, %10, %cst_12 {dimension_numbers = #tpu.dot_dimension_numbers<[1], [0], [0], [1], [0, 0, 1, 1], [], []>} : vector<16x8xf32>, vector<8x8xf32>, vector<16x8xf32> -> vector<16x8xf32>
    %cst_13 = arith.constant dense<0.000000e+00> : vector<16x16xf32>
    %12 = tpu.matmul %11, %1, %cst_13 {dimension_numbers = #tpu.dot_dimension_numbers<[1], [0], [0], [1], [0, 0, 1, 1], [], []>} : vector<16x8xf32>, vector<8x16xf32>, vector<16x16xf32> -> vector<16x16xf32>
    %c1_14 = arith.constant 1 : index
    %c0_15 = arith.constant 0 : index
    %c0_16 = arith.constant 0 : index
    %13 = vector.load %arg4[%c1_14, %c0_15, %c0_16] : memref<8x16x16xf32, #tpu.memory_space<vmem>>, vector<1x16x16xf32>
    %14 = vector.shape_cast %13 : vector<1x16x16xf32> to vector<16x16xf32>
    %15 = vector.shape_cast %12 : vector<16x16xf32> to vector<1x16x16xf32>
    tpu.vector_store %arg4[%c1_14, %c0_15, %c0_16], %15 {strides = array<i32>} : memref<8x16x16xf32, #tpu.memory_space<vmem>>, vector<1x16x16xf32>,
    %c2 = arith.constant 2 : index
    %c0_17 = arith.constant 0 : index
    %c0_18 = arith.constant 0 : index
    %16 = vector.load %arg3[%c2, %c0_17, %c0_18] : memref<8x8x8xf32, #tpu.memory_space<vmem>>, vector<1x8x8xf32>
    %17 = vector.shape_cast %16 : vector<1x8x8xf32> to vector<8x8xf32>
    %cst_19 = arith.constant dense<0.000000e+00> : vector<16x8xf32>
    %18 = tpu.matmul %0, %17, %cst_19 {dimension_numbers = #tpu.dot_dimension_numbers<[1], [0], [0], [1], [0, 0, 1, 1], [], []>} : vector<16x8xf32>, vector<8x8xf32>, vector<16x8xf32> -> vector<16x8xf32>
    %cst_20 = arith.constant dense<0.000000e+00> : vector<16x16xf32>
    %19 = tpu.matmul %18, %1, %cst_20 {dimension_numbers = #tpu.dot_dimension_numbers<[1], [0], [0], [1], [0, 0, 1, 1], [], []>} : vector<16x8xf32>, vector<8x16xf32>, vector<16x16xf32> -> vector<16x16xf32>
    %c2_21 = arith.constant 2 : index
    %c0_22 = arith.constant 0 : index
    %c0_23 = arith.constant 0 : index
    %20 = vector.load %arg4[%c2_21, %c0_22, %c0_23] : memref<8x16x16xf32, #tpu.memory_space<vmem>>, vector<1x16x16xf32>
    %21 = vector.shape_cast %20 : vector<1x16x16xf32> to vector<16x16xf32>
    %22 = vector.shape_cast %19 : vector<16x16xf32> to vector<1x16x16xf32>
    tpu.vector_store %arg4[%c2_21, %c0_22, %c0_23], %22 {strides = array<i32>} : memref<8x16x16xf32, #tpu.memory_space<vmem>>, vector<1x16x16xf32>,
    %c3 = arith.constant 3 : index
    %c0_24 = arith.constant 0 : index
    %c0_25 = arith.constant 0 : index
    %23 = vector.load %arg3[%c3, %c0_24, %c0_25] : memref<8x8x8xf32, #tpu.memory_space<vmem>>, vector<1x8x8xf32>
    %24 = vector.shape_cast %23 : vector<1x8x8xf32> to vector<8x8xf32>
    %cst_26 = arith.constant dense<0.000000e+00> : vector<16x8xf32>
    %25 = tpu.matmul %0, %24, %cst_26 {dimension_numbers = #tpu.dot_dimension_numbers<[1], [0], [0], [1], [0, 0, 1, 1], [], []>} : vector<16x8xf32>, vector<8x8xf32>, vector<16x8xf32> -> vector<16x8xf32>
    %cst_27 = arith.constant dense<0.000000e+00> : vector<16x16xf32>
    %26 = tpu.matmul %25, %1, %cst_27 {dimension_numbers = #tpu.dot_dimension_numbers<[1], [0], [0], [1], [0, 0, 1, 1], [], []>} : vector<16x8xf32>, vector<8x16xf32>, vector<16x16xf32> -> vector<16x16xf32>
    %c3_28 = arith.constant 3 : index
    %c0_29 = arith.constant 0 : index
    %c0_30 = arith.constant 0 : index
    %27 = vector.load %arg4[%c3_28, %c0_29, %c0_30] : memref<8x16x16xf32, #tpu.memory_space<vmem>>, vector<1x16x16xf32>
    %28 = vector.shape_cast %27 : vector<1x16x16xf32> to vector<16x16xf32>
    %29 = vector.shape_cast %26 : vector<16x16xf32> to vector<1x16x16xf32>
    tpu.vector_store %arg4[%c3_28, %c0_29, %c0_30], %29 {strides = array<i32>} : memref<8x16x16xf32, #tpu.memory_space<vmem>>, vector<1x16x16xf32>,
    %c4 = arith.constant 4 : index
    %c0_31 = arith.constant 0 : index
    %c0_32 = arith.constant 0 : index
    %30 = vector.load %arg3[%c4, %c0_31, %c0_32] : memref<8x8x8xf32, #tpu.memory_space<vmem>>, vector<1x8x8xf32>
    %31 = vector.shape_cast %30 : vector<1x8x8xf32> to vector<8x8xf32>
    %cst_33 = arith.constant dense<0.000000e+00> : vector<16x8xf32>
    %32 = tpu.matmul %0, %31, %cst_33 {dimension_numbers = #tpu.dot_dimension_numbers<[1], [0], [0], [1], [0, 0, 1, 1], [], []>} : vector<16x8xf32>, vector<8x8xf32>, vector<16x8xf32> -> vector<16x8xf32>
    %cst_34 = arith.constant dense<0.000000e+00> : vector<16x16xf32>
    %33 = tpu.matmul %32, %1, %cst_34 {dimension_numbers = #tpu.dot_dimension_numbers<[1], [0], [0], [1], [0, 0, 1, 1], [], []>} : vector<16x8xf32>, vector<8x16xf32>, vector<16x16xf32> -> vector<16x16xf32>
    %c4_35 = arith.constant 4 : index
    %c0_36 = arith.constant 0 : index
    %c0_37 = arith.constant 0 : index
    %34 = vector.load %arg4[%c4_35, %c0_36, %c0_37] : memref<8x16x16xf32, #tpu.memory_space<vmem>>, vector<1x16x16xf32>
    %35 = vector.shape_cast %34 : vector<1x16x16xf32> to vector<16x16xf32>
    %36 = vector.shape_cast %33 : vector<16x16xf32> to vector<1x16x16xf32>
    tpu.vector_store %arg4[%c4_35, %c0_36, %c0_37], %36 {strides = array<i32>} : memref<8x16x16xf32, #tpu.memory_space<vmem>>, vector<1x16x16xf32>,
    %c5 = arith.constant 5 : index
    %c0_38 = arith.constant 0 : index
    %c0_39 = arith.constant 0 : index
    %37 = vector.load %arg3[%c5, %c0_38, %c0_39] : memref<8x8x8xf32, #tpu.memory_space<vmem>>, vector<1x8x8xf32>
    %38 = vector.shape_cast %37 : vector<1x8x8xf32> to vector<8x8xf32>
    %cst_40 = arith.constant dense<0.000000e+00> : vector<16x8xf32>
    %39 = tpu.matmul %0, %38, %cst_40 {dimension_numbers = #tpu.dot_dimension_numbers<[1], [0], [0], [1], [0, 0, 1, 1], [], []>} : vector<16x8xf32>, vector<8x8xf32>, vector<16x8xf32> -> vector<16x8xf32>
    %cst_41 = arith.constant dense<0.000000e+00> : vector<16x16xf32>
    %40 = tpu.matmul %39, %1, %cst_41 {dimension_numbers = #tpu.dot_dimension_numbers<[1], [0], [0], [1], [0, 0, 1, 1], [], []>} : vector<16x8xf32>, vector<8x16xf32>, vector<16x16xf32> -> vector<16x16xf32>
    %c5_42 = arith.constant 5 : index
    %c0_43 = arith.constant 0 : index
    %c0_44 = arith.constant 0 : index
    %41 = vector.load %arg4[%c5_42, %c0_43, %c0_44] : memref<8x16x16xf32, #tpu.memory_space<vmem>>, vector<1x16x16xf32>
    %42 = vector.shape_cast %41 : vector<1x16x16xf32> to vector<16x16xf32>
    %43 = vector.shape_cast %40 : vector<16x16xf32> to vector<1x16x16xf32>
    tpu.vector_store %arg4[%c5_42, %c0_43, %c0_44], %43 {strides = array<i32>} : memref<8x16x16xf32, #tpu.memory_space<vmem>>, vector<1x16x16xf32>,
    %c6 = arith.constant 6 : index
    %c0_45 = arith.constant 0 : index
    %c0_46 = arith.constant 0 : index
    %44 = vector.load %arg3[%c6, %c0_45, %c0_46] : memref<8x8x8xf32, #tpu.memory_space<vmem>>, vector<1x8x8xf32>
    %45 = vector.shape_cast %44 : vector<1x8x8xf32> to vector<8x8xf32>
    %cst_47 = arith.constant dense<0.000000e+00> : vector<16x8xf32>
    %46 = tpu.matmul %0, %45, %cst_47 {dimension_numbers = #tpu.dot_dimension_numbers<[1], [0], [0], [1], [0, 0, 1, 1], [], []>} : vector<16x8xf32>, vector<8x8xf32>, vector<16x8xf32> -> vector<16x8xf32>
    %cst_48 = arith.constant dense<0.000000e+00> : vector<16x16xf32>
    %47 = tpu.matmul %46, %1, %cst_48 {dimension_numbers = #tpu.dot_dimension_numbers<[1], [0], [0], [1], [0, 0, 1, 1], [], []>} : vector<16x8xf32>, vector<8x16xf32>, vector<16x16xf32> -> vector<16x16xf32>
    %c6_49 = arith.constant 6 : index
    %c0_50 = arith.constant 0 : index
    %c0_51 = arith.constant 0 : index
    %48 = vector.load %arg4[%c6_49, %c0_50, %c0_51] : memref<8x16x16xf32, #tpu.memory_space<vmem>>, vector<1x16x16xf32>
    %49 = vector.shape_cast %48 : vector<1x16x16xf32> to vector<16x16xf32>
    %50 = vector.shape_cast %47 : vector<16x16xf32> to vector<1x16x16xf32>
    tpu.vector_store %arg4[%c6_49, %c0_50, %c0_51], %50 {strides = array<i32>} : memref<8x16x16xf32, #tpu.memory_space<vmem>>, vector<1x16x16xf32>,
    %c7 = arith.constant 7 : index
    %c0_52 = arith.constant 0 : index
    %c0_53 = arith.constant 0 : index
    %51 = vector.load %arg3[%c7, %c0_52, %c0_53] : memref<8x8x8xf32, #tpu.memory_space<vmem>>, vector<1x8x8xf32>
    %52 = vector.shape_cast %51 : vector<1x8x8xf32> to vector<8x8xf32>
    %cst_54 = arith.constant dense<0.000000e+00> : vector<16x8xf32>
    %53 = tpu.matmul %0, %52, %cst_54 {dimension_numbers = #tpu.dot_dimension_numbers<[1], [0], [0], [1], [0, 0, 1, 1], [], []>} : vector<16x8xf32>, vector<8x8xf32>, vector<16x8xf32> -> vector<16x8xf32>
    %cst_55 = arith.constant dense<0.000000e+00> : vector<16x16xf32>
    %54 = tpu.matmul %53, %1, %cst_55 {dimension_numbers = #tpu.dot_dimension_numbers<[1], [0], [0], [1], [0, 0, 1, 1], [], []>} : vector<16x8xf32>, vector<8x16xf32>, vector<16x16xf32> -> vector<16x16xf32>
    %c7_56 = arith.constant 7 : index
    %c0_57 = arith.constant 0 : index
    %c0_58 = arith.constant 0 : index
    %55 = vector.load %arg4[%c7_56, %c0_57, %c0_58] : memref<8x16x16xf32, #tpu.memory_space<vmem>>, vector<1x16x16xf32>
    %56 = vector.shape_cast %55 : vector<1x16x16xf32> to vector<16x16xf32>
    %57 = vector.shape_cast %54 : vector<16x16xf32> to vector<1x16x16xf32>
    tpu.vector_store %arg4[%c7_56, %c0_57, %c0_58], %57 {strides = array<i32>} : memref<8x16x16xf32, #tpu.memory_space<vmem>>, vector<1x16x16xf32>,
    return
  }
  func.func @transform_0(%arg0: i32) -> (i32, i32) {
    %c0_i32 = arith.constant 0 : i32
    %c0_i32_0 = arith.constant 0 : i32
    %c0_i32_1 = arith.constant 0 : i32
    return %c0_i32, %c0_i32_0 : i32, i32
  }
  func.func @transform_1(%arg0: i32) -> (i32, i32) {
    %c0_i32 = arith.constant 0 : i32
    %c0_i32_0 = arith.constant 0 : i32
    %c0_i32_1 = arith.constant 0 : i32
    return %c0_i32, %c0_i32_0 : i32, i32
  }
  func.func @transform_2(%arg0: i32) -> (i32, i32, i32) {
    %c0_i32 = arith.constant 0 : i32
    %c0_i32_0 = arith.constant 0 : i32
    %c0_i32_1 = arith.constant 0 : i32
    return %arg0, %c0_i32, %c0_i32_0 : i32, i32, i32
  }
  func.func @transform_3(%arg0: i32) -> (i32, i32, i32) {
    %c0_i32 = arith.constant 0 : i32
    %c0_i32_0 = arith.constant 0 : i32
    %c0_i32_1 = arith.constant 0 : i32
    return %arg0, %c0_i32, %c0_i32_0 : i32, i32, i32
  }
}

module attributes {stable_mosaic.version = 11 : i64} {
  func.func @conv3x3_kernel(%arg0: i32, %arg1: i32, %arg2: memref<1x576x24xbf16, #tpu.memory_space<vmem>>, %arg3: memref<3x24x128xbf16, #tpu.memory_space<vmem>>, %arg4: memref<512x1xf32, #tpu.memory_space<vmem>>, %arg5: memref<1x512x128xf32, #tpu.memory_space<vmem>>, %arg6: memref<1x1x128xf32, #tpu.memory_space<vmem>>, %arg7: memref<1x1x128xf32, #tpu.memory_space<vmem>>) attributes {dimension_semantics = [#tpu.dimension_semantics<parallel>, #tpu.dimension_semantics<parallel>], iteration_bounds = array<i64: 2, 1>, scalar_prefetch = 0 : i64, scratch_operands = 0 : i64, tpu.core_type = #tpu.core_type<tc>, window_params = [{transform_indices = @transform_0, window_bounds = array<i64: 1, 576, 24>}, {transform_indices = @transform_1, window_bounds = array<i64: 3, 24, 128>}, {pipeline_mode = #tpu.pipeline_mode<synchronous>, transform_indices = @transform_2, window_bounds = array<i64: 512, 1>}, {transform_indices = @transform_3, window_bounds = array<i64: 1, 512, 128>}, {transform_indices = @transform_4, window_bounds = array<i64: 1, 1, 128>}, {transform_indices = @transform_5, window_bounds = array<i64: 1, 1, 128>}]} {
    %cst = arith.constant 0.000000e+00 : f32
    %0 = vector.broadcast %cst : f32 to vector<512x128xf32>
    %c0 = arith.constant 0 : index
    %c0_0 = arith.constant 0 : index
    %c0_1 = arith.constant 0 : index
    %1 = vector.load %arg2[%c0, %c0_0, %c0_1] : memref<1x576x24xbf16, #tpu.memory_space<vmem>>, vector<1x512x24xbf16>
    %2 = vector.shape_cast %1 : vector<1x512x24xbf16> to vector<512x24xbf16>
    %c0_2 = arith.constant 0 : index
    %c0_3 = arith.constant 0 : index
    %c0_4 = arith.constant 0 : index
    %3 = vector.load %arg3[%c0_2, %c0_3, %c0_4] : memref<3x24x128xbf16, #tpu.memory_space<vmem>>, vector<1x24x128xbf16>
    %4 = vector.shape_cast %3 : vector<1x24x128xbf16> to vector<24x128xbf16>
    %cst_5 = arith.constant dense<0.000000e+00> : vector<512x128xf32>
    %5 = tpu.matmul %2, %4, %cst_5 {dimension_numbers = #tpu.dot_dimension_numbers<[1], [0], [0], [1], [0, 0, 1, 1], [], []>} : vector<512x24xbf16>, vector<24x128xbf16>, vector<512x128xf32> -> vector<512x128xf32>
    %6 = arith.addf %0, %5 : vector<512x128xf32>
    %c0_6 = arith.constant 0 : index
    %c32 = arith.constant 32 : index
    %c0_7 = arith.constant 0 : index
    %7 = vector.load %arg2[%c0_6, %c32, %c0_7] : memref<1x576x24xbf16, #tpu.memory_space<vmem>>, vector<1x512x24xbf16>
    %8 = vector.shape_cast %7 : vector<1x512x24xbf16> to vector<512x24xbf16>
    %c1 = arith.constant 1 : index
    %c0_8 = arith.constant 0 : index
    %c0_9 = arith.constant 0 : index
    %9 = vector.load %arg3[%c1, %c0_8, %c0_9] : memref<3x24x128xbf16, #tpu.memory_space<vmem>>, vector<1x24x128xbf16>
    %10 = vector.shape_cast %9 : vector<1x24x128xbf16> to vector<24x128xbf16>
    %cst_10 = arith.constant dense<0.000000e+00> : vector<512x128xf32>
    %11 = tpu.matmul %8, %10, %cst_10 {dimension_numbers = #tpu.dot_dimension_numbers<[1], [0], [0], [1], [0, 0, 1, 1], [], []>} : vector<512x24xbf16>, vector<24x128xbf16>, vector<512x128xf32> -> vector<512x128xf32>
    %12 = arith.addf %6, %11 : vector<512x128xf32>
    %c0_11 = arith.constant 0 : index
    %c64 = arith.constant 64 : index
    %c0_12 = arith.constant 0 : index
    %13 = vector.load %arg2[%c0_11, %c64, %c0_12] : memref<1x576x24xbf16, #tpu.memory_space<vmem>>, vector<1x512x24xbf16>
    %14 = vector.shape_cast %13 : vector<1x512x24xbf16> to vector<512x24xbf16>
    %c2 = arith.constant 2 : index
    %c0_13 = arith.constant 0 : index
    %c0_14 = arith.constant 0 : index
    %15 = vector.load %arg3[%c2, %c0_13, %c0_14] : memref<3x24x128xbf16, #tpu.memory_space<vmem>>, vector<1x24x128xbf16>
    %16 = vector.shape_cast %15 : vector<1x24x128xbf16> to vector<24x128xbf16>
    %cst_15 = arith.constant dense<0.000000e+00> : vector<512x128xf32>
    %17 = tpu.matmul %14, %16, %cst_15 {dimension_numbers = #tpu.dot_dimension_numbers<[1], [0], [0], [1], [0, 0, 1, 1], [], []>} : vector<512x24xbf16>, vector<24x128xbf16>, vector<512x128xf32> -> vector<512x128xf32>
    %18 = arith.addf %12, %17 : vector<512x128xf32>
    %c0_16 = arith.constant 0 : index
    %c0_17 = arith.constant 0 : index
    %c0_18 = arith.constant 0 : index
    %19 = vector.load %arg5[%c0_16, %c0_17, %c0_18] : memref<1x512x128xf32, #tpu.memory_space<vmem>>, vector<1x512x128xf32>
    %20 = vector.shape_cast %19 : vector<1x512x128xf32> to vector<512x128xf32>
    %21 = vector.shape_cast %18 : vector<512x128xf32> to vector<1x512x128xf32>
    tpu.vector_store %arg5[%c0_16, %c0_17, %c0_18], %21 {strides = array<i32>} : memref<1x512x128xf32, #tpu.memory_space<vmem>>, vector<1x512x128xf32>,
    %c0_19 = arith.constant 0 : index
    %c0_20 = arith.constant 0 : index
    %22 = vector.load %arg4[%c0_19, %c0_20] : memref<512x1xf32, #tpu.memory_space<vmem>>, vector<512x1xf32>
    %23 = vector.broadcast %22 : vector<512x1xf32> to vector<512x128xf32>
    %24 = arith.mulf %18, %23 : vector<512x128xf32>
    %cst_21 = arith.constant dense<0.000000e+00> : vector<128xf32>
    %25 = vector.multi_reduction <add>, %24, %cst_21 [0] : vector<512x128xf32> to vector<128xf32>
    %26 = vector.shape_cast %25 : vector<128xf32> to vector<1x128xf32>
    %c0_22 = arith.constant 0 : index
    %c0_23 = arith.constant 0 : index
    %c0_24 = arith.constant 0 : index
    %27 = vector.load %arg6[%c0_22, %c0_23, %c0_24] : memref<1x1x128xf32, #tpu.memory_space<vmem>>, vector<1x1x128xf32>
    %28 = vector.shape_cast %27 : vector<1x1x128xf32> to vector<1x128xf32>
    %29 = vector.shape_cast %26 : vector<1x128xf32> to vector<1x1x128xf32>
    tpu.vector_store %arg6[%c0_22, %c0_23, %c0_24], %29 {strides = array<i32>} : memref<1x1x128xf32, #tpu.memory_space<vmem>>, vector<1x1x128xf32>,
    %30 = arith.mulf %24, %18 : vector<512x128xf32>
    %cst_25 = arith.constant dense<0.000000e+00> : vector<128xf32>
    %31 = vector.multi_reduction <add>, %30, %cst_25 [0] : vector<512x128xf32> to vector<128xf32>
    %32 = vector.shape_cast %31 : vector<128xf32> to vector<1x128xf32>
    %c0_26 = arith.constant 0 : index
    %c0_27 = arith.constant 0 : index
    %c0_28 = arith.constant 0 : index
    %33 = vector.load %arg7[%c0_26, %c0_27, %c0_28] : memref<1x1x128xf32, #tpu.memory_space<vmem>>, vector<1x1x128xf32>
    %34 = vector.shape_cast %33 : vector<1x1x128xf32> to vector<1x128xf32>
    %35 = vector.shape_cast %32 : vector<1x128xf32> to vector<1x1x128xf32>
    tpu.vector_store %arg7[%c0_26, %c0_27, %c0_28], %35 {strides = array<i32>} : memref<1x1x128xf32, #tpu.memory_space<vmem>>, vector<1x1x128xf32>,
    return
  }
  func.func @transform_0(%arg0: i32, %arg1: i32) -> (i32, i32, i32) {
    %c0_i32 = arith.constant 0 : i32
    %c0_i32_0 = arith.constant 0 : i32
    %c0_i32_1 = arith.constant 0 : i32
    return %arg0, %c0_i32, %c0_i32_0 : i32, i32, i32
  }
  func.func @transform_1(%arg0: i32, %arg1: i32) -> (i32, i32, i32) {
    %c0_i32 = arith.constant 0 : i32
    %c0_i32_0 = arith.constant 0 : i32
    %c0_i32_1 = arith.constant 0 : i32
    return %c0_i32, %c0_i32_0, %arg1 : i32, i32, i32
  }
  func.func @transform_2(%arg0: i32, %arg1: i32) -> (i32, i32) {
    %c0_i32 = arith.constant 0 : i32
    %c0_i32_0 = arith.constant 0 : i32
    %c0_i32_1 = arith.constant 0 : i32
    return %c0_i32, %c0_i32_0 : i32, i32
  }
  func.func @transform_3(%arg0: i32, %arg1: i32) -> (i32, i32, i32) {
    %c0_i32 = arith.constant 0 : i32
    %c0_i32_0 = arith.constant 0 : i32
    return %arg0, %c0_i32, %arg1 : i32, i32, i32
  }
  func.func @transform_4(%arg0: i32, %arg1: i32) -> (i32, i32, i32) {
    %c0_i32 = arith.constant 0 : i32
    %c0_i32_0 = arith.constant 0 : i32
    return %arg0, %c0_i32, %arg1 : i32, i32, i32
  }
  func.func @transform_5(%arg0: i32, %arg1: i32) -> (i32, i32, i32) {
    %c0_i32 = arith.constant 0 : i32
    %c0_i32_0 = arith.constant 0 : i32
    return %arg0, %c0_i32, %arg1 : i32, i32, i32
  }
}

module attributes {stable_mosaic.version = 11 : i64} {
  func.func @conv3x3_kernel(%arg0: i32, %arg1: i32, %arg2: memref<1x576x12xbf16, #tpu.memory_space<vmem>>, %arg3: memref<3x12x128xbf16, #tpu.memory_space<vmem>>, %arg4: memref<512x1xf32, #tpu.memory_space<vmem>>, %arg5: memref<1x512x128xf32, #tpu.memory_space<vmem>>, %arg6: memref<1x1x128xf32, #tpu.memory_space<vmem>>, %arg7: memref<1x1x128xf32, #tpu.memory_space<vmem>>) attributes {dimension_semantics = [#tpu.dimension_semantics<parallel>, #tpu.dimension_semantics<parallel>], iteration_bounds = array<i64: 2, 1>, scalar_prefetch = 0 : i64, scratch_operands = 0 : i64, tpu.core_type = #tpu.core_type<tc>, window_params = [{transform_indices = @transform_0, window_bounds = array<i64: 1, 576, 12>}, {transform_indices = @transform_1, window_bounds = array<i64: 3, 12, 128>}, {pipeline_mode = #tpu.pipeline_mode<synchronous>, transform_indices = @transform_2, window_bounds = array<i64: 512, 1>}, {transform_indices = @transform_3, window_bounds = array<i64: 1, 512, 128>}, {transform_indices = @transform_4, window_bounds = array<i64: 1, 1, 128>}, {transform_indices = @transform_5, window_bounds = array<i64: 1, 1, 128>}]} {
    %cst = arith.constant 0.000000e+00 : f32
    %0 = vector.broadcast %cst : f32 to vector<512x128xf32>
    %c0 = arith.constant 0 : index
    %c0_0 = arith.constant 0 : index
    %c0_1 = arith.constant 0 : index
    %1 = vector.load %arg2[%c0, %c0_0, %c0_1] : memref<1x576x12xbf16, #tpu.memory_space<vmem>>, vector<1x512x12xbf16>
    %2 = vector.shape_cast %1 : vector<1x512x12xbf16> to vector<512x12xbf16>
    %c0_2 = arith.constant 0 : index
    %c0_3 = arith.constant 0 : index
    %c0_4 = arith.constant 0 : index
    %3 = vector.load %arg3[%c0_2, %c0_3, %c0_4] : memref<3x12x128xbf16, #tpu.memory_space<vmem>>, vector<1x12x128xbf16>
    %4 = vector.shape_cast %3 : vector<1x12x128xbf16> to vector<12x128xbf16>
    %cst_5 = arith.constant dense<0.000000e+00> : vector<512x128xf32>
    %5 = tpu.matmul %2, %4, %cst_5 {dimension_numbers = #tpu.dot_dimension_numbers<[1], [0], [0], [1], [0, 0, 1, 1], [], []>} : vector<512x12xbf16>, vector<12x128xbf16>, vector<512x128xf32> -> vector<512x128xf32>
    %6 = arith.addf %0, %5 : vector<512x128xf32>
    %c0_6 = arith.constant 0 : index
    %c32 = arith.constant 32 : index
    %c0_7 = arith.constant 0 : index
    %7 = vector.load %arg2[%c0_6, %c32, %c0_7] : memref<1x576x12xbf16, #tpu.memory_space<vmem>>, vector<1x512x12xbf16>
    %8 = vector.shape_cast %7 : vector<1x512x12xbf16> to vector<512x12xbf16>
    %c1 = arith.constant 1 : index
    %c0_8 = arith.constant 0 : index
    %c0_9 = arith.constant 0 : index
    %9 = vector.load %arg3[%c1, %c0_8, %c0_9] : memref<3x12x128xbf16, #tpu.memory_space<vmem>>, vector<1x12x128xbf16>
    %10 = vector.shape_cast %9 : vector<1x12x128xbf16> to vector<12x128xbf16>
    %cst_10 = arith.constant dense<0.000000e+00> : vector<512x128xf32>
    %11 = tpu.matmul %8, %10, %cst_10 {dimension_numbers = #tpu.dot_dimension_numbers<[1], [0], [0], [1], [0, 0, 1, 1], [], []>} : vector<512x12xbf16>, vector<12x128xbf16>, vector<512x128xf32> -> vector<512x128xf32>
    %12 = arith.addf %6, %11 : vector<512x128xf32>
    %c0_11 = arith.constant 0 : index
    %c64 = arith.constant 64 : index
    %c0_12 = arith.constant 0 : index
    %13 = vector.load %arg2[%c0_11, %c64, %c0_12] : memref<1x576x12xbf16, #tpu.memory_space<vmem>>, vector<1x512x12xbf16>
    %14 = vector.shape_cast %13 : vector<1x512x12xbf16> to vector<512x12xbf16>
    %c2 = arith.constant 2 : index
    %c0_13 = arith.constant 0 : index
    %c0_14 = arith.constant 0 : index
    %15 = vector.load %arg3[%c2, %c0_13, %c0_14] : memref<3x12x128xbf16, #tpu.memory_space<vmem>>, vector<1x12x128xbf16>
    %16 = vector.shape_cast %15 : vector<1x12x128xbf16> to vector<12x128xbf16>
    %cst_15 = arith.constant dense<0.000000e+00> : vector<512x128xf32>
    %17 = tpu.matmul %14, %16, %cst_15 {dimension_numbers = #tpu.dot_dimension_numbers<[1], [0], [0], [1], [0, 0, 1, 1], [], []>} : vector<512x12xbf16>, vector<12x128xbf16>, vector<512x128xf32> -> vector<512x128xf32>
    %18 = arith.addf %12, %17 : vector<512x128xf32>
    %c0_16 = arith.constant 0 : index
    %c0_17 = arith.constant 0 : index
    %c0_18 = arith.constant 0 : index
    %19 = vector.load %arg5[%c0_16, %c0_17, %c0_18] : memref<1x512x128xf32, #tpu.memory_space<vmem>>, vector<1x512x128xf32>
    %20 = vector.shape_cast %19 : vector<1x512x128xf32> to vector<512x128xf32>
    %21 = vector.shape_cast %18 : vector<512x128xf32> to vector<1x512x128xf32>
    tpu.vector_store %arg5[%c0_16, %c0_17, %c0_18], %21 {strides = array<i32>} : memref<1x512x128xf32, #tpu.memory_space<vmem>>, vector<1x512x128xf32>,
    %c0_19 = arith.constant 0 : index
    %c0_20 = arith.constant 0 : index
    %22 = vector.load %arg4[%c0_19, %c0_20] : memref<512x1xf32, #tpu.memory_space<vmem>>, vector<512x1xf32>
    %23 = vector.broadcast %22 : vector<512x1xf32> to vector<512x128xf32>
    %24 = arith.mulf %18, %23 : vector<512x128xf32>
    %cst_21 = arith.constant dense<0.000000e+00> : vector<128xf32>
    %25 = vector.multi_reduction <add>, %24, %cst_21 [0] : vector<512x128xf32> to vector<128xf32>
    %26 = vector.shape_cast %25 : vector<128xf32> to vector<1x128xf32>
    %c0_22 = arith.constant 0 : index
    %c0_23 = arith.constant 0 : index
    %c0_24 = arith.constant 0 : index
    %27 = vector.load %arg6[%c0_22, %c0_23, %c0_24] : memref<1x1x128xf32, #tpu.memory_space<vmem>>, vector<1x1x128xf32>
    %28 = vector.shape_cast %27 : vector<1x1x128xf32> to vector<1x128xf32>
    %29 = vector.shape_cast %26 : vector<1x128xf32> to vector<1x1x128xf32>
    tpu.vector_store %arg6[%c0_22, %c0_23, %c0_24], %29 {strides = array<i32>} : memref<1x1x128xf32, #tpu.memory_space<vmem>>, vector<1x1x128xf32>,
    %30 = arith.mulf %24, %18 : vector<512x128xf32>
    %cst_25 = arith.constant dense<0.000000e+00> : vector<128xf32>
    %31 = vector.multi_reduction <add>, %30, %cst_25 [0] : vector<512x128xf32> to vector<128xf32>
    %32 = vector.shape_cast %31 : vector<128xf32> to vector<1x128xf32>
    %c0_26 = arith.constant 0 : index
    %c0_27 = arith.constant 0 : index
    %c0_28 = arith.constant 0 : index
    %33 = vector.load %arg7[%c0_26, %c0_27, %c0_28] : memref<1x1x128xf32, #tpu.memory_space<vmem>>, vector<1x1x128xf32>
    %34 = vector.shape_cast %33 : vector<1x1x128xf32> to vector<1x128xf32>
    %35 = vector.shape_cast %32 : vector<1x128xf32> to vector<1x1x128xf32>
    tpu.vector_store %arg7[%c0_26, %c0_27, %c0_28], %35 {strides = array<i32>} : memref<1x1x128xf32, #tpu.memory_space<vmem>>, vector<1x1x128xf32>,
    return
  }
  func.func @transform_0(%arg0: i32, %arg1: i32) -> (i32, i32, i32) {
    %c0_i32 = arith.constant 0 : i32
    %c0_i32_0 = arith.constant 0 : i32
    %c0_i32_1 = arith.constant 0 : i32
    return %arg0, %c0_i32, %c0_i32_0 : i32, i32, i32
  }
  func.func @transform_1(%arg0: i32, %arg1: i32) -> (i32, i32, i32) {
    %c0_i32 = arith.constant 0 : i32
    %c0_i32_0 = arith.constant 0 : i32
    %c0_i32_1 = arith.constant 0 : i32
    return %c0_i32, %c0_i32_0, %arg1 : i32, i32, i32
  }
  func.func @transform_2(%arg0: i32, %arg1: i32) -> (i32, i32) {
    %c0_i32 = arith.constant 0 : i32
    %c0_i32_0 = arith.constant 0 : i32
    %c0_i32_1 = arith.constant 0 : i32
    return %c0_i32, %c0_i32_0 : i32, i32
  }
  func.func @transform_3(%arg0: i32, %arg1: i32) -> (i32, i32, i32) {
    %c0_i32 = arith.constant 0 : i32
    %c0_i32_0 = arith.constant 0 : i32
    return %arg0, %c0_i32, %arg1 : i32, i32, i32
  }
  func.func @transform_4(%arg0: i32, %arg1: i32) -> (i32, i32, i32) {
    %c0_i32 = arith.constant 0 : i32
    %c0_i32_0 = arith.constant 0 : i32
    return %arg0, %c0_i32, %arg1 : i32, i32, i32
  }
  func.func @transform_5(%arg0: i32, %arg1: i32) -> (i32, i32, i32) {
    %c0_i32 = arith.constant 0 : i32
    %c0_i32_0 = arith.constant 0 : i32
    return %arg0, %c0_i32, %arg1 : i32, i32, i32
  }
}

module attributes {stable_mosaic.version = 11 : i64} {
  func.func @bn_relu_kernel(%arg0: i32, %arg1: memref<1x512x128xf32, #tpu.memory_space<vmem>>, %arg2: memref<1x1x128xf32, #tpu.memory_space<vmem>>, %arg3: memref<1x1x128xf32, #tpu.memory_space<vmem>>, %arg4: memref<1x512x128xf32, #tpu.memory_space<vmem>>) attributes {dimension_semantics = [#tpu.dimension_semantics<parallel>], iteration_bounds = array<i64: 2>, scalar_prefetch = 0 : i64, scratch_operands = 0 : i64, tpu.core_type = #tpu.core_type<tc>, window_params = [{transform_indices = @transform_0, window_bounds = array<i64: 1, 512, 128>}, {pipeline_mode = #tpu.pipeline_mode<synchronous>, transform_indices = @transform_1, window_bounds = array<i64: 1, 1, 128>}, {pipeline_mode = #tpu.pipeline_mode<synchronous>, transform_indices = @transform_2, window_bounds = array<i64: 1, 1, 128>}, {transform_indices = @transform_3, window_bounds = array<i64: 1, 512, 128>}]} {
    %c0 = arith.constant 0 : index
    %c0_0 = arith.constant 0 : index
    %c0_1 = arith.constant 0 : index
    %0 = vector.load %arg1[%c0, %c0_0, %c0_1] : memref<1x512x128xf32, #tpu.memory_space<vmem>>, vector<1x512x128xf32>
    %c0_2 = arith.constant 0 : index
    %c0_3 = arith.constant 0 : index
    %c0_4 = arith.constant 0 : index
    %1 = vector.load %arg2[%c0_2, %c0_3, %c0_4] : memref<1x1x128xf32, #tpu.memory_space<vmem>>, vector<1x1x128xf32>
    %2 = vector.broadcast %1 : vector<1x1x128xf32> to vector<1x512x128xf32>
    %3 = arith.mulf %0, %2 : vector<1x512x128xf32>
    %c0_5 = arith.constant 0 : index
    %c0_6 = arith.constant 0 : index
    %c0_7 = arith.constant 0 : index
    %4 = vector.load %arg3[%c0_5, %c0_6, %c0_7] : memref<1x1x128xf32, #tpu.memory_space<vmem>>, vector<1x1x128xf32>
    %5 = vector.broadcast %4 : vector<1x1x128xf32> to vector<1x512x128xf32>
    %6 = arith.addf %3, %5 : vector<1x512x128xf32>
    %cst = arith.constant 0.000000e+00 : f32
    %7 = vector.broadcast %cst : f32 to vector<1x512x128xf32>
    %8 = arith.maximumf %6, %7 : vector<1x512x128xf32>
    %c0_8 = arith.constant 0 : index
    %c0_9 = arith.constant 0 : index
    %c0_10 = arith.constant 0 : index
    %9 = vector.load %arg4[%c0_8, %c0_9, %c0_10] : memref<1x512x128xf32, #tpu.memory_space<vmem>>, vector<1x512x128xf32>
    tpu.vector_store %arg4[%c0_8, %c0_9, %c0_10], %8 {strides = array<i32>} : memref<1x512x128xf32, #tpu.memory_space<vmem>>, vector<1x512x128xf32>,
    return
  }
  func.func @transform_0(%arg0: i32) -> (i32, i32, i32) {
    %c0_i32 = arith.constant 0 : i32
    %c0_i32_0 = arith.constant 0 : i32
    %c0_i32_1 = arith.constant 0 : i32
    return %arg0, %c0_i32, %c0_i32_0 : i32, i32, i32
  }
  func.func @transform_1(%arg0: i32) -> (i32, i32, i32) {
    %c0_i32 = arith.constant 0 : i32
    %c0_i32_0 = arith.constant 0 : i32
    %c0_i32_1 = arith.constant 0 : i32
    %c0_i32_2 = arith.constant 0 : i32
    return %c0_i32, %c0_i32_0, %c0_i32_1 : i32, i32, i32
  }
  func.func @transform_2(%arg0: i32) -> (i32, i32, i32) {
    %c0_i32 = arith.constant 0 : i32
    %c0_i32_0 = arith.constant 0 : i32
    %c0_i32_1 = arith.constant 0 : i32
    %c0_i32_2 = arith.constant 0 : i32
    return %c0_i32, %c0_i32_0, %c0_i32_1 : i32, i32, i32
  }
  func.func @transform_3(%arg0: i32) -> (i32, i32, i32) {
    %c0_i32 = arith.constant 0 : i32
    %c0_i32_0 = arith.constant 0 : i32
    %c0_i32_1 = arith.constant 0 : i32
    return %arg0, %c0_i32, %c0_i32_0 : i32, i32, i32
  }
}

</mosaic_0001>

<bundles_post_ra>
// kernel: upconv_forward_impl.4
= control target key start
LH: loop header
LB: loop body
LE: loop exit
PB: predicated region body
PF: predicated region fallthrough
CT: control target
= control target key end

     0   :  { %8 = vsyncpa [#allocation3], 0  ;;  %s1531_s12 = smov [#allocation2]   ;;  %s1671_s0 = inlined_call_operand.vmem [shape: f32[16,8], index: 0, kind: input, shape index: {}]   ;;  %s1672_s1 = inlined_call_operand.vmem [shape: f32[8,16], index: 1, kind: input, shape index: {}]   ;;  %s1673_s2 = inlined_call_operand.hbm [shape: f32[8,8,8], index: 2, kind: input, shape index: {}]   ;;  %s1674_s3 = inlined_call_operand.vmem [shape: f32[8,16,16], index: 3, kind: output, shape index: {}]  }
   0x1   :  { %s18_s13 = sshll.u32 %s1531_s12, 4  ;;  %s1507_s16 = scalar_lea.hbm %s1673_s2, 1024  ;;  %s19_s13 = int_to_ptr.vmem [resolvable:$true] %s18_s13 }
   0x2   :  { %p1508_p0 = scmp.ne.s32.totalorder %s1673_s2, %s1507_s16  ;;  %p1511_p1 = scmp.lt.u32.totalorder %s1507_s16, %s1673_s2 }
   0x4   :  { %p1513_p2 = pnand %p1511_p1, %p1508_p0 }
   0x6   :  { %1516 = shalt.err (!%p1513_p2)
}
   0x7   :  { %s1517_s21 = scalar_lea.vmem %s19_s13, 1024  ;;  %p1522_p4 = scmp.lt.s32.totalorder %s19_s13, %s19_s13 }
   0x8   :  { %p1518_p3 = scmp.ne.s32.totalorder %s19_s13, %s1517_s21  ;;  %p1523_p5 = scmp.lt.s32.totalorder %s1517_s21, %s1517_s21 }
   0xa   :  { %p1524_p6 = por %p1523_p5, %p1522_p4 }
   0xc   :  { %p1525_p7 = pnand %p1524_p6, %p1518_p3 }
   0xe   :  { %1528 = shalt.err (!%p1525_p7)
}
   0xf   :  { %s1532_s22 = smov 128   ;;  %s1533_s23 = smov 8  }
  0x10   :  { %24 = dma.hbm_to_vmem [thread:$0]  %s1673_s2, 1024, %s19_s13, [#allocation3], %s1532_s22, %s1532_s22, %s1533_s23  }
  0x11   :  { %1529 = dma.done.wait [#allocation3], 1024  }
  0x12   :  { %1530 = vsyncadd [#allocation3], 4294966272  ;;  %vm32_vm0 = vcmask 64512   ;;  %v31_v0 = vld [vmem:[#allocation2] sm:$0xff]  ;;  %v29_v2 = vld [vmem:[%s1671_s0 + $0x8] sm:$0xff]  ;;  %vm195_vm1 = vcmask 130048  }
  0x13   :  { %v28_v1 = vld [vmem:[%s1671_s0] sm:$0xff]  ;;  %1424 = vmatprep.subr.mxu0 %v31_v0  ;;  %v199_v3 = vld [vmem:[#allocation2 + $0x8] sm:$0xff]  ;;  %v360_v4 = vld [vmem:[#allocation2 + $0x10] sm:$0xff] }
  0x14   :  { %1426 = vmatprep.mubr.msk.f32.mxu0 %vm32_vm0, %v28_v1  ;;  %1425 = vmatpush3.msra.mxu0 %v31_v0  ;;  %v521_v5 = vld [vmem:[#allocation2 + $0x18] sm:$0xff]  ;;  %v682_v6 = vld [vmem:[#allocation2 + $0x20] sm:$0xff]  ;;  %v843_v7 = vld [vmem:[#allocation2 + $0x28] sm:$0xff] }
  0x15   :  { %1427 = vmatmul.mubr.msk.f32.vlgmr.msra.gmra.mrb[0].mxu0 %vm32_vm0, %v29_v2  ;;  %1434 = vmatprep.subr.mxu0 %v199_v3  ;;  %v1004_v8 = vld [vmem:[#allocation2 + $0x30] sm:$0xff]  ;;  %v1165_v9 = vld [vmem:[#allocation2 + $0x38] sm:$0xff]  ;;  %v30_v10 = vld [vmem:[%s1672_s1] sm:$0xff] }
  0x16   :  { %1435 = vmatpush3.msra.mxu0 %v199_v3  ;;  %1436 = vmatprep.mubr.msk.f32.mxu0 %vm32_vm0, %v28_v1 }
  0x17   :  { %1444 = vmatprep.subr.mxu0 %v360_v4  ;;  %1429 = vmatprep.subr.mxu1 %v30_v10 }
  0x18   :  { %1430 = vmatpush3.msra.mxu1 %v30_v10 }
  0x19   :  { %1437 = vmatmul.mubr.msk.f32.vlgmr.msra.gmra.mrb[2].mxu0 %vm32_vm0, %v29_v2  ;;  %1439 = vmatprep.subr.mxu1 %v30_v10 }
  0x1a   :  { %1445 = vmatpush3.msra.mxu0 %v360_v4  ;;  %1446 = vmatprep.mubr.msk.f32.mxu0 %vm32_vm0, %v28_v1 }
  0x1b   :  { %1454 = vmatprep.subr.mxu0 %v521_v5 }
  0x1d   :  { %1447 = vmatmul.mubr.msk.f32.vlgmr.msra.gmra.mrb[4].mxu0 %vm32_vm0, %v29_v2 }
  0x1e   :  { %1455 = vmatpush3.msra.mxu0 %v521_v5  ;;  %1456 = vmatprep.mubr.msk.f32.mxu0 %vm32_vm0, %v28_v1 }
  0x1f   :  { %1464 = vmatprep.subr.mxu0 %v682_v6 }
  0x21   :  { %1457 = vmatmul.mubr.msk.f32.vlgmr.msra.gmra.mrb[6].mxu0 %vm32_vm0, %v29_v2 }
  0x22   :  { %1465 = vmatpush3.msra.mxu0 %v682_v6  ;;  %1466 = vmatprep.mubr.msk.f32.mxu0 %vm32_vm0, %v28_v1 }
  0x23   :  { %1474 = vmatprep.subr.mxu0 %v843_v7 }
  0x25   :  { %1467 = vmatmul.mubr.msk.f32.vlgmr.msra.gmra.mrb[8].mxu0 %vm32_vm0, %v29_v2 }
  0x26   :  { %1475 = vmatpush3.msra.mxu0 %v843_v7  ;;  %1476 = vmatprep.mubr.msk.f32.mxu0 %vm32_vm0, %v28_v1 }
  0x27   :  { %1484 = vmatprep.subr.mxu0 %v1004_v8 }
  0x29   :  { %1477 = vmatmul.mubr.msk.f32.vlgmr.msra.gmra.mrb[10].mxu0 %vm32_vm0, %v29_v2 }
  0x2a   :  { %1485 = vmatpush3.msra.mxu0 %v1004_v8  ;;  %1486 = vmatprep.mubr.msk.f32.mxu0 %vm32_vm0, %v28_v1 }
  0x2b   :  { %1494 = vmatprep.subr.mxu0 %v1165_v9 }
  0x2d   :  { %1487 = vmatmul.mubr.msk.f32.vlgmr.msra.gmra.mrb[12].mxu0 %vm32_vm0, %v29_v2 }
  0x2e   :  { %1495 = vmatpush3.msra.mxu0 %v1165_v9  ;;  %1496 = vmatprep.mubr.msk.f32.mxu0 %vm32_vm0, %v28_v1 }
  0x31   :  { %1497 = vmatmul.mubr.msk.f32.vlgmr.msra.gmra.mrb[14].mxu0 %vm32_vm0, %v29_v2 }
  0xe8   :  { %v1428_v11 = vpop.f32.mrb[0].mxu0 }
  0xe9   :  { %v105_v12 = vpop.f32.mrb[1].mxu0 }
  0xea   :  { %1431 = vmatprep.mubr.msk.f32.mxu1 %vm32_vm0, %v105_v12 }
  0xeb   :  { %1432 = vmatmul.mubr.msk.f32.vlgmr.msra.gmra.mrb[0].mxu1 %vm32_vm0, %v1428_v11 }
  0xec   :  { %v1438_v13 = vpop.f32.mrb[2].mxu0  ;;  %1440 = vmatpush3.msra.mxu1 %v30_v10 }
  0xed   :  { %v266_v14 = vpop.f32.mrb[3].mxu0  ;;  %1449 = vmatprep.subr.mxu1 %v30_v10 }
  0xee   :  { %1441 = vmatprep.mubr.msk.f32.mxu1 %vm32_vm0, %v266_v14 }
  0xef   :  { %1442 = vmatmul.mubr.msk.f32.vlgmr.msra.gmra.mrb[2].mxu1 %vm32_vm0, %v1438_v13 }
  0xf0   :  { %v1448_v15 = vpop.f32.mrb[4].mxu0  ;;  %1450 = vmatpush3.msra.mxu1 %v30_v10 }
  0xf1   :  { %v427_v16 = vpop.f32.mrb[5].mxu0  ;;  %1459 = vmatprep.subr.mxu1 %v30_v10 }
  0xf2   :  { %1451 = vmatprep.mubr.msk.f32.mxu1 %vm32_vm0, %v427_v16 }
  0xf3   :  { %1452 = vmatmul.mubr.msk.f32.vlgmr.msra.gmra.mrb[4].mxu1 %vm32_vm0, %v1448_v15 }
  0xf4   :  { %v1458_v17 = vpop.f32.mrb[6].mxu0  ;;  %1460 = vmatpush3.msra.mxu1 %v30_v10 }
  0xf5   :  { %v588_v18 = vpop.f32.mrb[7].mxu0  ;;  %1469 = vmatprep.subr.mxu1 %v30_v10 }
  0xf6   :  { %1461 = vmatprep.mubr.msk.f32.mxu1 %vm32_vm0, %v588_v18 }
  0xf7   :  { %1462 = vmatmul.mubr.msk.f32.vlgmr.msra.gmra.mrb[6].mxu1 %vm32_vm0, %v1458_v17 }
  0xf8   :  { %v1468_v19 = vpop.f32.mrb[8].mxu0  ;;  %1470 = vmatpush3.msra.mxu1 %v30_v10 }
  0xf9   :  { %v749_v20 = vpop.f32.mrb[9].mxu0  ;;  %1479 = vmatprep.subr.mxu1 %v30_v10 }
  0xfa   :  { %1471 = vmatprep.mubr.msk.f32.mxu1 %vm32_vm0, %v749_v20 }
  0xfb   :  { %1472 = vmatmul.mubr.msk.f32.vlgmr.msra.gmra.mrb[8].mxu1 %vm32_vm0, %v1468_v19 }
  0xfc   :  { %v1478_v21 = vpop.f32.mrb[10].mxu0  ;;  %1480 = vmatpush3.msra.mxu1 %v30_v10 }
  0xfd   :  { %v910_v22 = vpop.f32.mrb[11].mxu0  ;;  %1489 = vmatprep.subr.mxu1 %v30_v10 }
  0xfe   :  { %1481 = vmatprep.mubr.msk.f32.mxu1 %vm32_vm0, %v910_v22 }
  0xff   :  { %1482 = vmatmul.mubr.msk.f32.vlgmr.msra.gmra.mrb[10].mxu1 %vm32_vm0, %v1478_v21 }
 0x100   :  { %v1488_v23 = vpop.f32.mrb[12].mxu0  ;;  %1490 = vmatpush3.msra.mxu1 %v30_v10 }
 0x101   :  { %v1071_v24 = vpop.f32.mrb[13].mxu0  ;;  %1499 = vmatprep.subr.mxu1 %v30_v10 }
 0x102   :  { %1491 = vmatprep.mubr.msk.f32.mxu1 %vm32_vm0, %v1071_v24 }
 0x103   :  { %1492 = vmatmul.mubr.msk.f32.vlgmr.msra.gmra.mrb[12].mxu1 %vm32_vm0, %v1488_v23 }
 0x104   :  { %v1498_v25 = vpop.f32.mrb[14].mxu0  ;;  %1500 = vmatpush3.msra.mxu1 %v30_v10 }
 0x105   :  { %v1232_v26 = vpop.f32.mrb[15].mxu0 }
 0x106   :  { %1501 = vmatprep.mubr.msk.f32.mxu1 %vm32_vm0, %v1232_v26 }
 0x107   :  { %1502 = vmatmul.mubr.msk.f32.vlgmr.msra.gmra.mrb[14].mxu1 %vm32_vm0, %v1498_v25 }
 0x1be   :  { %v1433_v27 = vpop.f32.mrb[0].mxu1 }
 0x1bf   :  { %197 = vst.msk [vmem:[%s1674_s3 + $0x8] sm:$0xff] %vm195_vm1, %v1433_v27  ;;  %v186_v28 = vpop.f32.mrb[1].mxu1 }
 0x1c0   :  { %196 = vst.msk [vmem:[%s1674_s3] sm:$0xff] %vm195_vm1, %v186_v28 }
 0x1c2   :  { %v1443_v29 = vpop.f32.mrb[2].mxu1 }
 0x1c3   :  { %1339 = vst.msk [vmem:[%s1674_s3 + $0x18] sm:$0xff] %vm195_vm1, %v1443_v29  ;;  %v347_v30 = vpop.f32.mrb[3].mxu1 }
 0x1c4   :  { %1338 = vst.msk [vmem:[%s1674_s3 + $0x10] sm:$0xff] %vm195_vm1, %v347_v30 }
 0x1c6   :  { %v1453_v31 = vpop.f32.mrb[4].mxu1 }
 0x1c7   :  { %1345 = vst.msk [vmem:[%s1674_s3 + $0x28] sm:$0xff] %vm195_vm1, %v1453_v31  ;;  %v508_v32 = vpop.f32.mrb[5].mxu1 }
 0x1c8   :  { %1344 = vst.msk [vmem:[%s1674_s3 + $0x20] sm:$0xff] %vm195_vm1, %v508_v32 }
 0x1ca   :  { %v1463_v33 = vpop.f32.mrb[6].mxu1 }
 0x1cb   :  { %1351 = vst.msk [vmem:[%s1674_s3 + $0x38] sm:$0xff] %vm195_vm1, %v1463_v33  ;;  %v669_v34 = vpop.f32.mrb[7].mxu1 }
 0x1cc   :  { %1350 = vst.msk [vmem:[%s1674_s3 + $0x30] sm:$0xff] %vm195_vm1, %v669_v34 }
 0x1ce   :  { %v1473_v35 = vpop.f32.mrb[8].mxu1 }
 0x1cf   :  { %1357 = vst.msk [vmem:[%s1674_s3 + $0x48] sm:$0xff] %vm195_vm1, %v1473_v35  ;;  %v830_v36 = vpop.f32.mrb[9].mxu1 }
 0x1d0   :  { %1356 = vst.msk [vmem:[%s1674_s3 + $0x40] sm:$0xff] %vm195_vm1, %v830_v36 }
 0x1d2   :  { %v1483_v37 = vpop.f32.mrb[10].mxu1 }
 0x1d3   :  { %1363 = vst.msk [vmem:[%s1674_s3 + $0x58] sm:$0xff] %vm195_vm1, %v1483_v37  ;;  %v991_v38 = vpop.f32.mrb[11].mxu1 }
 0x1d4   :  { %1362 = vst.msk [vmem:[%s1674_s3 + $0x50] sm:$0xff] %vm195_vm1, %v991_v38 }
 0x1d6   :  { %v1493_v39 = vpop.f32.mrb[12].mxu1 }
 0x1d7   :  { %1369 = vst.msk [vmem:[%s1674_s3 + $0x68] sm:$0xff] %vm195_vm1, %v1493_v39  ;;  %v1152_v40 = vpop.f32.mrb[13].mxu1 }
 0x1d8   :  { %1368 = vst.msk [vmem:[%s1674_s3 + $0x60] sm:$0xff] %vm195_vm1, %v1152_v40 }
 0x1da   :  { %v1503_v41 = vpop.f32.mrb[14].mxu1 }
 0x1db   :  { %1375 = vst.msk [vmem:[%s1674_s3 + $0x78] sm:$0xff] %vm195_vm1, %v1503_v41  ;;  %v1313_v42 = vpop.f32.mrb[15].mxu1 }
 0x1dc   :  { %1374 = vst.msk [vmem:[%s1674_s3 + $0x70] sm:$0xff] %vm195_vm1, %v1313_v42 }
 0x1dd   :  { %1329 = vsyncpa [#allocation3], 1 }

// kernel: upconv_forward_impl.5
= control target key start
LH: loop header
LB: loop body
LE: loop exit
PB: predicated region body
PF: predicated region fallthrough
CT: control target
= control target key end

     0   :  { %s3598_s18 = smov 0   ;;  %s3600_s19 = smov 0   ;;  %s4415_s0 = inlined_call_operand.vmem [shape: bf16[2,576,24], index: 0, kind: input, shape index: {}]   ;;  %s4416_s1 = inlined_call_operand.vmem [shape: bf16[3,24,128], index: 1, kind: input, shape index: {}]   ;;  %s4417_s2 = inlined_call_operand.vmem [shape: f32[512,1], index: 2, kind: input, shape index: {}]   ;;  %s4418_s3 = inlined_call_operand.vmem [shape: f32[2,512,128], index: 3, kind: output, shape index: {0}]   ;;  %s4419_s4 = inlined_call_operand.vmem [shape: f32[2,1,128], index: 4, kind: output, shape index: {1}]   ;;  %s4420_s5 = inlined_call_operand.vmem [shape: f32[2,1,128], index: 5, kind: output, shape index: {2}]  }
   0x1   :  { %s3602_s20 = smov 0  }
   0x2 LB: > { %s28_s21 = sadd.s32 1, %s3561_s19  ;;  %p2820_p0 = scmp.ge.s32.totalorder %s3565_s20, 1  ;;  %s3565_s20 = sphi %s3602_s20, %s16_s20   ;;  %s3561_s19 = sphi %s3600_s19, %s4444_s19   ;;  %s3557_s18 = sphi %s3598_s18, %s4443_s18  }
   0x3   : > { %p30_p1 = scmp.ge.s32.totalorder %s28_s21, 2  ;;  %p219_p2 = scmp.lt.s32.totalorder %s3565_s20, 3 }
   0x5   : > { %s4446_s21 = smov (%p30_p1, %s28_s21), 0  ;;  %p220_p3 = pnand %p2820_p0, %p219_p2 }
   0x7   : > { %223 = sbr.rel (%p220_p3) target bundleno = 448 (0x1c0), region = 32 }
   0xe   : > { %v3471_v0 = vld [vmem:[%s4416_s1 + $0xc] sm:$0xff]   ;;  %vm637_vm0 = vcmask 1043456   ;;  %v3472_v1 = vld [vmem:[%s4416_s1] sm:$0xff]   ;;  %p266_p4 = scmp.lt.s32.totalorder %s3557_s18, 1  ;;  %v3473_v2 = vld [vmem:[%s4416_s1 + $0x14] ss:$0 sps:$4 sm:$0xff]  }
   0xf   : > { %3103 = vmatprep.subr.bf16.mxu1 %v3471_v0  ;;  %3171 = vmatprep.subr.bf16.mxu0 %v3472_v1  ;;  %v3474_v3 = vld [vmem:[%s4416_s1 + $0x8] ss:$0 sps:$4 sm:$0xff]   ;;  %v639_v4 = vsel %vm637_vm0, %v3473_v2, 0  ;;  %v2000_v5 = vld [vmem:[%s4417_s2] sm:$0xff]  ;;  %v3479_v7 = vld [vmem:[%s4416_s1 + $0x18] sm:$0xff]   ;;  %v3567_v8 = vmov 0  }
  0x10   : > { %3104 = vmatpush3.bf16.msra.mxu1 %v3471_v0  ;;  %s4448_s18 = smov (!%p266_p4, %s3557_s18), 1  ;;  %3172 = vmatpush3.bf16.msra.mxu0 %v3472_v1  ;;  %v956_v6 = vsel %vm637_vm0, %v3474_v3, 0  ;;  %v2002_v9 = vld [vmem:[%s4417_s2 + $0x10] sm:$0xff]  ;;  %vm540_vm1 = vcmask 195584   ;;  %v2001_v10 = vld [vmem:[%s4417_s2 + $0x8] sm:$0xff]  ;;  %v2003_v11 = vld [vmem:[%s4417_s2 + $0x18] sm:$0xff] }
  0x11   : > { %3439 = vmatprep.subr.msk.bf16.mxu1 %vm637_vm0, %v3473_v2  ;;  %3440 = vmatprep.subr.msk.bf16.mxu0 %vm637_vm0, %v3474_v3  ;;  %s3443_s7 = smul.u32 288, %s4448_s18  ;;  %v3488_v14 = vld [vmem:[%s4416_s1 + $0x20] ss:$0 sps:$4 sm:$0xff]   ;;  %v2005_v19 = vld [vmem:[%s4417_s2 + $0x28] sm:$0xff]  ;;  %v2006_v21 = vld [vmem:[%s4417_s2 + $0x30] sm:$0xff]  ;;  %s288_s30 = scalar_lea.vmem %s4419_s4, %s4448_s18 }
  0x12   : > { %3469 = vset.pattern.permute.xlu0 %v3567_v8  ;;  %3470 = vset.pattern.permute.xlu1 %v3567_v8  ;;  %v2004_v17 = vld [vmem:[%s4417_s2 + $0x20] sm:$0xff]  ;;  %v1581_v20 = vsel %vm637_vm0, %v3488_v14, 0  ;;  %v2007_v24 = vld [vmem:[%s4417_s2 + $0x38] sm:$0xff]  ;;  %v2009_v26 = vld [vmem:[%s4417_s2 + $0x48] sm:$0xff]  ;;  %s294_s8 = scalar_lea.vmem %s4420_s5, %s4448_s18 }
  0x13   : > { %2066 = vperm.xlu0 %3469, %v2000_v5   ;;  %s3647_s14 = scalar_lea.vmem %s4415_s0, %s3443_s7  ;;  %2076 = vperm.xlu1 %3470, %v2002_v9   ;;  %v2008_v25 = vld [vmem:[%s4417_s2 + $0x40] sm:$0xff]  ;;  %v2010_v29 = vld [vmem:[%s4417_s2 + $0x50] sm:$0xff]  ;;  %v2011_v30 = vld [vmem:[%s4417_s2 + $0x58] sm:$0xff] }
  0x14   : > { %3106 = vmatpush3.bf16.msra.mxu1 %v639_v4  ;;  %3174 = vmatpush3.bf16.msra.mxu0 %v956_v6  ;;  %v3475_v12 = vld [vmem:[%s3647_s14 + $0x10] sm:$0xff]   ;;  %v3476_v13 = vld [vmem:[%s3647_s14] sm:$0xff]   ;;  %v3477_v15 = vld [vmem:[%s3647_s14 + $0x18] sm:$0xff]  }
  0x15   : > { %3307 = vmatprep.subr.bf16.mxu1 %v3472_v1  ;;  %3239 = vmatprep.subr.bf16.mxu0 %v3479_v7  ;;  %v3478_v16 = vld [vmem:[%s3647_s14 + $0x8] sm:$0xff]   ;;  %v3480_v18 = vld [vmem:[%s3647_s14 + $0x20] sm:$0xff]   ;;  %v3482_v23 = vld [vmem:[%s3647_s14 + $0x30] sm:$0xff]  }
  0x16   : > { %3107 = vmatprep.mubr.msk.bf16.mxu1 %vm540_vm1, %v3475_v12  ;;  %3175 = vmatprep.mubr.msk.bf16.mxu0 %vm540_vm1, %v3476_v13  ;;  %v3481_v22 = vld [vmem:[%s3647_s14 + $0x28] sm:$0xff]   ;;  %v3483_v27 = vld [vmem:[%s3647_s14 + $0x38] sm:$0xff]   ;;  %v3484_v28 = vld [vmem:[%s3647_s14 + $0x40] sm:$0xff]  }
  0x17   : > { %2071 = vperm.xlu0 %3469, %v2001_v10   ;;  %2081 = vperm.xlu1 %3470, %v2003_v11   ;;  %v2012_v31 = vld [vmem:[%s4417_s2 + $0x60] sm:$0xff]  ;;  %v2013_v32 = vld [vmem:[%s4417_s2 + $0x68] sm:$0xff]  ;;  %v3486_v34 = vld [vmem:[%s3647_s14 + $0x50] sm:$0xff]  }
  0x18   : > { %3108 = vmatmul.mubr.msk.bf16.vlgmr.msra.gmra.mrb[0].mxu1 %vm540_vm1, %v3477_v15  ;;  %3176 = vmatmul.mubr.msk.bf16.vlgmr.msra.gmra.mrb[0].mxu0 %vm540_vm1, %v3478_v16  ;;  %v3485_v33 = vld [vmem:[%s3647_s14 + $0x48] sm:$0xff]   ;;  %v2014_v35 = vld [vmem:[%s4417_s2 + $0x70] sm:$0xff]  ;;  %v2015_v36 = vld [vmem:[%s4417_s2 + $0x78] sm:$0xff] }
  0x19   : > { %3309 = vmatpush3.bf16.msra.mxu1 %v3472_v1  ;;  %3240 = vmatpush3.bf16.msra.mxu0 %v3479_v7  ;;  %v2016_v37 = vld [vmem:[%s4417_s2 + $0x80] sm:$0xff]  ;;  %v3487_v38 = vld [vmem:[%s3647_s14 + $0x58] sm:$0xff]   ;;  %v2017_v39 = vld [vmem:[%s4417_s2 + $0x88] sm:$0xff] }
  0x1a   : > { %3111 = vmatprep.mubr.msk.bf16.mxu1 %vm540_vm1, %v3480_v18  ;;  %3179 = vmatprep.mubr.msk.bf16.mxu0 %vm540_vm1, %v3475_v12  ;;  %v3489_v40 = vld [vmem:[%s3647_s14 + $0x60] sm:$0xff]   ;;  %v2018_v41 = vld [vmem:[%s4417_s2 + $0x90] sm:$0xff]  ;;  %v2019_v42 = vld [vmem:[%s4417_s2 + $0x98] sm:$0xff] }
  0x1b   : > { %3442 = vmatprep.subr.msk.bf16.mxu0 %vm637_vm0, %v3488_v14  ;;  %2086 = vperm.xlu0 %3469, %v2004_v17   ;;  %v2020_v43 = vld [vmem:[%s4417_s2 + $0xa0] sm:$0xff]  ;;  %v2021_v44 = vld [vmem:[%s4417_s2 + $0xa8] sm:$0xff]  ;;  %v3491_v46 = vld [vmem:[%s3647_s14 + $0x70] sm:$0xff]  }
  0x1c   : > { %2091 = vperm.xlu1 %3470, %v2005_v19   ;;  %3441 = vmatprep.subr.msk.bf16.mxu1 %vm637_vm0, %v3474_v3  ;;  %v3490_v45 = vld [vmem:[%s3647_s14 + $0x68] sm:$0xff]   ;;  %v2022_v47 = vld [vmem:[%s4417_s2 + $0xb0] sm:$0xff]  ;;  %v2023_v48 = vld [vmem:[%s4417_s2 + $0xb8] sm:$0xff] }
  0x1d   : > { %3242 = vmatpush3.bf16.msra.mxu0 %v1581_v20  ;;  %3310 = vmatpush3.bf16.msra.mxu1 %v956_v6  ;;  %v2024_v49 = vld [vmem:[%s4417_s2 + $0xc0] sm:$0xff]  ;;  %v3492_v50 = vld [vmem:[%s3647_s14 + $0x78] sm:$0xff]   ;;  %v2025_v51 = vld [vmem:[%s4417_s2 + $0xc8] sm:$0xff] }
  0x1e   : > { %v3770_v52 = vld [vmem:[%s3647_s14 + $0x80] sm:$0xff]   ;;  %v2026_v53 = vld [vmem:[%s4417_s2 + $0xd0] sm:$0xff]  ;;  %v2027_v54 = vld [vmem:[%s4417_s2 + $0xd8] sm:$0xff] }
  0x1f   : > { %2096 = vperm.xlu0 %3469, %v2006_v21   ;;  %v2028_v55 = vld [vmem:[%s4417_s2 + $0xe0] sm:$0xff]  ;;  %v2029_v56 = vld [vmem:[%s4417_s2 + $0xe8] sm:$0xff]  ;;  %v3793_v58 = vld [vmem:[%s3647_s14 + $0x90] sm:$0xff]  }
  0x20   : > { %3112 = vmatmul.mubr.msk.bf16.gmra.mrb[4].mxu1 %vm540_vm1, %v3481_v22  ;;  %3180 = vmatmul.mubr.msk.bf16.gmra.mrb[4].mxu0 %vm540_vm1, %v3477_v15  ;;  %v3790_v57 = vld [vmem:[%s3647_s14 + $0x88] sm:$0xff]   ;;  %v2030_v59 = vld [vmem:[%s4417_s2 + $0xf0] sm:$0xff]  ;;  %v3496_v60 = vld [vmem:[%s3647_s14 + $0x20] sm:$0xff]  }
  0x21   : > { %3115 = vmatprep.mubr.msk.bf16.mxu1 %vm540_vm1, %v3482_v23  ;;  %3183 = vmatprep.mubr.msk.bf16.mxu0 %vm540_vm1, %v3480_v18  ;;  %v2031_v61 = vld [vmem:[%s4417_s2 + $0xf8] sm:$0xff]  ;;  %v2032_v62 = vld [vmem:[%s4417_s2 + $0x100] sm:$0xff]  ;;  %v3498_v0 = vld [vmem:[%s3647_s14 + $0x28] sm:$0xff]  }
  0x22   : > { %2101 = vperm.xlu1 %3470, %v2007_v24   ;;  %v3812_v63 = vld [vmem:[%s3647_s14 + $0x98] sm:$0xff]   ;;  %v2033_v1 = vld [vmem:[%s4417_s2 + $0x108] sm:$0xff]  ;;  %v3819_v2 = vld [vmem:[%s3647_s14 + $0xa0] sm:$0xff]  }
  0x23   : > { %2106 = vperm.xlu0 %3469, %v2008_v25   ;;  %v2034_v3 = vld [vmem:[%s4417_s2 + $0x110] sm:$0xff]  ;;  %v2035_v5 = vld [vmem:[%s4417_s2 + $0x118] sm:$0xff]  ;;  %v2036_v6 = vld [vmem:[%s4417_s2 + $0x120] sm:$0xff] }
  0x24   : > { %v3500_v4 = vld [vmem:[%s3647_s14 + $0x30] sm:$0xff]   ;;  %v2037_v7 = vld [vmem:[%s4417_s2 + $0x128] sm:$0xff]  ;;  %v3502_v9 = vld [vmem:[%s3647_s14 + $0x38] sm:$0xff]  }
  0x25   : > { %v3841_v8 = vld [vmem:[%s3647_s14 + $0xa8] sm:$0xff]   ;;  %v3845_v10 = vld [vmem:[%s3647_s14 + $0xb0] sm:$0xff]   ;;  %v3504_v12 = vld [vmem:[%s3647_s14 + $0x40] sm:$0xff]  }
  0x26   : > { %2111 = vperm.xlu1 %3470, %v2009_v26   ;;  %v2038_v11 = vld [vmem:[%s4417_s2 + $0x130] sm:$0xff]  ;;  %v2039_v13 = vld [vmem:[%s4417_s2 + $0x138] sm:$0xff]  ;;  %v2040_v14 = vld [vmem:[%s4417_s2 + $0x140] sm:$0xff] }
  0x27   : > { %2116 = vperm.xlu0 %3469, %v2010_v29   ;;  %v3864_v15 = vld [vmem:[%s3647_s14 + $0xb8] sm:$0xff]   ;;  %v3506_v16 = vld [vmem:[%s3647_s14 + $0x48] sm:$0xff]   ;;  %v3871_v18 = vld [vmem:[%s3647_s14 + $0xc0] sm:$0xff]  }
  0x28   : > { %3116 = vmatmul.mubr.msk.bf16.gmra.mrb[8].mxu1 %vm540_vm1, %v3483_v27  ;;  %3184 = vmatmul.mubr.msk.bf16.gmra.mrb[8].mxu0 %vm540_vm1, %v3481_v22  ;;  %v2041_v17 = vld [vmem:[%s4417_s2 + $0x148] sm:$0xff]  ;;  %v2042_v19 = vld [vmem:[%s4417_s2 + $0x150] sm:$0xff]  ;;  %v2043_v21 = vld [vmem:[%s4417_s2 + $0x158] sm:$0xff] }
  0x29   : > { %3119 = vmatprep.mubr.msk.bf16.mxu1 %vm540_vm1, %v3484_v28  ;;  %3187 = vmatprep.mubr.msk.bf16.mxu0 %vm540_vm1, %v3482_v23  ;;  %v3508_v20 = vld [vmem:[%s3647_s14 + $0x50] sm:$0xff]   ;;  %v2044_v22 = vld [vmem:[%s4417_s2 + $0x160] sm:$0xff]  ;;  %v2045_v23 = vld [vmem:[%s4417_s2 + $0x168] sm:$0xff] }
  0x2a   : > { %2121 = vperm.xlu1 %3470, %v2011_v30   ;;  %v3893_v24 = vld [vmem:[%s3647_s14 + $0xc8] sm:$0xff]   ;;  %v3510_v25 = vld [vmem:[%s3647_s14 + $0x58] sm:$0xff]   ;;  %v3897_v26 = vld [vmem:[%s3647_s14 + $0xd0] sm:$0xff]  }
  0x2b   : > { %2126 = vperm.xlu0 %3469, %v2012_v31   ;;  %v2047_v29 = vld [vmem:[%s4417_s2 + $0x178] sm:$0xff]  ;;  %v2048_v30 = vld [vmem:[%s4417_s2 + $0x180] sm:$0xff]  ;;  %v2049_v31 = vld [vmem:[%s4417_s2 + $0x188] sm:$0xff] }
  0x2e   : > { %2131 = vperm.xlu1 %3470, %v2013_v32   ;;  %v3919_v32 = vld [vmem:[%s3647_s14 + $0xd8] sm:$0xff]  }
  0x2f   : > { %2136 = vperm.xlu0 %3469, %v2014_v35   ;;  %v2050_v35 = vld [vmem:[%s4417_s2 + $0x190] sm:$0xff] }
  0x30   : > { %3120 = vmatmul.mubr.msk.bf16.gmra.mrb[12].mxu1 %vm540_vm1, %v3485_v33  ;;  %3188 = vmatmul.mubr.msk.bf16.gmra.mrb[12].mxu0 %vm540_vm1, %v3483_v27  ;;  %v2046_v27 = vld [vmem:[%s4417_s2 + $0x170] sm:$0xff] }
  0x31   : > { %3123 = vmatprep.mubr.msk.bf16.mxu1 %vm540_vm1, %v3486_v34  ;;  %3191 = vmatprep.mubr.msk.bf16.mxu0 %vm540_vm1, %v3484_v28  ;;  %v3512_v28 = vld [vmem:[%s3647_s14 + $0x60] sm:$0xff]  }
  0x32   : > { %2141 = vperm.xlu1 %3470, %v2015_v36   ;;  %v3516_v36 = vld [vmem:[%s3647_s14 + $0x70] sm:$0xff]  }
  0x33   : > { %2146 = vperm.xlu0 %3469, %v2016_v37   ;;  %v2051_v37 = vld [vmem:[%s4417_s2 + $0x198] sm:$0xff] }
  0x36   : > { %2151 = vperm.xlu1 %3470, %v2017_v39   ;;  %v2053_v39 = vld [vmem:[%s4417_s2 + $0x1a8] sm:$0xff] }
  0x37   : > { %2156 = vperm.xlu0 %3469, %v2018_v41   ;;  %v3518_v41 = vld [vmem:[%s3647_s14 + $0x78] sm:$0xff]  }
  0x38   : > { %3124 = vmatmul.mubr.msk.bf16.gmra.mrb[16].mxu1 %vm540_vm1, %v3487_v38  ;;  %3192 = vmatmul.mubr.msk.bf16.gmra.mrb[16].mxu0 %vm540_vm1, %v3485_v33  ;;  %v3514_v33 = vld [vmem:[%s3647_s14 + $0x68] sm:$0xff]  }
  0x39   : > { %3127 = vmatprep.mubr.msk.bf16.mxu1 %vm540_vm1, %v3489_v40  ;;  %3195 = vmatprep.mubr.msk.bf16.mxu0 %vm540_vm1, %v3486_v34  ;;  %v3923_v34 = vld [vmem:[%s3647_s14 + $0xe0] sm:$0xff]  }
  0x3a   : > { %2161 = vperm.xlu1 %3470, %v2019_v42   ;;  %v3949_v42 = vld [vmem:[%s3647_s14 + $0xf0] sm:$0xff]  }
  0x3b   : > { %2166 = vperm.xlu0 %3469, %v2020_v43   ;;  %v2054_v43 = vld [vmem:[%s4417_s2 + $0x1b0] sm:$0xff] }
  0x3e   : > { %2171 = vperm.xlu1 %3470, %v2021_v44   ;;  %v3520_v44 = vld [vmem:[%s3647_s14 + $0x80] sm:$0xff]  }
  0x3f   : > { %2176 = vperm.xlu0 %3469, %v2022_v47   ;;  %v2057_v47 = vld [vmem:[%s4417_s2 + $0x1c8] sm:$0xff] }
  0x40   : > { %3128 = vmatmul.mubr.msk.bf16.gmra.mrb[20].mxu1 %vm540_vm1, %v3490_v45  ;;  %3196 = vmatmul.mubr.msk.bf16.gmra.mrb[20].mxu0 %vm540_vm1, %v3487_v38  ;;  %v2052_v38 = vld [vmem:[%s4417_s2 + $0x1a0] sm:$0xff] }
  0x41   : > { %3131 = vmatprep.mubr.msk.bf16.mxu1 %vm540_vm1, %v3491_v46  ;;  %3199 = vmatprep.mubr.msk.bf16.mxu0 %vm540_vm1, %v3489_v40  ;;  %v3945_v40 = vld [vmem:[%s3647_s14 + $0xe8] sm:$0xff]  }
  0x42   : > { %2181 = vperm.xlu1 %3470, %v2023_v48   ;;  %v3971_v48 = vld [vmem:[%s3647_s14 + $0xf8] sm:$0xff]  }
  0x43   : > { %2186 = vperm.xlu0 %3469, %v2024_v49   ;;  %v3522_v49 = vld [vmem:[%s3647_s14 + $0x88] sm:$0xff]  }
  0x46   : > { %2191 = vperm.xlu1 %3470, %v2025_v51   ;;  %v2058_v51 = vld [vmem:[%s4417_s2 + $0x1d0] sm:$0xff] }
  0x47   : > { %2196 = vperm.xlu0 %3469, %v2026_v53   ;;  %v3524_v53 = vld [vmem:[%s3647_s14 + $0x90] sm:$0xff]  }
  0x48   : > { %3132 = vmatmul.mubr.msk.bf16.gmra.mrb[24].mxu1 %vm540_vm1, %v3492_v50  ;;  %3200 = vmatmul.mubr.msk.bf16.gmra.mrb[24].mxu0 %vm540_vm1, %v3490_v45  ;;  %v2055_v45 = vld [vmem:[%s4417_s2 + $0x1b8] sm:$0xff] }
  0x49   : > { %3135 = vmatprep.mubr.msk.bf16.mxu1 %vm540_vm1, %v3770_v52  ;;  %3203 = vmatprep.mubr.msk.bf16.mxu0 %vm540_vm1, %v3491_v46  ;;  %v2056_v46 = vld [vmem:[%s4417_s2 + $0x1c0] sm:$0xff] }
  0x4a   : > { %2201 = vperm.xlu1 %3470, %v2027_v54   ;;  %v2059_v54 = vld [vmem:[%s4417_s2 + $0x1d8] sm:$0xff] }
  0x4b   : > { %2206 = vperm.xlu0 %3469, %v2028_v55   ;;  %v2060_v55 = vld [vmem:[%s4417_s2 + $0x1e0] sm:$0xff] }
  0x4e   : > { %2211 = vperm.xlu1 %3470, %v2029_v56   ;;  %v2061_v56 = vld [vmem:[%s4417_s2 + $0x1e8] sm:$0xff] }
  0x4f   : > { %2216 = vperm.xlu0 %3469, %v2030_v59   ;;  %v3525_v59 = vld [vmem:[%s3647_s14 + $0x108] sm:$0xff]  }
  0x50   : > { %3136 = vmatmul.mubr.msk.bf16.gmra.mrb[28].mxu1 %vm540_vm1, %v3790_v57  ;;  %3204 = vmatmul.mubr.msk.bf16.gmra.mrb[28].mxu0 %vm540_vm1, %v3492_v50  ;;  %v3523_v50 = vld [vmem:[%s3647_s14 + $0x100] sm:$0xff]  }
  0x51   : > { %3139 = vmatprep.mubr.msk.bf16.mxu1 %vm540_vm1, %v3793_v58  ;;  %3243 = vmatprep.mubr.msk.bf16.mxu0 %vm540_vm1, %v3496_v60  ;;  %v3526_v60 = vld [vmem:[%s3647_s14 + $0x98] sm:$0xff]  }
  0x52   : > { %2221 = vperm.xlu1 %3470, %v2031_v61   ;;  %v2062_v61 = vld [vmem:[%s4417_s2 + $0x1f0] sm:$0xff] }
  0x53   : > { %2226 = vperm.xlu0 %3469, %v2032_v62   ;;  %v3527_v62 = vld [vmem:[%s3647_s14 + $0xa0] sm:$0xff]  }
  0x56   : > { %2231 = vperm.xlu1 %3470, %v2033_v1   ;;  %v3528_v1 = vld [vmem:[%s3647_s14 + $0xa8] sm:$0xff]  }
  0x57   : > { %2236 = vperm.xlu0 %3469, %v2034_v3   ;;  %v3529_v3 = vld [vmem:[%s3647_s14 + $0xb0] sm:$0xff]  }
  0x58   : > { %3140 = vmatmul.mubr.msk.bf16.gmra.mrb[32].mxu1 %vm540_vm1, %v3812_v63  ;;  %3244 = vmatmul.mubr.msk.bf16.vlgmr.msra.gmra.mrb[0].mxu0 %vm540_vm1, %v3498_v0  ;;  %v2063_v0 = vld [vmem:[%s4417_s2 + $0x1f8] sm:$0xff] }
  0x59   : > { %3143 = vmatprep.mubr.msk.bf16.mxu1 %vm540_vm1, %v3819_v2  ;;  %3247 = vmatprep.mubr.msk.bf16.mxu0 %vm540_vm1, %v3500_v4  ;;  %v3530_v4 = vld [vmem:[%s3647_s14 + $0xb8] sm:$0xff]  }
  0x5a   : > { %2241 = vperm.xlu1 %3470, %v2035_v5   ;;  %v3533_v5 = vld [vmem:[%s3647_s14 + $0xd0] sm:$0xff]  }
  0x5b   : > { %2246 = vperm.xlu0 %3469, %v2036_v6   ;;  %v3537_v6 = vld [vmem:[%s3647_s14 + $0xf0] sm:$0xff]  }
  0x5e   : > { %2251 = vperm.xlu1 %3470, %v2037_v7   ;;  %v3538_v7 = vld [vmem:[%s3647_s14 + $0xf8] sm:$0xff]  }
  0x5f   : > { %2256 = vperm.xlu0 %3469, %v2038_v11   ;;  %v3542_v11 = vld [vmem:[%s3647_s14 + $0x118] sm:$0xff]  }
  0x60   : > { %3144 = vmatmul.mubr.msk.bf16.gmra.mrb[36].mxu1 %vm540_vm1, %v3841_v8  ;;  %3248 = vmatmul.mubr.msk.bf16.gmra.mrb[4].mxu0 %vm540_vm1, %v3502_v9  ;;  %v3540_v9 = vld [vmem:[%s3647_s14 + $0x108] sm:$0xff]  }
  0x61   : > { %3147 = vmatprep.mubr.msk.bf16.mxu1 %vm540_vm1, %v3845_v10  ;;  %3251 = vmatprep.mubr.msk.bf16.mxu0 %vm540_vm1, %v3504_v12 }
  0x62   : > { %2261 = vperm.xlu1 %3470, %v2039_v13  }
  0x63   : > { %2266 = vperm.xlu0 %3469, %v2040_v14  }
  0x66   : > { %2271 = vperm.xlu1 %3470, %v2041_v17  }
  0x67   : > { %2276 = vperm.xlu0 %3469, %v2042_v19  }
  0x68   : > { %3148 = vmatmul.mubr.msk.bf16.gmra.mrb[40].mxu1 %vm540_vm1, %v3864_v15  ;;  %3252 = vmatmul.mubr.msk.bf16.gmra.mrb[8].mxu0 %vm540_vm1, %v3506_v16 }
  0x69   : > { %3151 = vmatprep.mubr.msk.bf16.mxu1 %vm540_vm1, %v3871_v18  ;;  %3255 = vmatprep.mubr.msk.bf16.mxu0 %vm540_vm1, %v3508_v20 }
  0x6a   : > { %2281 = vperm.xlu1 %3470, %v2043_v21  }
  0x6b   : > { %2286 = vperm.xlu0 %3469, %v2044_v22  }
  0x6e   : > { %2291 = vperm.xlu1 %3470, %v2045_v23  }
  0x6f   : > { %2296 = vperm.xlu0 %3469, %v2046_v27  }
  0x70   : > { %3152 = vmatmul.mubr.msk.bf16.gmra.mrb[44].mxu1 %vm540_vm1, %v3893_v24  ;;  %3256 = vmatmul.mubr.msk.bf16.gmra.mrb[12].mxu0 %vm540_vm1, %v3510_v25 }
  0x71   : > { %3155 = vmatprep.mubr.msk.bf16.mxu1 %vm540_vm1, %v3897_v26  ;;  %3259 = vmatprep.mubr.msk.bf16.mxu0 %vm540_vm1, %v3512_v28 }
  0x72   : > { %2301 = vperm.xlu1 %3470, %v2047_v29  }
  0x73   : > { %2306 = vperm.xlu0 %3469, %v2048_v30  }
  0x76   : > { %2311 = vperm.xlu1 %3470, %v2049_v31  }
  0x77   : > { %2316 = vperm.xlu0 %3469, %v2050_v35  }
  0x78   : > { %3156 = vmatmul.mubr.msk.bf16.gmra.mrb[48].mxu1 %vm540_vm1, %v3919_v32  ;;  %3260 = vmatmul.mubr.msk.bf16.gmra.mrb[16].mxu0 %vm540_vm1, %v3514_v33 }
  0x79   : > { %3159 = vmatprep.mubr.msk.bf16.mxu1 %vm540_vm1, %v3923_v34  ;;  %3263 = vmatprep.mubr.msk.bf16.mxu0 %vm540_vm1, %v3516_v36 }
  0x7a   : > { %2321 = vperm.xlu1 %3470, %v2051_v37  }
  0x7b   : > { %2326 = vperm.xlu0 %3469, %v2052_v38  }
  0x7e   : > { %2331 = vperm.xlu1 %3470, %v2053_v39  }
  0x7f   : > { %2336 = vperm.xlu0 %3469, %v2054_v43  }
  0x80   : > { %3160 = vmatmul.mubr.msk.bf16.gmra.mrb[52].mxu1 %vm540_vm1, %v3945_v40  ;;  %3264 = vmatmul.mubr.msk.bf16.gmra.mrb[20].mxu0 %vm540_vm1, %v3518_v41 }
  0x81   : > { %3163 = vmatprep.mubr.msk.bf16.mxu1 %vm540_vm1, %v3949_v42  ;;  %3267 = vmatprep.mubr.msk.bf16.mxu0 %vm540_vm1, %v3520_v44 }
  0x82   : > { %2341 = vperm.xlu1 %3470, %v2055_v45  }
  0x83   : > { %2346 = vperm.xlu0 %3469, %v2056_v46  }
  0x86   : > { %2351 = vperm.xlu1 %3470, %v2057_v47  }
  0x87   : > { %2356 = vperm.xlu0 %3469, %v2058_v51  }
  0x88   : > { %3164 = vmatmul.mubr.msk.bf16.gmra.mrb[56].mxu1 %vm540_vm1, %v3971_v48  ;;  %3268 = vmatmul.mubr.msk.bf16.gmra.mrb[24].mxu0 %vm540_vm1, %v3522_v49 }
  0x89   : > { %3167 = vmatprep.mubr.msk.bf16.mxu1 %vm540_vm1, %v3523_v50  ;;  %3271 = vmatprep.mubr.msk.bf16.mxu0 %vm540_vm1, %v3524_v53 }
  0x8a   : > { %2361 = vperm.xlu1 %3470, %v2059_v54  }
  0x8b   : > { %2366 = vperm.xlu0 %3469, %v2060_v55  }
  0x8e   : > { %2371 = vperm.xlu1 %3470, %v2061_v56  }
  0x8f   : > { %2376 = vperm.xlu0 %3469, %v2062_v61  }
  0x90   : > { %3168 = vmatmul.mubr.msk.bf16.gmra.mrb[60].mxu1 %vm540_vm1, %v3525_v59  ;;  %3272 = vmatmul.mubr.msk.bf16.gmra.mrb[28].mxu0 %vm540_vm1, %v3526_v60 }
  0x91   : > { %3207 = vmatprep.mubr.msk.bf16.mxu1 %vm540_vm1, %v3770_v52  ;;  %3275 = vmatprep.mubr.msk.bf16.mxu0 %vm540_vm1, %v3527_v62  ;;  %v3531_v52 = vld [vmem:[%s3647_s14 + $0xc0] sm:$0xff]  }
  0x92   : > { %2381 = vperm.xlu1 %3470, %v2063_v0   ;;  %v4067_v12 = vpop.permute.xlu0 %2066  ;;  %v4069_v13 = vpop.permute.xlu1 %2076 }
  0x96   : > { %v4071_v14 = vpop.permute.xlu0 %2071 }
  0x98   : > { %3208 = vmatmul.mubr.msk.bf16.vlgmr.msra.gmra.mrb[32].mxu1 %vm540_vm1, %v3790_v57  ;;  %3276 = vmatmul.mubr.msk.bf16.gmra.mrb[32].mxu0 %vm540_vm1, %v3528_v1  ;;  %v3532_v57 = vld [vmem:[%s3647_s14 + $0xc8] sm:$0xff]  }
  0x99   : > { %3211 = vmatprep.mubr.msk.bf16.mxu1 %vm540_vm1, %v3793_v58  ;;  %3279 = vmatprep.mubr.msk.bf16.mxu0 %vm540_vm1, %v3529_v3  ;;  %v3534_v58 = vld [vmem:[%s3647_s14 + $0xd8] sm:$0xff]  }
  0x9a   : > { %v4075_v17 = vpop.permute.xlu0 %2086 }
  0x9e   : > { %v4081_v22 = vpop.permute.xlu0 %2096 }
  0xa0   : > { %3212 = vmatmul.mubr.msk.bf16.gmra.mrb[36].mxu1 %vm540_vm1, %v3812_v63  ;;  %3280 = vmatmul.mubr.msk.bf16.gmra.mrb[36].mxu0 %vm540_vm1, %v3530_v4  ;;  %v3535_v63 = vld [vmem:[%s3647_s14 + $0xe0] sm:$0xff]  }
  0xa1   : > { %3215 = vmatprep.mubr.msk.bf16.mxu1 %vm540_vm1, %v3819_v2  ;;  %3283 = vmatprep.mubr.msk.bf16.mxu0 %vm540_vm1, %v3531_v52  ;;  %v3536_v2 = vld [vmem:[%s3647_s14 + $0xe8] sm:$0xff]  }
  0xa2   : > { %v4093_v28 = vpop.permute.xlu0 %2106 }
  0xa6   : > { %v4103_v33 = vpop.permute.xlu0 %2116 }
  0xa8   : > { %3216 = vmatmul.mubr.msk.bf16.gmra.mrb[40].mxu1 %vm540_vm1, %v3841_v8  ;;  %3284 = vmatmul.mubr.msk.bf16.gmra.mrb[40].mxu0 %vm540_vm1, %v3532_v57  ;;  %v3539_v8 = vld [vmem:[%s3647_s14 + $0x100] sm:$0xff]  }
  0xa9   : > { %3219 = vmatprep.mubr.msk.bf16.mxu1 %vm540_vm1, %v3845_v10  ;;  %3287 = vmatprep.mubr.msk.bf16.mxu0 %vm540_vm1, %v3533_v5  ;;  %v3541_v10 = vld [vmem:[%s3647_s14 + $0x110] sm:$0xff]   ;;  %s3000_s14 = sshll.u32 %s4448_s18, 9 }
  0xaa   : > { %v4111_v37 = vpop.permute.xlu0 %2126  ;;  %s4181_s27 = scalar_lea.vmem %s4418_s3, %s3000_s14 }
  0xb0   : > { %3220 = vmatmul.mubr.msk.bf16.gmra.mrb[44].mxu1 %vm540_vm1, %v3864_v15  ;;  %3288 = vmatmul.mubr.msk.bf16.gmra.mrb[44].mxu0 %vm540_vm1, %v3534_v58  ;;  %v4073_v15 = vpop.permute.xlu1 %2081 }
  0xb1   : > { %3223 = vmatprep.mubr.msk.bf16.mxu1 %vm540_vm1, %v3871_v18  ;;  %3291 = vmatprep.mubr.msk.bf16.mxu0 %vm540_vm1, %v3535_v63 }
  0xb4   : > { %v4077_v19 = vpop.permute.xlu1 %2091 }
  0xb8   : > { %3224 = vmatmul.mubr.msk.bf16.gmra.mrb[48].mxu1 %vm540_vm1, %v3893_v24  ;;  %3292 = vmatmul.mubr.msk.bf16.gmra.mrb[48].mxu0 %vm540_vm1, %v3536_v2  ;;  %v4083_v23 = vpop.permute.xlu1 %2101 }
  0xb9   : > { %3227 = vmatprep.mubr.msk.bf16.mxu1 %vm540_vm1, %v3897_v26  ;;  %3295 = vmatprep.mubr.msk.bf16.mxu0 %vm540_vm1, %v3537_v6 }
  0xbc   : > { %v4095_v29 = vpop.permute.xlu1 %2111 }
  0xc0   : > { %3228 = vmatmul.mubr.msk.bf16.gmra.mrb[52].mxu1 %vm540_vm1, %v3919_v32  ;;  %3296 = vmatmul.mubr.msk.bf16.gmra.mrb[52].mxu0 %vm540_vm1, %v3538_v7  ;;  %v4107_v35 = vpop.permute.xlu1 %2121 }
  0xc1   : > { %3231 = vmatprep.mubr.msk.bf16.mxu1 %vm540_vm1, %v3923_v34  ;;  %3299 = vmatprep.mubr.msk.bf16.mxu0 %vm540_vm1, %v3539_v8 }
  0xc4   : > { %v4115_v39 = vpop.permute.xlu1 %2131 }
  0xc8   : > { %3232 = vmatmul.mubr.msk.bf16.gmra.mrb[56].mxu1 %vm540_vm1, %v3945_v40  ;;  %3300 = vmatmul.mubr.msk.bf16.gmra.mrb[56].mxu0 %vm540_vm1, %v3540_v9  ;;  %v4123_v43 = vpop.permute.xlu1 %2141 }
  0xc9   : > { %3235 = vmatprep.mubr.msk.bf16.mxu1 %vm540_vm1, %v3949_v42  ;;  %3303 = vmatprep.mubr.msk.bf16.mxu0 %vm540_vm1, %v3541_v10  ;;  %v4121_v42 = vpop.permute.xlu0 %2136 }
  0xcc   : > { %v4135_v49 = vpop.permute.xlu1 %2151 }
  0xd0   : > { %3236 = vmatmul.mubr.msk.bf16.gmra.mrb[60].mxu1 %vm540_vm1, %v3971_v48  ;;  %3304 = vmatmul.mubr.msk.bf16.gmra.mrb[60].mxu0 %vm540_vm1, %v3542_v11  ;;  %v4133_v48 = vpop.permute.xlu0 %2146  ;;  %v4147_v56 = vpop.permute.xlu1 %2161 }
  0xd4   : > { %v4143_v54 = vpop.permute.xlu0 %2156  ;;  %v4155_v62 = vpop.permute.xlu1 %2171 }
  0xd8   : > { %v4151_v60 = vpop.permute.xlu0 %2166  ;;  %v4163_v4 = vpop.permute.xlu1 %2181 }
  0xdc   : > { %v4161_v3 = vpop.permute.xlu0 %2176  ;;  %v4175_v2 = vpop.permute.xlu1 %2191 }
  0xdd   : > { %4428 = vst [vmem:[#allocation9_spill] sm:$0xff] %v4175_v2 }
  0xe0   : > { %v4173_v63 = vpop.permute.xlu0 %2186 }
  0xe1   : > { %4427 = vst [vmem:[#allocation8_spill] sm:$0xff] %v4173_v63 }
  0xe4   : > { %v4183_v9 = vpop.permute.xlu0 %2196 }
  0xe5   : > { %4429 = vst [vmem:[#allocation10_spill] sm:$0xff] %v4183_v9 }
  0xeb   : > { %v3109_v16 = vpop.f32.mrb[0].mxu1 }
  0xec   : > { %v675_v18 = vpop.f32.mrb[1].mxu1 }
  0xed   : > { %v3110_v20 = vpop.f32.mrb[2].mxu1 }
  0xee   : > { %v4079_v21 = vpop.f32.mrb[3].mxu1 }
  0xf3   : > { %v4085_v24 = vpop.f32.mrb[4].mxu1 }
  0xf4   : > { %v4087_v25 = vpop.f32.mrb[5].mxu1 }
  0xf5   : > { %v4089_v26 = vpop.f32.mrb[6].mxu1 }
  0xf6   : > { %v4091_v27 = vpop.f32.mrb[7].mxu1 }
  0xfb   : > { %v4097_v30 = vpop.f32.mrb[8].mxu1 }
  0xfc   : > { %v4099_v31 = vpop.f32.mrb[9].mxu1 }
  0xfd   : > { %v4101_v32 = vpop.f32.mrb[10].mxu1 }
  0xfe   : > { %v4105_v34 = vpop.f32.mrb[11].mxu1 }
 0x103   : > { %v4109_v36 = vpop.f32.mrb[12].mxu1 }
 0x104   : > { %v4113_v38 = vpop.f32.mrb[13].mxu1 }
 0x105   : > { %v4117_v40 = vpop.f32.mrb[14].mxu1 }
 0x106   : > { %v4119_v41 = vpop.f32.mrb[15].mxu1 }
 0x10b   : > { %v4125_v44 = vpop.f32.mrb[16].mxu1 }
 0x10c   : > { %v4127_v45 = vpop.f32.mrb[17].mxu1 }
 0x10d   : > { %v4129_v46 = vpop.f32.mrb[18].mxu1 }
 0x10e   : > { %v4131_v47 = vpop.f32.mrb[19].mxu1 }
 0x113   : > { %v4137_v50 = vpop.f32.mrb[20].mxu1 }
 0x114   : > { %v4139_v51 = vpop.f32.mrb[21].mxu1 }
 0x115   : > { %v4141_v53 = vpop.f32.mrb[22].mxu1 }
 0x116   : > { %v4145_v55 = vpop.f32.mrb[23].mxu1 }
 0x11b   : > { %v4149_v59 = vpop.f32.mrb[24].mxu1 }
 0x11c   : > { %v4153_v61 = vpop.f32.mrb[25].mxu1 }
 0x11d   : > { %v4157_v0 = vpop.f32.mrb[26].mxu1 }
 0x11e   : > { %4421 = vst [vmem:[#allocation2_spill] sm:$0xff] %v4157_v0  ;;  %v4159_v1 = vpop.f32.mrb[27].mxu1 }
 0x11f   : > { %4422 = vst [vmem:[#allocation3_spill] sm:$0xff] %v4159_v1 }
 0x123   : > { %v4165_v52 = vpop.f32.mrb[28].mxu1 }
 0x124   : > { %4423 = vst [vmem:[#allocation4_spill] sm:$0xff] %v4165_v52  ;;  %v4167_v57 = vpop.f32.mrb[29].mxu1 }
 0x125   : > { %4424 = vst [vmem:[#allocation5_spill] sm:$0xff] %v4167_v57  ;;  %v4169_v5 = vpop.f32.mrb[30].mxu1 }
 0x126   : > { %4425 = vst [vmem:[#allocation6_spill] sm:$0xff] %v4169_v5  ;;  %v4171_v58 = vpop.f32.mrb[31].mxu1 }
 0x127   : > { %4426 = vst [vmem:[#allocation7_spill] sm:$0xff] %v4171_v58  ;;  %v4185_v58 = vpop.permute.xlu1 %2201 }
 0x128   : > { %4430 = vst [vmem:[#allocation11_spill] sm:$0xff] %v4185_v58 }
 0x12b   : > { %v3245_v6 = vpop.f32.mrb[0].mxu0  ;;  %v4198_v9 = vpop.permute.xlu1 %2211 }
 0x12c   : > { %v3311_v7 = vadd.f32 %v3245_v6, %v3109_v16  ;;  %v1617_v8 = vpop.f32.mrb[1].mxu0  ;;  %v4196_v6 = vpop.permute.xlu0 %2206  ;;  %4431 = vst [vmem:[#allocation12_spill] sm:$0xff] %v4198_v9 }
 0x12d   : > { %v3312_v10 = vadd.f32 %v1617_v8, %v675_v18  ;;  %v3246_v11 = vpop.f32.mrb[2].mxu0 }
 0x12e   : > { %1938 = vst [vmem:[%s4181_s27 + $0x10] sm:$0xff] %v3311_v7  ;;  %v3313_v5 = vadd.f32 %v3246_v11, %v3110_v20  ;;  %v1620_v57 = vpop.f32.mrb[3].mxu0  ;;  %v2386_v1 = vmul.f32 %v3311_v7, %v4069_v13 }
 0x12f   : > { %1936 = vst [vmem:[%s4181_s27] sm:$0xff] %v3312_v10  ;;  %v2384_v52 = vmul.f32 %v3312_v10, %v4067_v12  ;;  %v3314_v2 = vadd.f32 %v1620_v57, %v4079_v21 }
 0x130   : > { %1939 = vst [vmem:[%s4181_s27 + $0x18] sm:$0xff] %v3313_v5  ;;  %v2387_v18 = vmul.f32 %v3313_v5, %v4073_v15  ;;  %v2520_v13 = vmul.f32 %v3311_v7, %v2386_v1 }
 0x131   : > { %1937 = vst [vmem:[%s4181_s27 + $0x8] sm:$0xff] %v3314_v2  ;;  %v2385_v16 = vmul.f32 %v3314_v2, %v4071_v14  ;;  %v2518_v8 = vmul.f32 %v3312_v10, %v2384_v52 }
 0x132   : > { %v2521_v15 = vmul.f32 %v3313_v5, %v2387_v18 }
 0x133   : > { %v2448_v58 = vadd.f32 %v2385_v16, %v2384_v52  ;;  %v2519_v20 = vmul.f32 %v3314_v2, %v2385_v16  ;;  %v3249_v11 = vpop.f32.mrb[4].mxu0 }
 0x134   : > { %v3315_v12 = vadd.f32 %v3249_v11, %v4085_v24  ;;  %v1633_v21 = vpop.f32.mrb[5].mxu0 }
 0x135   : > { %v2449_v57 = vadd.f32 %v2448_v58, %v2386_v1  ;;  %v2582_v63 = vadd.f32 %v2519_v20, %v2518_v8  ;;  %v3316_v14 = vadd.f32 %v1633_v21, %v4087_v25  ;;  %v3250_v0 = vpop.f32.mrb[6].mxu0  ;;  %v4209_v1 = vpop.permute.xlu0 %2216 }
 0x136   : > { %1942 = vst [vmem:[%s4181_s27 + $0x30] sm:$0xff] %v3315_v12  ;;  %v3317_v52 = vadd.f32 %v3250_v0, %v4089_v26  ;;  %v1636_v10 = vpop.f32.mrb[7].mxu0  ;;  %v2390_v7 = vmul.f32 %v3315_v12, %v4081_v22  ;;  %v4213_v0 = vpop.permute.xlu1 %2221 }
 0x137   : > { %v2583_v2 = vadd.f32 %v2582_v63, %v2520_v13  ;;  %1940 = vst [vmem:[%s4181_s27 + $0x20] sm:$0xff] %v3316_v14  ;;  %v2388_v16 = vmul.f32 %v3316_v14, %v4075_v17  ;;  %v2450_v9 = vadd.f32 %v2449_v57, %v2387_v18  ;;  %v3318_v24 = vadd.f32 %v1636_v10, %v4091_v27 }
 0x138   : > { %1943 = vst [vmem:[%s4181_s27 + $0x38] sm:$0xff] %v3317_v52  ;;  %v2391_v5 = vmul.f32 %v3317_v52, %v4083_v23  ;;  %v2524_v11 = vmul.f32 %v3315_v12, %v2390_v7 }
 0x139   : > { %v2451_v25 = vadd.f32 %v2450_v9, %v2388_v16  ;;  %v2522_v58 = vmul.f32 %v3316_v14, %v2388_v16  ;;  %v2584_v8 = vadd.f32 %v2583_v2, %v2521_v15  ;;  %1941 = vst [vmem:[%s4181_s27 + $0x28] sm:$0xff] %v3318_v24  ;;  %v2389_v26 = vmul.f32 %v3318_v24, %v4077_v19  ;;  %v4220_v15 = vpop.permute.xlu0 %2226 }
 0x13a   : > { %v2525_v19 = vmul.f32 %v3317_v52, %v2391_v5  ;;  %v4225_v16 = vpop.permute.xlu1 %2231 }
 0x13b   : > { %v2585_v17 = vadd.f32 %v2584_v8, %v2522_v58  ;;  %v2452_v63 = vadd.f32 %v2451_v25, %v2389_v26  ;;  %v2523_v27 = vmul.f32 %v3318_v24, %v2389_v26  ;;  %v3253_v18 = vpop.f32.mrb[8].mxu0 }
 0x13c   : > { %v3319_v22 = vadd.f32 %v3253_v18, %v4097_v30  ;;  %v1649_v20 = vpop.f32.mrb[9].mxu0 }
 0x13d   : > { %v2453_v9 = vadd.f32 %v2452_v63, %v2390_v7  ;;  %v2586_v21 = vadd.f32 %v2585_v17, %v2523_v27  ;;  %v3320_v13 = vadd.f32 %v1649_v20, %v4099_v31  ;;  %v3254_v57 = vpop.f32.mrb[10].mxu0  ;;  %v4233_v17 = vpop.permute.xlu0 %2236 }
 0x13e   : > { %1946 = vst [vmem:[%s4181_s27 + $0x50] sm:$0xff] %v3319_v22  ;;  %v3321_v23 = vadd.f32 %v3254_v57, %v4101_v32  ;;  %v1652_v14 = vpop.f32.mrb[11].mxu0  ;;  %v2394_v31 = vmul.f32 %v3319_v22, %v4103_v33  ;;  %v4236_v20 = vpop.permute.xlu1 %2241 }
 0x13f   : > { %v2587_v10 = vadd.f32 %v2586_v21, %v2524_v11  ;;  %1944 = vst [vmem:[%s4181_s27 + $0x40] sm:$0xff] %v3320_v13  ;;  %v2392_v30 = vmul.f32 %v3320_v13, %v4093_v28  ;;  %v2454_v2 = vadd.f32 %v2453_v9, %v2391_v5  ;;  %v3322_v12 = vadd.f32 %v1652_v14, %v4105_v34 }
 0x140   : > { %1947 = vst [vmem:[%s4181_s27 + $0x58] sm:$0xff] %v3321_v23  ;;  %v2395_v25 = vmul.f32 %v3321_v23, %v4107_v35  ;;  %v2528_v33 = vmul.f32 %v3319_v22, %v2394_v31 }
 0x141   : > { %v2455_v52 = vadd.f32 %v2454_v2, %v2392_v30  ;;  %v2526_v24 = vmul.f32 %v3320_v13, %v2392_v30  ;;  %v2588_v7 = vadd.f32 %v2587_v10, %v2525_v19  ;;  %1945 = vst [vmem:[%s4181_s27 + $0x48] sm:$0xff] %v3322_v12  ;;  %v2393_v32 = vmul.f32 %v3322_v12, %v4095_v29  ;;  %v4248_v10 = vpop.permute.xlu0 %2246 }
 0x142   : > { %v2529_v35 = vmul.f32 %v3321_v23, %v2395_v25 }
 0x143   : > { %v2589_v58 = vadd.f32 %v2588_v7, %v2526_v24  ;;  %v2456_v8 = vadd.f32 %v2455_v52, %v2393_v32  ;;  %v2527_v28 = vmul.f32 %v3322_v12, %v2393_v32  ;;  %v3257_v26 = vpop.f32.mrb[12].mxu0 }
 0x144   : > { %v3323_v34 = vadd.f32 %v3257_v26, %v4109_v36  ;;  %v1665_v5 = vpop.f32.mrb[13].mxu0 }
 0x145   : > { %v2457_v63 = vadd.f32 %v2456_v8, %v2394_v31  ;;  %v2590_v27 = vadd.f32 %v2589_v58, %v2527_v28  ;;  %v3324_v18 = vadd.f32 %v1665_v5, %v4113_v38  ;;  %v3258_v29 = vpop.f32.mrb[14].mxu0  ;;  %v4261_v5 = vpop.permute.xlu0 %2256 }
 0x146   : > { %1950 = vst [vmem:[%s4181_s27 + $0x70] sm:$0xff] %v3323_v34  ;;  %v3325_v11 = vadd.f32 %v3258_v29, %v4117_v40  ;;  %v1668_v9 = vpop.f32.mrb[15].mxu0  ;;  %v2398_v57 = vmul.f32 %v3323_v34, %v4121_v42 }
 0x147   : > { %v2591_v21 = vadd.f32 %v2590_v27, %v2528_v33  ;;  %1948 = vst [vmem:[%s4181_s27 + $0x60] sm:$0xff] %v3324_v18  ;;  %v2396_v36 = vmul.f32 %v3324_v18, %v4111_v37  ;;  %v2458_v13 = vadd.f32 %v2457_v63, %v2395_v25  ;;  %v3326_v22 = vadd.f32 %v1668_v9, %v4119_v41  ;;  %v4250_v41 = vpop.permute.xlu1 %2251 }
 0x148   : > { %1951 = vst [vmem:[%s4181_s27 + $0x78] sm:$0xff] %v3325_v11  ;;  %v2399_v40 = vmul.f32 %v3325_v11, %v4123_v43  ;;  %v2532_v52 = vmul.f32 %v3323_v34, %v2398_v57 }
 0x149   : > { %v2459_v38 = vadd.f32 %v2458_v13, %v2396_v36  ;;  %v2530_v19 = vmul.f32 %v3324_v18, %v2396_v36  ;;  %v2592_v14 = vadd.f32 %v2591_v21, %v2529_v35  ;;  %1949 = vst [vmem:[%s4181_s27 + $0x68] sm:$0xff] %v3326_v22  ;;  %v2397_v23 = vmul.f32 %v3326_v22, %v4115_v39 }
 0x14a   : > { %v2533_v43 = vmul.f32 %v3325_v11, %v2399_v40 }
 0x14b   : > { %v2593_v30 = vadd.f32 %v2592_v14, %v2530_v19  ;;  %v2460_v2 = vadd.f32 %v2459_v38, %v2397_v23  ;;  %v2531_v37 = vmul.f32 %v3326_v22, %v2397_v23  ;;  %v3261_v12 = vpop.f32.mrb[16].mxu0  ;;  %v4265_v27 = vpop.permute.xlu1 %2261 }
 0x14c   : > { %v3327_v42 = vadd.f32 %v3261_v12, %v4125_v44  ;;  %v1681_v31 = vpop.f32.mrb[17].mxu0  ;;  %v4272_v38 = vpop.permute.xlu0 %2266 }
 0x14d   : > { %v2461_v24 = vadd.f32 %v2460_v2, %v2398_v57  ;;  %v2594_v7 = vadd.f32 %v2593_v30, %v2531_v37  ;;  %v3328_v39 = vadd.f32 %v1681_v31, %v4127_v45  ;;  %v3262_v32 = vpop.f32.mrb[18].mxu0 }
 0x14e   : > { %1954 = vst [vmem:[%s4181_s27 + $0x90] sm:$0xff] %v3327_v42  ;;  %v3329_v25 = vadd.f32 %v3262_v32, %v4129_v46  ;;  %v1684_v58 = vpop.f32.mrb[19].mxu0  ;;  %v2402_v34 = vmul.f32 %v3327_v42, %v4143_v54 }
 0x14f   : > { %v2595_v8 = vadd.f32 %v2594_v7, %v2532_v52  ;;  %1952 = vst [vmem:[%s4181_s27 + $0x80] sm:$0xff] %v3328_v39  ;;  %v2400_v28 = vmul.f32 %v3328_v39, %v4133_v48  ;;  %v2462_v26 = vadd.f32 %v2461_v24, %v2399_v40  ;;  %v3330_v44 = vadd.f32 %v1684_v58, %v4131_v47  ;;  %v4277_v40 = vpop.permute.xlu1 %2271  ;;  %v4432_v58 = vld [vmem:[#allocation2_spill] sm:$0xff] }
 0x150   : > { %1955 = vst [vmem:[%s4181_s27 + $0x98] sm:$0xff] %v3329_v25  ;;  %v2403_v18 = vmul.f32 %v3329_v25, %v4147_v56  ;;  %v2536_v9 = vmul.f32 %v3327_v42, %v2402_v34  ;;  %v4285_v7 = vpop.permute.xlu0 %2276 }
 0x151   : > { %v2463_v45 = vadd.f32 %v2462_v26, %v2400_v28  ;;  %v2534_v33 = vmul.f32 %v3328_v39, %v2400_v28  ;;  %v2596_v63 = vadd.f32 %v2595_v8, %v2533_v43  ;;  %1953 = vst [vmem:[%s4181_s27 + $0x88] sm:$0xff] %v3330_v44  ;;  %v2401_v46 = vmul.f32 %v3330_v44, %v4135_v49 }
 0x152   : > { %v2537_v49 = vmul.f32 %v3329_v25, %v2403_v18 }
 0x153   : > { %v2597_v48 = vadd.f32 %v2596_v63, %v2534_v33  ;;  %v2464_v29 = vadd.f32 %v2463_v45, %v2401_v46  ;;  %v2535_v47 = vmul.f32 %v3330_v44, %v2401_v46  ;;  %v3265_v35 = vpop.f32.mrb[20].mxu0  ;;  %v4288_v25 = vpop.permute.xlu1 %2281  ;;  %v4434_v45 = vld [vmem:[#allocation3_spill] sm:$0xff]  ;;  %v4435_v63 = vld [vmem:[#allocation10_spill] sm:$0xff] }
 0x154   : > { %v3331_v54 = vadd.f32 %v3265_v35, %v4137_v50  ;;  %v1697_v11 = vpop.f32.mrb[21].mxu0  ;;  %v4437_v35 = vld [vmem:[#allocation11_spill] sm:$0xff] }
 0x155   : > { %v2465_v21 = vadd.f32 %v2464_v29, %v2402_v34  ;;  %v2598_v36 = vadd.f32 %v2597_v48, %v2535_v47  ;;  %v3332_v13 = vadd.f32 %v1697_v11, %v4139_v51  ;;  %v3266_v22 = vpop.f32.mrb[22].mxu0  ;;  %v4436_v29 = vld [vmem:[#allocation9_spill] sm:$0xff]  ;;  %v4300_v11 = vpop.permute.xlu0 %2286 }
 0x156   : > { %1958 = vst [vmem:[%s4181_s27 + $0xb0] sm:$0xff] %v3331_v54  ;;  %v3333_v56 = vadd.f32 %v3266_v22, %v4141_v53  ;;  %v1700_v57 = vpop.f32.mrb[23].mxu0  ;;  %v2406_v51 = vmul.f32 %v3331_v54, %v4161_v3 }
 0x157   : > { %v2599_v19 = vadd.f32 %v2598_v36, %v2536_v9  ;;  %1956 = vst [vmem:[%s4181_s27 + $0xa0] sm:$0xff] %v3332_v13  ;;  %v2404_v50 = vmul.f32 %v3332_v13, %v4151_v60  ;;  %v2466_v14 = vadd.f32 %v2465_v21, %v2403_v18  ;;  %v3334_v23 = vadd.f32 %v1700_v57, %v4145_v55  ;;  %v4302_v22 = vpop.permute.xlu1 %2291 }
 0x158   : > { %1959 = vst [vmem:[%s4181_s27 + $0xb8] sm:$0xff] %v3333_v56  ;;  %v2407_v12 = vmul.f32 %v3333_v56, %v4163_v4  ;;  %v2540_v3 = vmul.f32 %v3331_v54, %v2406_v51 }
 0x159   : > { %v2467_v30 = vadd.f32 %v2466_v14, %v2404_v50  ;;  %v2538_v2 = vmul.f32 %v3332_v13, %v2404_v50  ;;  %v2600_v37 = vadd.f32 %v2599_v19, %v2537_v49  ;;  %1957 = vst [vmem:[%s4181_s27 + $0xa8] sm:$0xff] %v3334_v23  ;;  %v2405_v53 = vmul.f32 %v3334_v23, %v4155_v62  ;;  %v4438_v49 = vld [vmem:[#allocation4_spill] sm:$0xff] }
 0x15a   : > { %v2541_v4 = vmul.f32 %v3333_v56, %v2407_v12 }
 0x15b   : > { %v2601_v42 = vadd.f32 %v2600_v37, %v2538_v2  ;;  %v2468_v31 = vadd.f32 %v2467_v30, %v2405_v53  ;;  %v2539_v60 = vmul.f32 %v3334_v23, %v2405_v53  ;;  %v3269_v52 = vpop.f32.mrb[24].mxu0  ;;  %v4439_v23 = vld [vmem:[#allocation5_spill] sm:$0xff]  ;;  %v4440_v37 = vld [vmem:[#allocation6_spill] sm:$0xff] }
 0x15c   : > { %v3335_v55 = vadd.f32 %v3269_v52, %v4149_v59  ;;  %v1713_v24 = vpop.f32.mrb[25].mxu0  ;;  %v4433_v59 = vld [vmem:[#allocation8_spill] sm:$0xff]  ;;  %v4441_v52 = vld [vmem:[#allocation7_spill] sm:$0xff] }
 0x15d   : > { %v2469_v39 = vadd.f32 %v2468_v31, %v2406_v51  ;;  %v2602_v32 = vadd.f32 %v2601_v42, %v2539_v60  ;;  %v3336_v43 = vadd.f32 %v1713_v24, %v4153_v61  ;;  %v3270_v62 = vpop.f32.mrb[26].mxu0 }
 0x15e   : > { %1962 = vst [vmem:[%s4181_s27 + $0xd0] sm:$0xff] %v3335_v55  ;;  %v3337_v8 = vadd.f32 %v3270_v62, %v4432_v58  ;;  %v1716_v28 = vpop.f32.mrb[27].mxu0  ;;  %v2410_v46 = vmul.f32 %v3335_v55, %v4435_v63  ;;  %v4442_v62 = vld [vmem:[#allocation12_spill] sm:$0xff]  ;;  %v4317_v58 = vpop.permute.xlu1 %2301 }
 0x15f   : > { %v2603_v26 = vadd.f32 %v2602_v32, %v2540_v3  ;;  %1960 = vst [vmem:[%s4181_s27 + $0xc0] sm:$0xff] %v3336_v43  ;;  %v2408_v44 = vmul.f32 %v3336_v43, %v4433_v59  ;;  %v2470_v34 = vadd.f32 %v2469_v39, %v2407_v12  ;;  %v3338_v33 = vadd.f32 %v1716_v28, %v4434_v45  ;;  %v4313_v3 = vpop.permute.xlu0 %2296 }
 0x160   : > { %1963 = vst [vmem:[%s4181_s27 + $0xd8] sm:$0xff] %v3337_v8  ;;  %v2411_v54 = vmul.f32 %v3337_v8, %v4437_v35  ;;  %v2544_v19 = vmul.f32 %v3335_v55, %v2410_v46 }
 0x161   : > { %v2471_v61 = vadd.f32 %v2470_v34, %v2408_v44  ;;  %v2542_v18 = vmul.f32 %v3336_v43, %v2408_v44  ;;  %v2604_v48 = vadd.f32 %v2603_v26, %v2541_v4  ;;  %1961 = vst [vmem:[%s4181_s27 + $0xc8] sm:$0xff] %v3338_v33  ;;  %v2409_v47 = vmul.f32 %v3338_v33, %v4436_v29 }
 0x162   : > { %v2545_v2 = vmul.f32 %v3337_v8, %v2411_v54 }
 0x163   : > { %v2605_v9 = vadd.f32 %v2604_v48, %v2542_v18  ;;  %v2472_v21 = vadd.f32 %v2471_v61, %v2409_v47  ;;  %v2543_v36 = vmul.f32 %v3338_v33, %v2409_v47  ;;  %v3273_v13 = vpop.f32.mrb[28].mxu0 }
 0x164   : > { %v3339_v56 = vadd.f32 %v3273_v13, %v4438_v49  ;;  %v1729_v57 = vpop.f32.mrb[29].mxu0  ;;  %v4325_v49 = vpop.permute.xlu0 %2306 }
 0x165   : > { %v2473_v50 = vadd.f32 %v2472_v21, %v2410_v46  ;;  %v2606_v14 = vadd.f32 %v2605_v9, %v2543_v36  ;;  %v3340_v51 = vadd.f32 %v1729_v57, %v4439_v23  ;;  %v3274_v30 = vpop.f32.mrb[30].mxu0 }
 0x166   : > { %1966 = vst [vmem:[%s4181_s27 + $0xf0] sm:$0xff] %v3339_v56  ;;  %v3341_v53 = vadd.f32 %v3274_v30, %v4440_v37  ;;  %v1732_v12 = vpop.f32.mrb[31].mxu0  ;;  %v2414_v55 = vmul.f32 %v3339_v56, %v4209_v1 }
 0x167   : > { %v2607_v42 = vadd.f32 %v2606_v14, %v2544_v19  ;;  %1964 = vst [vmem:[%s4181_s27 + $0xe0] sm:$0xff] %v3340_v51  ;;  %v2412_v31 = vmul.f32 %v3340_v51, %v4196_v6  ;;  %v2474_v60 = vadd.f32 %v2473_v50, %v2411_v54  ;;  %v3342_v24 = vadd.f32 %v1732_v12, %v4441_v52  ;;  %v4329_v14 = vpop.permute.xlu1 %2311 }
 0x168   : > { %1967 = vst [vmem:[%s4181_s27 + $0xf8] sm:$0xff] %v3341_v53  ;;  %v2415_v8 = vmul.f32 %v3341_v53, %v4213_v0  ;;  %v2548_v63 = vmul.f32 %v3339_v56, %v2414_v55 }
 0x169   : > { %v2475_v39 = vadd.f32 %v2474_v60, %v2412_v31  ;;  %v2546_v32 = vmul.f32 %v3340_v51, %v2412_v31  ;;  %v2608_v43 = vadd.f32 %v2607_v42, %v2545_v2  ;;  %1965 = vst [vmem:[%s4181_s27 + $0xe8] sm:$0xff] %v3342_v24  ;;  %v2413_v4 = vmul.f32 %v3342_v24, %v4442_v62 }
 0x16a   : > { %v2549_v0 = vmul.f32 %v3341_v53, %v2415_v8 }
 0x16b   : > { %v3209_v28 = vpop.f32.mrb[32].mxu1  ;;  %v2609_v6 = vadd.f32 %v2608_v43, %v2546_v32  ;;  %v2476_v26 = vadd.f32 %v2475_v39, %v2413_v4  ;;  %v2547_v59 = vmul.f32 %v3342_v24, %v2413_v4  ;;  %v3277_v44 = vpop.f32.mrb[32].mxu0 }
 0x16c   : > { %v1120_v1 = vpop.f32.mrb[33].mxu1  ;;  %v3343_v34 = vadd.f32 %v3277_v44, %v3209_v28  ;;  %v1745_v45 = vpop.f32.mrb[33].mxu0 }
 0x16d   : > { %v3210_v33 = vpop.f32.mrb[34].mxu1  ;;  %v2477_v46 = vadd.f32 %v2476_v26, %v2414_v55  ;;  %v2610_v61 = vadd.f32 %v2609_v6, %v2547_v59  ;;  %v3344_v18 = vadd.f32 %v1745_v45, %v1120_v1  ;;  %v3278_v48 = vpop.f32.mrb[34].mxu0 }
 0x16e   : > { %v1123_v29 = vpop.f32.mrb[35].mxu1  ;;  %1970 = vst [vmem:[%s4181_s27 + $0x110] sm:$0xff] %v3343_v34  ;;  %v3345_v47 = vadd.f32 %v3278_v48, %v3210_v33  ;;  %v1748_v35 = vpop.f32.mrb[35].mxu0  ;;  %v2418_v13 = vmul.f32 %v3343_v34, %v4233_v17 }
 0x16f   : > { %v2611_v54 = vadd.f32 %v2610_v61, %v2548_v63  ;;  %1968 = vst [vmem:[%s4181_s27 + $0x100] sm:$0xff] %v3344_v18  ;;  %v2416_v9 = vmul.f32 %v3344_v18, %v4220_v15  ;;  %v2478_v21 = vadd.f32 %v2477_v46, %v2415_v8  ;;  %v3346_v36 = vadd.f32 %v1748_v35, %v1123_v29  ;;  %v4337_v6 = vpop.permute.xlu0 %2316 }
 0x170   : > { %1971 = vst [vmem:[%s4181_s27 + $0x118] sm:$0xff] %v3345_v47  ;;  %v2419_v23 = vmul.f32 %v3345_v47, %v4236_v20  ;;  %v2552_v31 = vmul.f32 %v3343_v34, %v2418_v13  ;;  %v4341_v34 = vpop.permute.xlu1 %2321 }
 0x171   : > { %v2479_v56 = vadd.f32 %v2478_v21, %v2416_v9  ;;  %v2550_v57 = vmul.f32 %v3344_v18, %v2416_v9  ;;  %v2612_v19 = vadd.f32 %v2611_v54, %v2549_v0  ;;  %1969 = vst [vmem:[%s4181_s27 + $0x108] sm:$0xff] %v3346_v36  ;;  %v2417_v50 = vmul.f32 %v3346_v36, %v4225_v16 }
 0x172   : > { %v2553_v20 = vmul.f32 %v3345_v47, %v2419_v23 }
 0x173   : > { %v3213_v51 = vpop.f32.mrb[36].mxu1  ;;  %v2613_v15 = vadd.f32 %v2612_v19, %v2550_v57  ;;  %v2480_v30 = vadd.f32 %v2479_v56, %v2417_v50  ;;  %v2551_v2 = vmul.f32 %v3346_v36, %v2417_v50  ;;  %v3281_v37 = vpop.f32.mrb[36].mxu0 }
 0x174   : > { %v1136_v17 = vpop.f32.mrb[37].mxu1  ;;  %v3347_v53 = vadd.f32 %v3281_v37, %v3213_v51  ;;  %v1761_v12 = vpop.f32.mrb[37].mxu0 }
 0x175   : > { %v3214_v42 = vpop.f32.mrb[38].mxu1  ;;  %v2481_v60 = vadd.f32 %v2480_v30, %v2418_v13  ;;  %v2614_v52 = vadd.f32 %v2613_v15, %v2551_v2  ;;  %v3348_v16 = vadd.f32 %v1761_v12, %v1136_v17  ;;  %v3282_v24 = vpop.f32.mrb[38].mxu0 }
 0x176   : > { %v1139_v55 = vpop.f32.mrb[39].mxu1  ;;  %1974 = vst [vmem:[%s4181_s27 + $0x130] sm:$0xff] %v3347_v53  ;;  %v3349_v39 = vadd.f32 %v3282_v24, %v3214_v42  ;;  %v1764_v32 = vpop.f32.mrb[39].mxu0  ;;  %v2422_v28 = vmul.f32 %v3347_v53, %v4261_v5 }
 0x177   : > { %v2615_v43 = vadd.f32 %v2614_v52, %v2552_v31  ;;  %1972 = vst [vmem:[%s4181_s27 + $0x120] sm:$0xff] %v3348_v16  ;;  %v2420_v62 = vmul.f32 %v3348_v16, %v4248_v10  ;;  %v2482_v4 = vadd.f32 %v2481_v60, %v2419_v23  ;;  %v3350_v8 = vadd.f32 %v1764_v32, %v1139_v55  ;;  %v4349_v23 = vpop.permute.xlu0 %2326  ;;  %v4353_v37 = vpop.permute.xlu1 %2331 }
 0x178   : > { %1975 = vst [vmem:[%s4181_s27 + $0x138] sm:$0xff] %v3349_v39  ;;  %v2423_v45 = vmul.f32 %v3349_v39, %v4265_v27  ;;  %v2556_v0 = vmul.f32 %v3347_v53, %v2422_v28 }
 0x179   : > { %v2483_v26 = vadd.f32 %v2482_v4, %v2420_v62  ;;  %v2554_v59 = vmul.f32 %v3348_v16, %v2420_v62  ;;  %v2616_v44 = vadd.f32 %v2615_v43, %v2553_v20  ;;  %1973 = vst [vmem:[%s4181_s27 + $0x128] sm:$0xff] %v3350_v8  ;;  %v2421_v1 = vmul.f32 %v3350_v8, %v4250_v41 }
 0x17a   : > { %v2557_v27 = vmul.f32 %v3349_v39, %v2423_v45 }
 0x17b   : > { %v3217_v33 = vpop.f32.mrb[40].mxu1  ;;  %v2617_v10 = vadd.f32 %v2616_v44, %v2554_v59  ;;  %v2484_v63 = vadd.f32 %v2483_v26, %v2421_v1  ;;  %v2555_v46 = vmul.f32 %v3350_v8, %v2421_v1  ;;  %v3285_v61 = vpop.f32.mrb[40].mxu0 }
 0x17c   : > { %v1152_v5 = vpop.f32.mrb[41].mxu1  ;;  %v3351_v18 = vadd.f32 %v3285_v61, %v3217_v33  ;;  %v1777_v48 = vpop.f32.mrb[41].mxu0 }
 0x17d   : > { %v3218_v29 = vpop.f32.mrb[42].mxu1  ;;  %v2485_v47 = vadd.f32 %v2484_v63, %v2422_v28  ;;  %v2618_v35 = vadd.f32 %v2617_v10, %v2555_v46  ;;  %v3352_v41 = vadd.f32 %v1777_v48, %v1152_v5  ;;  %v3286_v54 = vpop.f32.mrb[42].mxu0 }
 0x17e   : > { %v1155_v9 = vpop.f32.mrb[43].mxu1  ;;  %1978 = vst [vmem:[%s4181_s27 + $0x150] sm:$0xff] %v3351_v18  ;;  %v3353_v21 = vadd.f32 %v3286_v54, %v3218_v29  ;;  %v1780_v36 = vpop.f32.mrb[43].mxu0  ;;  %v2426_v50 = vmul.f32 %v3351_v18, %v4285_v7 }
 0x17f   : > { %v2619_v13 = vadd.f32 %v2618_v35, %v2556_v0  ;;  %1976 = vst [vmem:[%s4181_s27 + $0x140] sm:$0xff] %v3352_v41  ;;  %v2424_v56 = vmul.f32 %v3352_v41, %v4272_v38  ;;  %v2486_v57 = vadd.f32 %v2485_v47, %v2423_v45  ;;  %v3354_v19 = vadd.f32 %v1780_v36, %v1155_v9  ;;  %v4361_v44 = vpop.permute.xlu0 %2336  ;;  %v4365_v63 = vpop.permute.xlu1 %2341 }
 0x180   : > { %1979 = vst [vmem:[%s4181_s27 + $0x158] sm:$0xff] %v3353_v21  ;;  %v2427_v17 = vmul.f32 %v3353_v21, %v4288_v25  ;;  %v2560_v24 = vmul.f32 %v3351_v18, %v2426_v50 }
 0x181   : > { %v2487_v51 = vadd.f32 %v2486_v57, %v2424_v56  ;;  %v2558_v15 = vmul.f32 %v3352_v41, %v2424_v56  ;;  %v2620_v30 = vadd.f32 %v2619_v13, %v2557_v27  ;;  %1977 = vst [vmem:[%s4181_s27 + $0x148] sm:$0xff] %v3354_v19  ;;  %v2425_v2 = vmul.f32 %v3354_v19, %v4277_v40 }
 0x182   : > { %v2561_v25 = vmul.f32 %v3353_v21, %v2427_v17 }
 0x183   : > { %v3221_v53 = vpop.f32.mrb[44].mxu1  ;;  %v2621_v38 = vadd.f32 %v2620_v30, %v2558_v15  ;;  %v2488_v12 = vadd.f32 %v2487_v51, %v2425_v2  ;;  %v2559_v42 = vmul.f32 %v3354_v19, %v2425_v2  ;;  %v3289_v31 = vpop.f32.mrb[44].mxu0 }
 0x184   : > { %v1168_v7 = vpop.f32.mrb[45].mxu1  ;;  %v3355_v60 = vadd.f32 %v3289_v31, %v3221_v53  ;;  %v1793_v52 = vpop.f32.mrb[45].mxu0 }
 0x185   : > { %v3222_v16 = vpop.f32.mrb[46].mxu1  ;;  %v2489_v55 = vadd.f32 %v2488_v12, %v2426_v50  ;;  %v2622_v20 = vadd.f32 %v2621_v38, %v2559_v42  ;;  %v3356_v40 = vadd.f32 %v1793_v52, %v1168_v7  ;;  %v3290_v39 = vpop.f32.mrb[46].mxu0 }
 0x186   : > { %v1171_v32 = vpop.f32.mrb[47].mxu1  ;;  %1982 = vst [vmem:[%s4181_s27 + $0x170] sm:$0xff] %v3355_v60  ;;  %v3357_v43 = vadd.f32 %v3290_v39, %v3222_v16  ;;  %v1796_v62 = vpop.f32.mrb[47].mxu0  ;;  %v2430_v59 = vmul.f32 %v3355_v60, %v4313_v3 }
 0x187   : > { %v2623_v4 = vadd.f32 %v2622_v20, %v2560_v24  ;;  %1980 = vst [vmem:[%s4181_s27 + $0x160] sm:$0xff] %v3356_v40  ;;  %v2428_v8 = vmul.f32 %v3356_v40, %v4300_v11  ;;  %v2490_v28 = vadd.f32 %v2489_v55, %v2427_v17  ;;  %v3358_v26 = vadd.f32 %v1796_v62, %v1171_v32  ;;  %v4373_v51 = vpop.permute.xlu0 %2346  ;;  %v4377_v53 = vpop.permute.xlu1 %2351 }
 0x188   : > { %1983 = vst [vmem:[%s4181_s27 + $0x178] sm:$0xff] %v3357_v43  ;;  %v2431_v46 = vmul.f32 %v3357_v43, %v4317_v58  ;;  %v2564_v35 = vmul.f32 %v3355_v60, %v2430_v59 }
 0x189   : > { %v2491_v1 = vadd.f32 %v2490_v28, %v2428_v8  ;;  %v2562_v45 = vmul.f32 %v3356_v40, %v2428_v8  ;;  %v2624_v33 = vadd.f32 %v2623_v4, %v2561_v25  ;;  %1981 = vst [vmem:[%s4181_s27 + $0x168] sm:$0xff] %v3358_v26  ;;  %v2429_v10 = vmul.f32 %v3358_v26, %v4302_v22 }
 0x18a   : > { %v2565_v58 = vmul.f32 %v3357_v43, %v2431_v46 }
 0x18b   : > { %v3225_v61 = vpop.f32.mrb[48].mxu1  ;;  %v2625_v11 = vadd.f32 %v2624_v33, %v2562_v45  ;;  %v2492_v5 = vadd.f32 %v2491_v1, %v2429_v10  ;;  %v2563_v18 = vmul.f32 %v3358_v26, %v2429_v10  ;;  %v3293_v48 = vpop.f32.mrb[48].mxu0 }
 0x18c   : > { %v1184_v3 = vpop.f32.mrb[49].mxu1  ;;  %v3359_v29 = vadd.f32 %v3293_v48, %v3225_v61  ;;  %v1809_v0 = vpop.f32.mrb[49].mxu0 }
 0x18d   : > { %v3226_v47 = vpop.f32.mrb[50].mxu1  ;;  %v2493_v41 = vadd.f32 %v2492_v5, %v2430_v59  ;;  %v2626_v54 = vadd.f32 %v2625_v11, %v2563_v18  ;;  %v3360_v22 = vadd.f32 %v1809_v0, %v1184_v3  ;;  %v3294_v9 = vpop.f32.mrb[50].mxu0 }
 0x18e   : > { %v1187_v27 = vpop.f32.mrb[51].mxu1  ;;  %1986 = vst [vmem:[%s4181_s27 + $0x190] sm:$0xff] %v3359_v29  ;;  %v3361_v21 = vadd.f32 %v3294_v9, %v3226_v47  ;;  %v1812_v36 = vpop.f32.mrb[51].mxu0  ;;  %v2434_v50 = vmul.f32 %v3359_v29, %v4337_v6 }
 0x18f   : > { %v2627_v13 = vadd.f32 %v2626_v54, %v2564_v35  ;;  %1984 = vst [vmem:[%s4181_s27 + $0x180] sm:$0xff] %v3360_v22  ;;  %v2432_v56 = vmul.f32 %v3360_v22, %v4325_v49  ;;  %v2494_v57 = vadd.f32 %v2493_v41, %v2431_v46  ;;  %v3362_v19 = vadd.f32 %v1812_v36, %v1187_v27  ;;  %v2357_v26 = vpop.permute.xlu0 %2356  ;;  %v2362_v10 = vpop.permute.xlu1 %2361 }
 0x190   : > { %1987 = vst [vmem:[%s4181_s27 + $0x198] sm:$0xff] %v3361_v21  ;;  %v2435_v38 = vmul.f32 %v3361_v21, %v4341_v34  ;;  %v2568_v24 = vmul.f32 %v3359_v29, %v2434_v50 }
 0x191   : > { %v2495_v15 = vadd.f32 %v2494_v57, %v2432_v56  ;;  %v2566_v30 = vmul.f32 %v3360_v22, %v2432_v56  ;;  %v2628_v2 = vadd.f32 %v2627_v13, %v2565_v58  ;;  %1985 = vst [vmem:[%s4181_s27 + $0x188] sm:$0xff] %v3362_v19  ;;  %v2433_v17 = vmul.f32 %v3362_v19, %v4329_v14 }
 0x192   : > { %v2569_v34 = vmul.f32 %v3361_v21, %v2435_v38 }
 0x193   : > { %v3229_v12 = vpop.f32.mrb[52].mxu1  ;;  %v2629_v49 = vadd.f32 %v2628_v2, %v2566_v30  ;;  %v2496_v42 = vadd.f32 %v2495_v15, %v2433_v17  ;;  %v2567_v31 = vmul.f32 %v3362_v19, %v2433_v17  ;;  %v3297_v7 = vpop.f32.mrb[52].mxu0 }
 0x194   : > { %v1200_v6 = vpop.f32.mrb[53].mxu1  ;;  %v3363_v60 = vadd.f32 %v3297_v7, %v3229_v12  ;;  %v1825_v52 = vpop.f32.mrb[53].mxu0 }
 0x195   : > { %v3230_v16 = vpop.f32.mrb[54].mxu1  ;;  %v2497_v55 = vadd.f32 %v2496_v42, %v2434_v50  ;;  %v2630_v20 = vadd.f32 %v2629_v49, %v2567_v31  ;;  %v3364_v14 = vadd.f32 %v1825_v52, %v1200_v6  ;;  %v3298_v40 = vpop.f32.mrb[54].mxu0 }
 0x196   : > { %v1203_v39 = vpop.f32.mrb[55].mxu1  ;;  %1990 = vst [vmem:[%s4181_s27 + $0x1b0] sm:$0xff] %v3363_v60  ;;  %v3365_v32 = vadd.f32 %v3298_v40, %v3230_v16  ;;  %v1828_v25 = vpop.f32.mrb[55].mxu0  ;;  %v2438_v28 = vmul.f32 %v3363_v60, %v4361_v44 }
 0x197   : > { %v2631_v43 = vadd.f32 %v2630_v20, %v2568_v24  ;;  %1988 = vst [vmem:[%s4181_s27 + $0x1a0] sm:$0xff] %v3364_v14  ;;  %v2436_v62 = vmul.f32 %v3364_v14, %v4349_v23  ;;  %v2498_v4 = vadd.f32 %v2497_v55, %v2435_v38  ;;  %v3366_v8 = vadd.f32 %v1828_v25, %v1203_v39  ;;  %v2367_v56 = vpop.permute.xlu0 %2366  ;;  %v2372_v30 = vpop.permute.xlu1 %2371 }
 0x198   : > { %1991 = vst [vmem:[%s4181_s27 + $0x1b8] sm:$0xff] %v3365_v32  ;;  %v2439_v46 = vmul.f32 %v3365_v32, %v4365_v63  ;;  %v2572_v0 = vmul.f32 %v3363_v60, %v2438_v28 }
 0x199   : > { %v2499_v59 = vadd.f32 %v2498_v4, %v2436_v62  ;;  %v2570_v1 = vmul.f32 %v3364_v14, %v2436_v62  ;;  %v2632_v45 = vadd.f32 %v2631_v43, %v2569_v34  ;;  %1989 = vst [vmem:[%s4181_s27 + $0x1a8] sm:$0xff] %v3366_v8  ;;  %v2437_v33 = vmul.f32 %v3366_v8, %v4353_v37 }
 0x19a   : > { %v2573_v63 = vmul.f32 %v3365_v32, %v2439_v46 }
 0x19b   : > { %v3233_v61 = vpop.f32.mrb[56].mxu1  ;;  %v2633_v11 = vadd.f32 %v2632_v45, %v2570_v1  ;;  %v2500_v5 = vadd.f32 %v2499_v59, %v2437_v33  ;;  %v2571_v23 = vmul.f32 %v3366_v8, %v2437_v33  ;;  %v3301_v18 = vpop.f32.mrb[56].mxu0 }
 0x19c   : > { %v1216_v48 = vpop.f32.mrb[57].mxu1  ;;  %v3367_v44 = vadd.f32 %v3301_v18, %v3233_v61  ;;  %v1841_v3 = vpop.f32.mrb[57].mxu0 }
 0x19d   : > { %v3234_v29 = vpop.f32.mrb[58].mxu1  ;;  %v2501_v47 = vadd.f32 %v2500_v5, %v2438_v28  ;;  %v2634_v35 = vadd.f32 %v2633_v11, %v2571_v23  ;;  %v3368_v41 = vadd.f32 %v1841_v3, %v1216_v48  ;;  %v3302_v37 = vpop.f32.mrb[58].mxu0 }
 0x19e   : > { %v1219_v54 = vpop.f32.mrb[59].mxu1  ;;  %1994 = vst [vmem:[%s4181_s27 + $0x1d0] sm:$0xff] %v3367_v44  ;;  %v3369_v22 = vadd.f32 %v3302_v37, %v3234_v29  ;;  %v1844_v9 = vpop.f32.mrb[59].mxu0  ;;  %v2442_v13 = vmul.f32 %v3367_v44, %v2357_v26 }
 0x19f   : > { %v2635_v27 = vadd.f32 %v2634_v35, %v2572_v0  ;;  %1992 = vst [vmem:[%s4181_s27 + $0x1c0] sm:$0xff] %v3368_v41  ;;  %v2440_v58 = vmul.f32 %v3368_v41, %v4373_v51  ;;  %v2502_v21 = vadd.f32 %v2501_v47, %v2439_v46  ;;  %v3370_v36 = vadd.f32 %v1844_v9, %v1219_v54  ;;  %v2377_v39 = vpop.permute.xlu0 %2376  ;;  %v2382_v59 = vpop.permute.xlu1 %2381 }
 0x1a0   : > { %1995 = vst [vmem:[%s4181_s27 + $0x1d8] sm:$0xff] %v3369_v22  ;;  %v2443_v2 = vmul.f32 %v3369_v22, %v2362_v10  ;;  %v2576_v60 = vmul.f32 %v3367_v44, %v2442_v13 }
 0x1a1   : > { %v2503_v57 = vadd.f32 %v2502_v21, %v2440_v58  ;;  %v2574_v19 = vmul.f32 %v3368_v41, %v2440_v58  ;;  %v2636_v50 = vadd.f32 %v2635_v27, %v2573_v63  ;;  %1993 = vst [vmem:[%s4181_s27 + $0x1c8] sm:$0xff] %v3370_v36  ;;  %v2441_v15 = vmul.f32 %v3370_v36, %v4377_v53 }
 0x1a2   : > { %v2577_v20 = vmul.f32 %v3369_v22, %v2443_v2 }
 0x1a3   : > { %v3237_v17 = vpop.f32.mrb[60].mxu1  ;;  %v2637_v38 = vadd.f32 %v2636_v50, %v2574_v19  ;;  %v2504_v12 = vadd.f32 %v2503_v57, %v2441_v15  ;;  %v2575_v49 = vmul.f32 %v3370_v36, %v2441_v15  ;;  %v3305_v42 = vpop.f32.mrb[60].mxu0 }
 0x1a4   : > { %v1232_v51 = vpop.f32.mrb[61].mxu1  ;;  %v3371_v31 = vadd.f32 %v3305_v42, %v3237_v17  ;;  %v1857_v7 = vpop.f32.mrb[61].mxu0 }
 0x1a5   : > { %v3238_v6 = vpop.f32.mrb[62].mxu1  ;;  %v2505_v52 = vadd.f32 %v2504_v12, %v2442_v13  ;;  %v2638_v16 = vadd.f32 %v2637_v38, %v2575_v49  ;;  %v3372_v24 = vadd.f32 %v1857_v7, %v1232_v51  ;;  %v3306_v55 = vpop.f32.mrb[62].mxu0 }
 0x1a6   : > { %v1235_v53 = vpop.f32.mrb[63].mxu1  ;;  %1998 = vst [vmem:[%s4181_s27 + $0x1f0] sm:$0xff] %v3371_v31  ;;  %v3373_v14 = vadd.f32 %v3306_v55, %v3238_v6  ;;  %v1860_v40 = vpop.f32.mrb[63].mxu0  ;;  %v2446_v62 = vmul.f32 %v3371_v31, %v2377_v39 }
 0x1a7   : > { %v2639_v34 = vadd.f32 %v2638_v16, %v2576_v60  ;;  %1996 = vst [vmem:[%s4181_s27 + $0x1e0] sm:$0xff] %v3372_v24  ;;  %v2444_v32 = vmul.f32 %v3372_v24, %v2367_v56  ;;  %v2506_v25 = vadd.f32 %v2505_v52, %v2443_v2  ;;  %v3374_v43 = vadd.f32 %v1860_v40, %v1235_v53 }
 0x1a8   : > { %1999 = vst [vmem:[%s4181_s27 + $0x1f8] sm:$0xff] %v3373_v14  ;;  %v2447_v45 = vmul.f32 %v3373_v14, %v2382_v59  ;;  %v2580_v46 = vmul.f32 %v3371_v31, %v2446_v62 }
 0x1a9   : > { %v2507_v4 = vadd.f32 %v2506_v25, %v2444_v32  ;;  %v2578_v8 = vmul.f32 %v3372_v24, %v2444_v32  ;;  %v2640_v28 = vadd.f32 %v2639_v34, %v2577_v20  ;;  %1997 = vst [vmem:[%s4181_s27 + $0x1e8] sm:$0xff] %v3374_v43  ;;  %v2445_v26 = vmul.f32 %v3374_v43, %v2372_v30 }
 0x1aa   : > { %v2581_v5 = vmul.f32 %v3373_v14, %v2447_v45 }
 0x1ab   : > { %v2641_v1 = vadd.f32 %v2640_v28, %v2578_v8  ;;  %v2508_v33 = vadd.f32 %v2507_v4, %v2445_v26  ;;  %v2579_v10 = vmul.f32 %v3374_v43, %v2445_v26 }
 0x1ad   : > { %v2509_v61 = vadd.f32 %v2508_v33, %v2446_v62  ;;  %v2642_v11 = vadd.f32 %v2641_v1, %v2579_v10 }
 0x1af   : > { %v2510_v23 = vadd.f32 %v2509_v61, %v2447_v45  ;;  %v2643_v18 = vadd.f32 %v2642_v11, %v2580_v46 }
 0x1b1   : > { %v2511_v48 = vrot.slane %v2510_v23, 4  ;;  %v2644_v44 = vadd.f32 %v2643_v18, %v2581_v5 }
 0x1b3   : > { %v2512_v3 = vadd.f32 %v2511_v48, %v2510_v23  ;;  %v2645_v29 = vrot.slane %v2644_v44, 4 }
 0x1b5   : > { %v2513_v0 = vrot.slane %v2512_v3, 2  ;;  %v2646_v47 = vadd.f32 %v2645_v29, %v2644_v44 }
 0x1b7   : > { %v2514_v35 = vadd.f32 %v2513_v0, %v2512_v3  ;;  %v2647_v41 = vrot.slane %v2646_v47, 2 }
 0x1b9   : > { %v2515_v37 = vrot.slane %v2514_v35, 1  ;;  %v2648_v54 = vadd.f32 %v2647_v41, %v2646_v47 }
 0x1bb   : > { %v2516_v63 = vadd.f32 %v2515_v37, %v2514_v35  ;;  %v2649_v22 = vrot.slane %v2648_v54, 1 }
 0x1bd   : > { %2517 = vst [vmem:[%s288_s30] sm:$0x1] %v2516_v63  ;;  %v2650_v9 = vadd.f32 %v2649_v22, %v2648_v54 }
 0x1bf   : > { %2651 = vst [vmem:[%s294_s8] sm:$0x1] %v2650_v9 }
 0x1c0 PF: > { %s16_s20 = sadd.s32 1, %s3565_s20   ;;  %s4443_s18 = smov %s3561_s19 }
 0x1c1   : > { %p13_p5 = scmp.ge.s32.totalorder %s16_s20, 4   ;;  %s4444_s19 = smov %s4446_s21 }
 0x1c3   :  { %15 = sbr.rel (!%p13_p5) target bundleno = 2 (0x2), region = 91 }

// kernel: upconv_forward_impl.7
= control target key start
LH: loop header
LB: loop body
LE: loop exit
PB: predicated region body
PF: predicated region fallthrough
CT: control target
= control target key end

     0   :  { %s611_s12 = smov 0   ;;  %s898_s0 = inlined_call_operand.vmem [shape: f32[2,512,128], index: 0, kind: input, shape index: {}]   ;;  %s899_s1 = inlined_call_operand.vmem [shape: f32[1,1,128], index: 1, kind: input, shape index: {}]   ;;  %s900_s2 = inlined_call_operand.vmem [shape: f32[1,1,128], index: 2, kind: input, shape index: {}]   ;;  %s901_s3 = inlined_call_operand.vmem [shape: f32[2,512,128], index: 3, kind: output, shape index: {}]  }
   0x1 LB: > { %s560_s13 = sadd.s32 4294967295, %s589_s12   ;;  %p564_p0 = scmp.ge.s32.totalorder %s589_s12, 1  ;;  %s589_s12 = sphi %s611_s12, %s13_s12  }
   0x2   : > { %p137_p1 = scmp.lt.s32.totalorder %s589_s12, 3 }
   0x4   : > { %p138_p2 = pnand %p564_p0, %p137_p1 }
   0x5   : > { %p161_p3 = scmp.lt.s32.totalorder (!%p138_p2), %s560_s13, 1  ;;  %v622_v0 = vld [vmem:[%s899_s1] ss:$0 sm:$0xff] (!%p138_p2) }
   0x6   : > { %141 = sbr.rel (%p138_p2) target bundleno = 70 (0x46), region = 32  ;;  %v632_v1 = vld [vmem:[%s900_s2] ss:$0 sm:$0xff] (!%p138_p2) }
   0xd   : > { %s903_s13 = smov (!%p161_p3, %s560_s13), 1 }
   0xe   : > { %s573_s14 = sshll.u32 %s903_s13, 9 }
   0xf   : > { %s627_s19 = scalar_lea.vmem %s898_s0, %s573_s14  ;;  %s655_s24 = scalar_lea.vmem %s901_s3, %s573_s14 }
  0x10   : > { %v171_v2 = vld [vmem:[%s627_s19] sm:$0xff]  ;;  %v172_v3 = vld [vmem:[%s627_s19 + $0x8] sm:$0xff]  ;;  %v173_v4 = vld [vmem:[%s627_s19 + $0x10] sm:$0xff] }
  0x11   : > { %v242_v5 = vmul.f32 %v622_v0, %v171_v2  ;;  %v243_v6 = vmul.f32 %v622_v0, %v172_v3  ;;  %v244_v7 = vmul.f32 %v622_v0, %v173_v4  ;;  %v174_v8 = vld [vmem:[%s627_s19 + $0x18] sm:$0xff]  ;;  %v175_v9 = vld [vmem:[%s627_s19 + $0x20] sm:$0xff]  ;;  %v176_v10 = vld [vmem:[%s627_s19 + $0x28] sm:$0xff] }
  0x12   : > { %v245_v11 = vmul.f32 %v622_v0, %v174_v8  ;;  %v246_v12 = vmul.f32 %v622_v0, %v175_v9  ;;  %v247_v13 = vmul.f32 %v622_v0, %v176_v10  ;;  %v177_v14 = vld [vmem:[%s627_s19 + $0x30] sm:$0xff]  ;;  %v178_v15 = vld [vmem:[%s627_s19 + $0x38] sm:$0xff]  ;;  %v179_v24 = vld [vmem:[%s627_s19 + $0x40] sm:$0xff] }
  0x13   : > { %v313_v16 = vadd.f32 %v632_v1, %v242_v5  ;;  %v314_v17 = vadd.f32 %v632_v1, %v243_v6  ;;  %v315_v18 = vadd.f32 %v632_v1, %v244_v7  ;;  %v248_v19 = vmul.f32 %v622_v0, %v177_v14  ;;  %v180_v25 = vld [vmem:[%s627_s19 + $0x48] sm:$0xff]  ;;  %v181_v26 = vld [vmem:[%s627_s19 + $0x50] sm:$0xff]  ;;  %v182_v31 = vld [vmem:[%s627_s19 + $0x58] sm:$0xff] }
  0x14   : > { %v316_v20 = vadd.f32 %v632_v1, %v245_v11  ;;  %v317_v21 = vadd.f32 %v632_v1, %v246_v12  ;;  %v318_v22 = vadd.f32 %v632_v1, %v247_v13  ;;  %v249_v23 = vmul.f32 %v622_v0, %v178_v15  ;;  %v183_v32 = vld [vmem:[%s627_s19 + $0x60] sm:$0xff]  ;;  %v184_v33 = vld [vmem:[%s627_s19 + $0x68] sm:$0xff]  ;;  %v185_v38 = vld [vmem:[%s627_s19 + $0x70] sm:$0xff] }
  0x15   : > { %v377_v27 = vmax.f32 %v313_v16, 0.0  ;;  %v378_v28 = vmax.f32 %v314_v17, 0.0  ;;  %v379_v29 = vmax.f32 %v315_v18, 0.0  ;;  %v319_v30 = vadd.f32 %v632_v1, %v248_v19  ;;  %v186_v43 = vld [vmem:[%s627_s19 + $0x78] sm:$0xff]  ;;  %v187_v56 = vld [vmem:[%s627_s19 + $0x80] sm:$0xff]  ;;  %v188_v57 = vld [vmem:[%s627_s19 + $0x88] sm:$0xff] }
  0x16   : > { %v380_v34 = vmax.f32 %v316_v20, 0.0  ;;  %v381_v35 = vmax.f32 %v317_v21, 0.0  ;;  %v382_v36 = vmax.f32 %v318_v22, 0.0  ;;  %v320_v37 = vadd.f32 %v632_v1, %v249_v23  ;;  %v189_v58 = vld [vmem:[%s627_s19 + $0x90] sm:$0xff]  ;;  %v190_v63 = vld [vmem:[%s627_s19 + $0x98] sm:$0xff]  ;;  %v191_v2 = vld [vmem:[%s627_s19 + $0xa0] sm:$0xff] }
  0x17   : > { %441 = vst [vmem:[%s655_s24] sm:$0xff] %v377_v27  ;;  %442 = vst [vmem:[%s655_s24 + $0x8] sm:$0xff] %v378_v28  ;;  %v383_v39 = vmax.f32 %v319_v30, 0.0  ;;  %v250_v40 = vmul.f32 %v622_v0, %v179_v24  ;;  %v251_v41 = vmul.f32 %v622_v0, %v180_v25  ;;  %v252_v42 = vmul.f32 %v622_v0, %v181_v26  ;;  %v192_v3 = vld [vmem:[%s627_s19 + $0xa8] sm:$0xff]  ;;  %v193_v8 = vld [vmem:[%s627_s19 + $0xb0] sm:$0xff] }
  0x18   : > { %443 = vst [vmem:[%s655_s24 + $0x10] sm:$0xff] %v379_v29  ;;  %444 = vst [vmem:[%s655_s24 + $0x18] sm:$0xff] %v380_v34  ;;  %v384_v44 = vmax.f32 %v320_v37, 0.0  ;;  %v253_v45 = vmul.f32 %v622_v0, %v182_v31  ;;  %v254_v46 = vmul.f32 %v622_v0, %v183_v32  ;;  %v255_v47 = vmul.f32 %v622_v0, %v184_v33  ;;  %v194_v13 = vld [vmem:[%s627_s19 + $0xb8] sm:$0xff]  ;;  %v195_v26 = vld [vmem:[%s627_s19 + $0xc0] sm:$0xff] }
  0x19   : > { %445 = vst [vmem:[%s655_s24 + $0x20] sm:$0xff] %v381_v35  ;;  %446 = vst [vmem:[%s655_s24 + $0x28] sm:$0xff] %v382_v36  ;;  %v321_v48 = vadd.f32 %v632_v1, %v250_v40  ;;  %v322_v49 = vadd.f32 %v632_v1, %v251_v41  ;;  %v323_v50 = vadd.f32 %v632_v1, %v252_v42  ;;  %v196_v27 = vld [vmem:[%s627_s19 + $0xc8] sm:$0xff]  ;;  %v197_v28 = vld [vmem:[%s627_s19 + $0xd0] sm:$0xff] }
  0x1a   : > { %447 = vst [vmem:[%s655_s24 + $0x30] sm:$0xff] %v383_v39  ;;  %v256_v51 = vmul.f32 %v622_v0, %v185_v38  ;;  %448 = vst [vmem:[%s655_s24 + $0x38] sm:$0xff] %v384_v44  ;;  %v324_v52 = vadd.f32 %v632_v1, %v253_v45  ;;  %v325_v53 = vadd.f32 %v632_v1, %v254_v46  ;;  %v198_v33 = vld [vmem:[%s627_s19 + $0xd8] sm:$0xff]  ;;  %v199_v34 = vld [vmem:[%s627_s19 + $0xe0] sm:$0xff] }
  0x1b   : > { %v326_v54 = vadd.f32 %v632_v1, %v255_v47  ;;  %v257_v55 = vmul.f32 %v622_v0, %v186_v43  ;;  %v385_v59 = vmax.f32 %v321_v48, 0.0  ;;  %v386_v60 = vmax.f32 %v322_v49, 0.0  ;;  %v200_v35 = vld [vmem:[%s627_s19 + $0xe8] sm:$0xff]  ;;  %v201_v40 = vld [vmem:[%s627_s19 + $0xf0] sm:$0xff]  ;;  %v202_v45 = vld [vmem:[%s627_s19 + $0xf8] sm:$0xff] }
  0x1c   : > { %v387_v61 = vmax.f32 %v323_v50, 0.0  ;;  %v327_v62 = vadd.f32 %v632_v1, %v256_v51  ;;  %v388_v4 = vmax.f32 %v324_v52, 0.0  ;;  %v389_v5 = vmax.f32 %v325_v53, 0.0 }
  0x1d   : > { %v390_v6 = vmax.f32 %v326_v54, 0.0  ;;  %v328_v7 = vadd.f32 %v632_v1, %v257_v55  ;;  %449 = vst [vmem:[%s655_s24 + $0x40] sm:$0xff] %v385_v59  ;;  %450 = vst [vmem:[%s655_s24 + $0x48] sm:$0xff] %v386_v60  ;;  %v258_v10 = vmul.f32 %v622_v0, %v187_v56  ;;  %v259_v11 = vmul.f32 %v622_v0, %v188_v57  ;;  %v204_v59 = vld [vmem:[%s627_s19 + $0x108] sm:$0xff]  ;;  %v205_v60 = vld [vmem:[%s627_s19 + $0x110] sm:$0xff] }
  0x1e   : > { %451 = vst [vmem:[%s655_s24 + $0x50] sm:$0xff] %v387_v61  ;;  %v391_v9 = vmax.f32 %v327_v62, 0.0  ;;  %v260_v12 = vmul.f32 %v622_v0, %v189_v58  ;;  %452 = vst [vmem:[%s655_s24 + $0x58] sm:$0xff] %v388_v4  ;;  %v261_v15 = vmul.f32 %v622_v0, %v190_v63  ;;  %v262_v16 = vmul.f32 %v622_v0, %v191_v2  ;;  %v203_v58 = vld [vmem:[%s627_s19 + $0x100] sm:$0xff] }
  0x1f   : > { %453 = vst [vmem:[%s655_s24 + $0x60] sm:$0xff] %v389_v5  ;;  %454 = vst [vmem:[%s655_s24 + $0x68] sm:$0xff] %v390_v6  ;;  %v392_v14 = vmax.f32 %v328_v7, 0.0  ;;  %v263_v17 = vmul.f32 %v622_v0, %v192_v3  ;;  %v329_v18 = vadd.f32 %v632_v1, %v258_v10  ;;  %v330_v19 = vadd.f32 %v632_v1, %v259_v11  ;;  %v206_v3 = vld [vmem:[%s627_s19 + $0x118] sm:$0xff]  ;;  %v207_v4 = vld [vmem:[%s627_s19 + $0x120] sm:$0xff] }
  0x20   : > { %455 = vst [vmem:[%s655_s24 + $0x70] sm:$0xff] %v391_v9  ;;  %v331_v20 = vadd.f32 %v632_v1, %v260_v12  ;;  %v264_v21 = vmul.f32 %v622_v0, %v193_v8  ;;  %v332_v22 = vadd.f32 %v632_v1, %v261_v15  ;;  %v333_v23 = vadd.f32 %v632_v1, %v262_v16  ;;  %v208_v5 = vld [vmem:[%s627_s19 + $0x128] sm:$0xff]  ;;  %v209_v10 = vld [vmem:[%s627_s19 + $0x130] sm:$0xff]  ;;  %v210_v15 = vld [vmem:[%s627_s19 + $0x138] sm:$0xff] }
  0x21   : > { %456 = vst [vmem:[%s655_s24 + $0x78] sm:$0xff] %v392_v14  ;;  %v334_v24 = vadd.f32 %v632_v1, %v263_v17  ;;  %v265_v25 = vmul.f32 %v622_v0, %v194_v13  ;;  %v393_v29 = vmax.f32 %v329_v18, 0.0  ;;  %v394_v30 = vmax.f32 %v330_v19, 0.0 }
  0x22   : > { %v395_v31 = vmax.f32 %v331_v20, 0.0  ;;  %v335_v32 = vadd.f32 %v632_v1, %v264_v21  ;;  %v396_v36 = vmax.f32 %v332_v22, 0.0  ;;  %v397_v37 = vmax.f32 %v333_v23, 0.0 }
  0x23   : > { %v398_v38 = vmax.f32 %v334_v24, 0.0  ;;  %v336_v39 = vadd.f32 %v632_v1, %v265_v25  ;;  %457 = vst [vmem:[%s655_s24 + $0x80] sm:$0xff] %v393_v29  ;;  %458 = vst [vmem:[%s655_s24 + $0x88] sm:$0xff] %v394_v30  ;;  %v266_v42 = vmul.f32 %v622_v0, %v195_v26  ;;  %v267_v43 = vmul.f32 %v622_v0, %v196_v27  ;;  %v212_v29 = vld [vmem:[%s627_s19 + $0x148] sm:$0xff]  ;;  %v213_v30 = vld [vmem:[%s627_s19 + $0x150] sm:$0xff] }
  0x24   : > { %459 = vst [vmem:[%s655_s24 + $0x90] sm:$0xff] %v395_v31  ;;  %v399_v41 = vmax.f32 %v335_v32, 0.0  ;;  %v268_v44 = vmul.f32 %v622_v0, %v197_v28  ;;  %460 = vst [vmem:[%s655_s24 + $0x98] sm:$0xff] %v396_v36  ;;  %v269_v47 = vmul.f32 %v622_v0, %v198_v33  ;;  %v270_v48 = vmul.f32 %v622_v0, %v199_v34  ;;  %v211_v28 = vld [vmem:[%s627_s19 + $0x140] sm:$0xff] }
  0x25   : > { %461 = vst [vmem:[%s655_s24 + $0xa0] sm:$0xff] %v397_v37  ;;  %462 = vst [vmem:[%s655_s24 + $0xa8] sm:$0xff] %v398_v38  ;;  %v400_v46 = vmax.f32 %v336_v39, 0.0  ;;  %v271_v49 = vmul.f32 %v622_v0, %v200_v35  ;;  %v337_v50 = vadd.f32 %v632_v1, %v266_v42  ;;  %v338_v51 = vadd.f32 %v632_v1, %v267_v43  ;;  %v214_v35 = vld [vmem:[%s627_s19 + $0x158] sm:$0xff]  ;;  %v215_v36 = vld [vmem:[%s627_s19 + $0x160] sm:$0xff] }
  0x26   : > { %463 = vst [vmem:[%s655_s24 + $0xb0] sm:$0xff] %v399_v41  ;;  %v339_v52 = vadd.f32 %v632_v1, %v268_v44  ;;  %v272_v53 = vmul.f32 %v622_v0, %v201_v40  ;;  %v340_v54 = vadd.f32 %v632_v1, %v269_v47  ;;  %v341_v55 = vadd.f32 %v632_v1, %v270_v48  ;;  %v216_v37 = vld [vmem:[%s627_s19 + $0x168] sm:$0xff]  ;;  %v217_v42 = vld [vmem:[%s627_s19 + $0x170] sm:$0xff]  ;;  %v218_v47 = vld [vmem:[%s627_s19 + $0x178] sm:$0xff] }
  0x27   : > { %464 = vst [vmem:[%s655_s24 + $0xb8] sm:$0xff] %v400_v46  ;;  %v342_v56 = vadd.f32 %v632_v1, %v271_v49  ;;  %v273_v57 = vmul.f32 %v622_v0, %v202_v45  ;;  %v401_v61 = vmax.f32 %v337_v50, 0.0  ;;  %v402_v62 = vmax.f32 %v338_v51, 0.0 }
  0x28   : > { %v403_v63 = vmax.f32 %v339_v52, 0.0  ;;  %v343_v2 = vadd.f32 %v632_v1, %v272_v53  ;;  %v404_v6 = vmax.f32 %v340_v54, 0.0  ;;  %v405_v7 = vmax.f32 %v341_v55, 0.0 }
  0x29   : > { %v406_v8 = vmax.f32 %v342_v56, 0.0  ;;  %v344_v9 = vadd.f32 %v632_v1, %v273_v57  ;;  %465 = vst [vmem:[%s655_s24 + $0xc0] sm:$0xff] %v401_v61  ;;  %466 = vst [vmem:[%s655_s24 + $0xc8] sm:$0xff] %v402_v62  ;;  %v274_v12 = vmul.f32 %v622_v0, %v203_v58  ;;  %v275_v13 = vmul.f32 %v622_v0, %v204_v59  ;;  %v220_v61 = vld [vmem:[%s627_s19 + $0x188] sm:$0xff]  ;;  %v221_v62 = vld [vmem:[%s627_s19 + $0x190] sm:$0xff] }
  0x2a   : > { %467 = vst [vmem:[%s655_s24 + $0xd0] sm:$0xff] %v403_v63  ;;  %v407_v11 = vmax.f32 %v343_v2, 0.0  ;;  %v276_v14 = vmul.f32 %v622_v0, %v205_v60  ;;  %468 = vst [vmem:[%s655_s24 + $0xd8] sm:$0xff] %v404_v6  ;;  %v277_v17 = vmul.f32 %v622_v0, %v206_v3  ;;  %v278_v18 = vmul.f32 %v622_v0, %v207_v4  ;;  %v219_v60 = vld [vmem:[%s627_s19 + $0x180] sm:$0xff] }
  0x2b   : > { %469 = vst [vmem:[%s655_s24 + $0xe0] sm:$0xff] %v405_v7  ;;  %470 = vst [vmem:[%s655_s24 + $0xe8] sm:$0xff] %v406_v8  ;;  %v408_v16 = vmax.f32 %v344_v9, 0.0  ;;  %v279_v19 = vmul.f32 %v622_v0, %v208_v5  ;;  %v345_v20 = vadd.f32 %v632_v1, %v274_v12  ;;  %v346_v21 = vadd.f32 %v632_v1, %v275_v13  ;;  %v222_v5 = vld [vmem:[%s627_s19 + $0x198] sm:$0xff]  ;;  %v223_v6 = vld [vmem:[%s627_s19 + $0x1a0] sm:$0xff] }
  0x2c   : > { %471 = vst [vmem:[%s655_s24 + $0xf0] sm:$0xff] %v407_v11  ;;  %v347_v22 = vadd.f32 %v632_v1, %v276_v14  ;;  %v280_v23 = vmul.f32 %v622_v0, %v209_v10  ;;  %v348_v24 = vadd.f32 %v632_v1, %v277_v17  ;;  %v349_v25 = vadd.f32 %v632_v1, %v278_v18  ;;  %v224_v7 = vld [vmem:[%s627_s19 + $0x1a8] sm:$0xff]  ;;  %v225_v12 = vld [vmem:[%s627_s19 + $0x1b0] sm:$0xff]  ;;  %v226_v17 = vld [vmem:[%s627_s19 + $0x1b8] sm:$0xff] }
  0x2d   : > { %472 = vst [vmem:[%s655_s24 + $0xf8] sm:$0xff] %v408_v16  ;;  %v350_v26 = vadd.f32 %v632_v1, %v279_v19  ;;  %v281_v27 = vmul.f32 %v622_v0, %v210_v15  ;;  %v409_v31 = vmax.f32 %v345_v20, 0.0  ;;  %v410_v32 = vmax.f32 %v346_v21, 0.0 }
  0x2e   : > { %v411_v33 = vmax.f32 %v347_v22, 0.0  ;;  %v351_v34 = vadd.f32 %v632_v1, %v280_v23  ;;  %v412_v38 = vmax.f32 %v348_v24, 0.0  ;;  %v413_v39 = vmax.f32 %v349_v25, 0.0 }
  0x2f   : > { %v414_v40 = vmax.f32 %v350_v26, 0.0  ;;  %v352_v41 = vadd.f32 %v632_v1, %v281_v27  ;;  %473 = vst [vmem:[%s655_s24 + $0x100] sm:$0xff] %v409_v31  ;;  %474 = vst [vmem:[%s655_s24 + $0x108] sm:$0xff] %v410_v32  ;;  %v282_v44 = vmul.f32 %v622_v0, %v211_v28  ;;  %v283_v45 = vmul.f32 %v622_v0, %v212_v29  ;;  %v228_v31 = vld [vmem:[%s627_s19 + $0x1c8] sm:$0xff]  ;;  %v229_v32 = vld [vmem:[%s627_s19 + $0x1d0] sm:$0xff] }
  0x30   : > { %475 = vst [vmem:[%s655_s24 + $0x110] sm:$0xff] %v411_v33  ;;  %v415_v43 = vmax.f32 %v351_v34, 0.0  ;;  %v284_v46 = vmul.f32 %v622_v0, %v213_v30  ;;  %476 = vst [vmem:[%s655_s24 + $0x118] sm:$0xff] %v412_v38  ;;  %v285_v49 = vmul.f32 %v622_v0, %v214_v35  ;;  %v286_v50 = vmul.f32 %v622_v0, %v215_v36  ;;  %v227_v30 = vld [vmem:[%s627_s19 + $0x1c0] sm:$0xff] }
  0x31   : > { %477 = vst [vmem:[%s655_s24 + $0x120] sm:$0xff] %v413_v39  ;;  %478 = vst [vmem:[%s655_s24 + $0x128] sm:$0xff] %v414_v40  ;;  %v416_v48 = vmax.f32 %v352_v41, 0.0  ;;  %v287_v51 = vmul.f32 %v622_v0, %v216_v37  ;;  %v353_v52 = vadd.f32 %v632_v1, %v282_v44  ;;  %v354_v53 = vadd.f32 %v632_v1, %v283_v45  ;;  %v230_v37 = vld [vmem:[%s627_s19 + $0x1d8] sm:$0xff]  ;;  %v231_v38 = vld [vmem:[%s627_s19 + $0x1e0] sm:$0xff] }
  0x32   : > { %479 = vst [vmem:[%s655_s24 + $0x130] sm:$0xff] %v415_v43  ;;  %v355_v54 = vadd.f32 %v632_v1, %v284_v46  ;;  %v288_v55 = vmul.f32 %v622_v0, %v217_v42  ;;  %v356_v56 = vadd.f32 %v632_v1, %v285_v49  ;;  %v357_v57 = vadd.f32 %v632_v1, %v286_v50  ;;  %v232_v39 = vld [vmem:[%s627_s19 + $0x1e8] sm:$0xff]  ;;  %v233_v44 = vld [vmem:[%s627_s19 + $0x1f0] sm:$0xff]  ;;  %v234_v49 = vld [vmem:[%s627_s19 + $0x1f8] sm:$0xff] }
  0x33   : > { %480 = vst [vmem:[%s655_s24 + $0x138] sm:$0xff] %v416_v48  ;;  %v358_v58 = vadd.f32 %v632_v1, %v287_v51  ;;  %v289_v59 = vmul.f32 %v622_v0, %v218_v47  ;;  %v417_v63 = vmax.f32 %v353_v52, 0.0  ;;  %v418_v2 = vmax.f32 %v354_v53, 0.0 }
  0x34   : > { %v419_v3 = vmax.f32 %v355_v54, 0.0  ;;  %v359_v4 = vadd.f32 %v632_v1, %v288_v55  ;;  %v420_v8 = vmax.f32 %v356_v56, 0.0  ;;  %v421_v9 = vmax.f32 %v357_v57, 0.0 }
  0x35   : > { %v422_v10 = vmax.f32 %v358_v58, 0.0  ;;  %v360_v11 = vadd.f32 %v632_v1, %v289_v59  ;;  %481 = vst [vmem:[%s655_s24 + $0x140] sm:$0xff] %v417_v63  ;;  %482 = vst [vmem:[%s655_s24 + $0x148] sm:$0xff] %v418_v2  ;;  %v290_v14 = vmul.f32 %v622_v0, %v219_v60  ;;  %v291_v15 = vmul.f32 %v622_v0, %v220_v61 }
  0x36   : > { %483 = vst [vmem:[%s655_s24 + $0x150] sm:$0xff] %v419_v3  ;;  %v423_v13 = vmax.f32 %v359_v4, 0.0  ;;  %v292_v16 = vmul.f32 %v622_v0, %v221_v62  ;;  %484 = vst [vmem:[%s655_s24 + $0x158] sm:$0xff] %v420_v8  ;;  %v293_v19 = vmul.f32 %v622_v0, %v222_v5  ;;  %v294_v20 = vmul.f32 %v622_v0, %v223_v6 }
  0x37   : > { %485 = vst [vmem:[%s655_s24 + $0x160] sm:$0xff] %v421_v9  ;;  %486 = vst [vmem:[%s655_s24 + $0x168] sm:$0xff] %v422_v10  ;;  %v424_v18 = vmax.f32 %v360_v11, 0.0  ;;  %v295_v21 = vmul.f32 %v622_v0, %v224_v7  ;;  %v361_v22 = vadd.f32 %v632_v1, %v290_v14  ;;  %v362_v23 = vadd.f32 %v632_v1, %v291_v15 }
  0x38   : > { %487 = vst [vmem:[%s655_s24 + $0x170] sm:$0xff] %v423_v13  ;;  %v363_v24 = vadd.f32 %v632_v1, %v292_v16  ;;  %v296_v25 = vmul.f32 %v622_v0, %v225_v12  ;;  %v364_v26 = vadd.f32 %v632_v1, %v293_v19  ;;  %v365_v27 = vadd.f32 %v632_v1, %v294_v20 }
  0x39   : > { %488 = vst [vmem:[%s655_s24 + $0x178] sm:$0xff] %v424_v18  ;;  %v366_v28 = vadd.f32 %v632_v1, %v295_v21  ;;  %v297_v29 = vmul.f32 %v622_v0, %v226_v17  ;;  %v425_v33 = vmax.f32 %v361_v22, 0.0  ;;  %v426_v34 = vmax.f32 %v362_v23, 0.0 }
  0x3a   : > { %v427_v35 = vmax.f32 %v363_v24, 0.0  ;;  %v367_v36 = vadd.f32 %v632_v1, %v296_v25  ;;  %v428_v40 = vmax.f32 %v364_v26, 0.0  ;;  %v429_v41 = vmax.f32 %v365_v27, 0.0 }
  0x3b   : > { %v430_v42 = vmax.f32 %v366_v28, 0.0  ;;  %v368_v43 = vadd.f32 %v632_v1, %v297_v29  ;;  %489 = vst [vmem:[%s655_s24 + $0x180] sm:$0xff] %v425_v33  ;;  %490 = vst [vmem:[%s655_s24 + $0x188] sm:$0xff] %v426_v34  ;;  %v298_v46 = vmul.f32 %v622_v0, %v227_v30  ;;  %v299_v47 = vmul.f32 %v622_v0, %v228_v31 }
  0x3c   : > { %491 = vst [vmem:[%s655_s24 + $0x190] sm:$0xff] %v427_v35  ;;  %v431_v45 = vmax.f32 %v367_v36, 0.0  ;;  %v300_v48 = vmul.f32 %v622_v0, %v229_v32  ;;  %492 = vst [vmem:[%s655_s24 + $0x198] sm:$0xff] %v428_v40  ;;  %v301_v51 = vmul.f32 %v622_v0, %v230_v37  ;;  %v302_v52 = vmul.f32 %v622_v0, %v231_v38 }
  0x3d   : > { %493 = vst [vmem:[%s655_s24 + $0x1a0] sm:$0xff] %v429_v41  ;;  %494 = vst [vmem:[%s655_s24 + $0x1a8] sm:$0xff] %v430_v42  ;;  %v432_v50 = vmax.f32 %v368_v43, 0.0  ;;  %v303_v53 = vmul.f32 %v622_v0, %v232_v39  ;;  %v369_v54 = vadd.f32 %v632_v1, %v298_v46  ;;  %v370_v55 = vadd.f32 %v632_v1, %v299_v47 }
  0x3e   : > { %495 = vst [vmem:[%s655_s24 + $0x1b0] sm:$0xff] %v431_v45  ;;  %v371_v56 = vadd.f32 %v632_v1, %v300_v48  ;;  %v304_v57 = vmul.f32 %v622_v0, %v233_v44  ;;  %v372_v58 = vadd.f32 %v632_v1, %v301_v51  ;;  %v373_v59 = vadd.f32 %v632_v1, %v302_v52 }
  0x3f   : > { %496 = vst [vmem:[%s655_s24 + $0x1b8] sm:$0xff] %v432_v50  ;;  %v374_v60 = vadd.f32 %v632_v1, %v303_v53  ;;  %v305_v61 = vmul.f32 %v622_v0, %v234_v49  ;;  %v433_v62 = vmax.f32 %v369_v54, 0.0  ;;  %v434_v63 = vmax.f32 %v370_v55, 0.0 }
  0x40   : > { %v435_v2 = vmax.f32 %v371_v56, 0.0  ;;  %v375_v3 = vadd.f32 %v632_v1, %v304_v57  ;;  %v436_v4 = vmax.f32 %v372_v58, 0.0  ;;  %v437_v5 = vmax.f32 %v373_v59, 0.0 }
  0x41   : > { %v438_v6 = vmax.f32 %v374_v60, 0.0  ;;  %v376_v7 = vadd.f32 %v632_v1, %v305_v61  ;;  %497 = vst [vmem:[%s655_s24 + $0x1c0] sm:$0xff] %v433_v62  ;;  %498 = vst [vmem:[%s655_s24 + $0x1c8] sm:$0xff] %v434_v63 }
  0x42   : > { %499 = vst [vmem:[%s655_s24 + $0x1d0] sm:$0xff] %v435_v2  ;;  %v439_v8 = vmax.f32 %v375_v3, 0.0  ;;  %500 = vst [vmem:[%s655_s24 + $0x1d8] sm:$0xff] %v436_v4 }
  0x43   : > { %501 = vst [vmem:[%s655_s24 + $0x1e0] sm:$0xff] %v437_v5  ;;  %502 = vst [vmem:[%s655_s24 + $0x1e8] sm:$0xff] %v438_v6  ;;  %v440_v0 = vmax.f32 %v376_v7, 0.0 }
  0x44   : > { %503 = vst [vmem:[%s655_s24 + $0x1f0] sm:$0xff] %v439_v8 }
  0x45   : > { %504 = vst [vmem:[%s655_s24 + $0x1f8] sm:$0xff] %v440_v0 }
  0x46 PF: > { %s13_s12 = sadd.s32 1, %s589_s12  }
  0x47   : > { %p10_p4 = scmp.ge.s32.totalorder %s13_s12, 4  }
  0x49   :  { %12 = sbr.rel (!%p10_p4) target bundleno = 1 (0x1), region = 62 }

// kernel: upconv_forward_impl.6
= control target key start
LH: loop header
LB: loop body
LE: loop exit
PB: predicated region body
PF: predicated region fallthrough
CT: control target
= control target key end

     0   :  { %s3564_s18 = smov 0   ;;  %s3566_s19 = smov 0   ;;  %s4372_s0 = inlined_call_operand.vmem [shape: bf16[2,576,12], index: 0, kind: input, shape index: {}]   ;;  %s4373_s1 = inlined_call_operand.vmem [shape: bf16[3,12,128], index: 1, kind: input, shape index: {}]   ;;  %s4374_s2 = inlined_call_operand.vmem [shape: f32[512,1], index: 2, kind: input, shape index: {}]   ;;  %s4375_s3 = inlined_call_operand.vmem [shape: f32[2,512,128], index: 3, kind: output, shape index: {0}]   ;;  %s4376_s4 = inlined_call_operand.vmem [shape: f32[2,1,128], index: 4, kind: output, shape index: {1}]   ;;  %s4377_s5 = inlined_call_operand.vmem [shape: f32[2,1,128], index: 5, kind: output, shape index: {2}]  }
   0x1   :  { %s3568_s20 = smov 0  }
   0x2 LB: > { %s28_s21 = sadd.s32 1, %s3527_s19  ;;  %p2805_p0 = scmp.ge.s32.totalorder %s3531_s20, 1  ;;  %s3531_s20 = sphi %s3568_s20, %s16_s20   ;;  %s3527_s19 = sphi %s3566_s19, %s4401_s19   ;;  %s3523_s18 = sphi %s3564_s18, %s4400_s18  }
   0x3   : > { %p30_p1 = scmp.ge.s32.totalorder %s28_s21, 2  ;;  %p219_p2 = scmp.lt.s32.totalorder %s3531_s20, 3 }
   0x5   : > { %s4403_s21 = smov (%p30_p1, %s28_s21), 0  ;;  %p220_p3 = pnand %p2805_p0, %p219_p2 }
   0x7   : > { %223 = sbr.rel (%p220_p3) target bundleno = 447 (0x1bf), region = 32 }
   0xe   : > { %v3440_v0 = vld [vmem:[%s4373_s1 + $0x8] sm:$0x3f]   ;;  %vm631_vm0 = vcmask 1045504   ;;  %p266_p4 = scmp.lt.s32.totalorder %s3523_s18, 1  ;;  %v3441_v1 = vld [vmem:[%s4373_s1] sm:$0x3f]  }
   0xf   : > { %3408 = vmatprep.subr.msk.bf16.mxu1 %vm631_vm0, %v3440_v0  ;;  %v633_v2 = vsel %vm631_vm0, %v3440_v0, 0  ;;  %v3444_v3 = vld [vmem:[%s4373_s1 + $0x10] sm:$0x3f]   ;;  %3409 = vmatprep.subr.msk.bf16.mxu0 %vm631_vm0, %v3441_v1  ;;  %v946_v4 = vsel %vm631_vm0, %v3441_v1, 0  ;;  %v1985_v5 = vld [vmem:[%s4374_s2] sm:$0xff]  ;;  %v3533_v6 = vmov 0  }
  0x10   : > { %3081 = vmatpush3.bf16.msra.mxu1 %v633_v2  ;;  %s4405_s18 = smov (!%p266_p4, %s3523_s18), 1  ;;  %3147 = vmatpush3.bf16.msra.mxu0 %v946_v4  ;;  %v1987_v7 = vld [vmem:[%s4374_s2 + $0x10] sm:$0xff]  ;;  %vm534_vm1 = vcmask 97280   ;;  %v1986_v8 = vld [vmem:[%s4374_s2 + $0x8] sm:$0xff]  ;;  %v1988_v9 = vld [vmem:[%s4374_s2 + $0x18] sm:$0xff]  ;;  %v1566_v15 = vsel %vm631_vm0, %v3444_v3, 0 }
  0x11   : > { %3410 = vmatprep.subr.msk.bf16.mxu1 %vm631_vm0, %v3441_v1  ;;  %s3412_s30 = smul.u32 288, %s4405_s18  ;;  %3438 = vset.pattern.permute.xlu0 %v3533_v6  ;;  %v1989_v13 = vld [vmem:[%s4374_s2 + $0x20] sm:$0xff]  ;;  %v1990_v17 = vld [vmem:[%s4374_s2 + $0x28] sm:$0xff]  ;;  %v1991_v18 = vld [vmem:[%s4374_s2 + $0x30] sm:$0xff]  ;;  %s288_s24 = scalar_lea.vmem %s4376_s4, %s4405_s18 }
  0x12   : > { %3411 = vmatprep.subr.msk.bf16.mxu0 %vm631_vm0, %v3444_v3  ;;  %2051 = vperm.xlu0 %3438, %v1985_v5   ;;  %v1992_v19 = vld [vmem:[%s4374_s2 + $0x38] sm:$0xff]  ;;  %v1993_v22 = vld [vmem:[%s4374_s2 + $0x40] sm:$0xff]  ;;  %v1994_v23 = vld [vmem:[%s4374_s2 + $0x48] sm:$0xff]  ;;  %s294_s27 = scalar_lea.vmem %s4377_s5, %s4405_s18 }
  0x13   : > { %s3609_s10 = scalar_lea.vmem %s4372_s0, %s3412_s30  ;;  %3439 = vset.pattern.permute.xlu1 %v3533_v6  ;;  %v1995_v25 = vld [vmem:[%s4374_s2 + $0x50] sm:$0xff]  ;;  %v1996_v26 = vld [vmem:[%s4374_s2 + $0x58] sm:$0xff]  ;;  %v1997_v28 = vld [vmem:[%s4374_s2 + $0x60] sm:$0xff] }
  0x14   : > { %v3442_v10 = vld [vmem:[%s3609_s10 + $0x10] sm:$0xff]   ;;  %2061 = vperm.xlu1 %3439, %v1987_v7   ;;  %v3443_v11 = vld [vmem:[%s3609_s10] sm:$0xff]   ;;  %v3445_v12 = vld [vmem:[%s3609_s10 + $0x18] sm:$0xff]  }
  0x15   : > { %3082 = vmatprep.mubr.msk.bf16.mxu1 %vm534_vm1, %v3442_v10  ;;  %3148 = vmatprep.mubr.msk.bf16.mxu0 %vm534_vm1, %v3443_v11  ;;  %v3446_v14 = vld [vmem:[%s3609_s10 + $0x8] sm:$0xff]   ;;  %v3447_v16 = vld [vmem:[%s3609_s10 + $0x20] sm:$0xff]   ;;  %v3449_v21 = vld [vmem:[%s3609_s10 + $0x30] sm:$0xff]  }
  0x16   : > { %2056 = vperm.xlu0 %3438, %v1986_v8   ;;  %3083 = vmatmul.mubr.msk.bf16.vlgmr.msra.gmra.mrb[0].mxu1 %vm534_vm1, %v3445_v12  ;;  %v3448_v20 = vld [vmem:[%s3609_s10 + $0x28] sm:$0xff]   ;;  %v3450_v24 = vld [vmem:[%s3609_s10 + $0x38] sm:$0xff]   ;;  %v3451_v27 = vld [vmem:[%s3609_s10 + $0x40] sm:$0xff]  }
  0x17   : > { %3279 = vmatpush3.bf16.msra.mxu1 %v946_v4  ;;  %3149 = vmatmul.mubr.msk.bf16.vlgmr.msra.gmra.mrb[0].mxu0 %vm534_vm1, %v3446_v14  ;;  %v1998_v29 = vld [vmem:[%s4374_s2 + $0x68] sm:$0xff]  ;;  %v1999_v31 = vld [vmem:[%s4374_s2 + $0x70] sm:$0xff]  ;;  %v2000_v33 = vld [vmem:[%s4374_s2 + $0x78] sm:$0xff] }
  0x18   : > { %2066 = vperm.xlu1 %3439, %v1988_v9   ;;  %3213 = vmatpush3.bf16.msra.mxu0 %v1566_v15  ;;  %v3452_v30 = vld [vmem:[%s3609_s10 + $0x48] sm:$0xff]   ;;  %v3453_v32 = vld [vmem:[%s3609_s10 + $0x50] sm:$0xff]   ;;  %v2001_v34 = vld [vmem:[%s4374_s2 + $0x80] sm:$0xff] }
  0x19   : > { %3086 = vmatprep.mubr.msk.bf16.mxu1 %vm534_vm1, %v3447_v16  ;;  %3152 = vmatprep.mubr.msk.bf16.mxu0 %vm534_vm1, %v3442_v10  ;;  %v2002_v35 = vld [vmem:[%s4374_s2 + $0x88] sm:$0xff]  ;;  %v3454_v36 = vld [vmem:[%s3609_s10 + $0x58] sm:$0xff]   ;;  %v3455_v37 = vld [vmem:[%s3609_s10 + $0x60] sm:$0xff]  }
  0x1a   : > { %2071 = vperm.xlu0 %3438, %v1989_v13   ;;  %v2003_v38 = vld [vmem:[%s4374_s2 + $0x90] sm:$0xff]  ;;  %v2004_v39 = vld [vmem:[%s4374_s2 + $0x98] sm:$0xff]  ;;  %v2005_v40 = vld [vmem:[%s4374_s2 + $0xa0] sm:$0xff] }
  0x1b   : > { %v2006_v41 = vld [vmem:[%s4374_s2 + $0xa8] sm:$0xff]  ;;  %v2007_v43 = vld [vmem:[%s4374_s2 + $0xb0] sm:$0xff]  ;;  %v2008_v45 = vld [vmem:[%s4374_s2 + $0xb8] sm:$0xff] }
  0x1c   : > { %2076 = vperm.xlu1 %3439, %v1990_v17   ;;  %v3456_v42 = vld [vmem:[%s3609_s10 + $0x68] sm:$0xff]   ;;  %v3457_v44 = vld [vmem:[%s3609_s10 + $0x70] sm:$0xff]   ;;  %v2009_v46 = vld [vmem:[%s4374_s2 + $0xc0] sm:$0xff] }
  0x1d   : > { %v2010_v47 = vld [vmem:[%s4374_s2 + $0xc8] sm:$0xff]  ;;  %v3458_v48 = vld [vmem:[%s3609_s10 + $0x78] sm:$0xff]   ;;  %v3727_v49 = vld [vmem:[%s3609_s10 + $0x80] sm:$0xff]  }
  0x1e   : > { %2081 = vperm.xlu0 %3438, %v1991_v18   ;;  %3087 = vmatmul.mubr.msk.bf16.gmra.mrb[4].mxu1 %vm534_vm1, %v3448_v20  ;;  %v2011_v50 = vld [vmem:[%s4374_s2 + $0xd0] sm:$0xff]  ;;  %v2012_v51 = vld [vmem:[%s4374_s2 + $0xd8] sm:$0xff]  ;;  %v2013_v52 = vld [vmem:[%s4374_s2 + $0xe0] sm:$0xff] }
  0x1f   : > { %3153 = vmatmul.mubr.msk.bf16.gmra.mrb[4].mxu0 %vm534_vm1, %v3445_v12  ;;  %3090 = vmatprep.mubr.msk.bf16.mxu1 %vm534_vm1, %v3449_v21  ;;  %v2014_v53 = vld [vmem:[%s4374_s2 + $0xe8] sm:$0xff]  ;;  %v2015_v55 = vld [vmem:[%s4374_s2 + $0xf0] sm:$0xff]  ;;  %v2016_v57 = vld [vmem:[%s4374_s2 + $0xf8] sm:$0xff] }
  0x20   : > { %2086 = vperm.xlu1 %3439, %v1992_v19   ;;  %3156 = vmatprep.mubr.msk.bf16.mxu0 %vm534_vm1, %v3447_v16  ;;  %v3747_v54 = vld [vmem:[%s3609_s10 + $0x88] sm:$0xff]   ;;  %v3753_v56 = vld [vmem:[%s3609_s10 + $0x90] sm:$0xff]   ;;  %v3462_v58 = vld [vmem:[%s3609_s10 + $0x20] sm:$0xff]  }
  0x21   : > { %v2017_v59 = vld [vmem:[%s4374_s2 + $0x100] sm:$0xff]  ;;  %v2018_v60 = vld [vmem:[%s4374_s2 + $0x108] sm:$0xff]  ;;  %v3772_v61 = vld [vmem:[%s3609_s10 + $0x98] sm:$0xff]  }
  0x22   : > { %2091 = vperm.xlu0 %3438, %v1993_v22   ;;  %v2019_v62 = vld [vmem:[%s4374_s2 + $0x110] sm:$0xff]  ;;  %v3464_v63 = vld [vmem:[%s3609_s10 + $0x28] sm:$0xff]   ;;  %v3779_v0 = vld [vmem:[%s3609_s10 + $0xa0] sm:$0xff]  }
  0x23   : > { %v2020_v1 = vld [vmem:[%s4374_s2 + $0x118] sm:$0xff]  ;;  %v3466_v2 = vld [vmem:[%s3609_s10 + $0x30] sm:$0xff]   ;;  %v2021_v3 = vld [vmem:[%s4374_s2 + $0x120] sm:$0xff] }
  0x24   : > { %2096 = vperm.xlu1 %3439, %v1994_v23   ;;  %v2022_v4 = vld [vmem:[%s4374_s2 + $0x128] sm:$0xff]  ;;  %v3468_v6 = vld [vmem:[%s3609_s10 + $0x38] sm:$0xff]   ;;  %v3802_v7 = vld [vmem:[%s3609_s10 + $0xb0] sm:$0xff]  }
  0x25   : > { %v3798_v5 = vld [vmem:[%s3609_s10 + $0xa8] sm:$0xff]   ;;  %v2023_v8 = vld [vmem:[%s4374_s2 + $0x130] sm:$0xff]  ;;  %v2024_v9 = vld [vmem:[%s4374_s2 + $0x138] sm:$0xff] }
  0x26   : > { %2101 = vperm.xlu0 %3438, %v1995_v25   ;;  %3091 = vmatmul.mubr.msk.bf16.gmra.mrb[8].mxu1 %vm534_vm1, %v3450_v24  ;;  %v3470_v10 = vld [vmem:[%s3609_s10 + $0x40] sm:$0xff]   ;;  %v2026_v12 = vld [vmem:[%s4374_s2 + $0x148] sm:$0xff]  ;;  %v3824_v13 = vld [vmem:[%s3609_s10 + $0xb8] sm:$0xff]  }
  0x27   : > { %3157 = vmatmul.mubr.msk.bf16.gmra.mrb[8].mxu0 %vm534_vm1, %v3448_v20  ;;  %3094 = vmatprep.mubr.msk.bf16.mxu1 %vm534_vm1, %v3451_v27  ;;  %v2025_v11 = vld [vmem:[%s4374_s2 + $0x140] sm:$0xff]  ;;  %v3472_v14 = vld [vmem:[%s3609_s10 + $0x48] sm:$0xff]   ;;  %v2027_v16 = vld [vmem:[%s4374_s2 + $0x150] sm:$0xff] }
  0x28   : > { %2106 = vperm.xlu1 %3439, %v1996_v26   ;;  %3160 = vmatprep.mubr.msk.bf16.mxu0 %vm534_vm1, %v3449_v21  ;;  %v3828_v15 = vld [vmem:[%s3609_s10 + $0xc0] sm:$0xff]   ;;  %v2028_v17 = vld [vmem:[%s4374_s2 + $0x158] sm:$0xff]  ;;  %v3474_v18 = vld [vmem:[%s3609_s10 + $0x50] sm:$0xff]  }
  0x29   : > { %v2029_v19 = vld [vmem:[%s4374_s2 + $0x160] sm:$0xff]  ;;  %v2030_v20 = vld [vmem:[%s4374_s2 + $0x168] sm:$0xff]  ;;  %v2031_v22 = vld [vmem:[%s4374_s2 + $0x170] sm:$0xff] }
  0x2a   : > { %2111 = vperm.xlu0 %3438, %v1997_v28   ;;  %v3850_v21 = vld [vmem:[%s3609_s10 + $0xc8] sm:$0xff]   ;;  %v3476_v23 = vld [vmem:[%s3609_s10 + $0x58] sm:$0xff]   ;;  %v3478_v26 = vld [vmem:[%s3609_s10 + $0x60] sm:$0xff]  }
  0x2b   : > { %v2032_v25 = vld [vmem:[%s4374_s2 + $0x178] sm:$0xff]  ;;  %v2034_v28 = vld [vmem:[%s4374_s2 + $0x188] sm:$0xff] }
  0x2c   : > { %2116 = vperm.xlu1 %3439, %v1998_v29   ;;  %v3876_v29 = vld [vmem:[%s3609_s10 + $0xd8] sm:$0xff]  }
  0x2e   : > { %2121 = vperm.xlu0 %3438, %v1999_v31   ;;  %3095 = vmatmul.mubr.msk.bf16.gmra.mrb[12].mxu1 %vm534_vm1, %v3452_v30  ;;  %v3480_v31 = vld [vmem:[%s3609_s10 + $0x68] sm:$0xff]  }
  0x2f   : > { %3161 = vmatmul.mubr.msk.bf16.gmra.mrb[12].mxu0 %vm534_vm1, %v3450_v24  ;;  %3098 = vmatprep.mubr.msk.bf16.mxu1 %vm534_vm1, %v3453_v32  ;;  %v3857_v24 = vld [vmem:[%s3609_s10 + $0xd0] sm:$0xff]  }
  0x30   : > { %2126 = vperm.xlu1 %3439, %v2000_v33   ;;  %3164 = vmatprep.mubr.msk.bf16.mxu0 %vm534_vm1, %v3451_v27  ;;  %v2033_v27 = vld [vmem:[%s4374_s2 + $0x180] sm:$0xff]  ;;  %v2036_v33 = vld [vmem:[%s4374_s2 + $0x198] sm:$0xff] }
  0x32   : > { %2131 = vperm.xlu0 %3438, %v2001_v34   ;;  %v3482_v34 = vld [vmem:[%s3609_s10 + $0x70] sm:$0xff]  }
  0x34   : > { %2136 = vperm.xlu1 %3439, %v2002_v35   ;;  %v2037_v35 = vld [vmem:[%s4374_s2 + $0x1a0] sm:$0xff] }
  0x36   : > { %2141 = vperm.xlu0 %3438, %v2003_v38   ;;  %3099 = vmatmul.mubr.msk.bf16.gmra.mrb[16].mxu1 %vm534_vm1, %v3454_v36  ;;  %v2039_v38 = vld [vmem:[%s4374_s2 + $0x1b0] sm:$0xff] }
  0x37   : > { %3165 = vmatmul.mubr.msk.bf16.gmra.mrb[16].mxu0 %vm534_vm1, %v3452_v30  ;;  %3102 = vmatprep.mubr.msk.bf16.mxu1 %vm534_vm1, %v3455_v37  ;;  %v2035_v30 = vld [vmem:[%s4374_s2 + $0x190] sm:$0xff] }
  0x38   : > { %2146 = vperm.xlu1 %3439, %v2004_v39   ;;  %3168 = vmatprep.mubr.msk.bf16.mxu0 %vm534_vm1, %v3453_v32  ;;  %v3883_v32 = vld [vmem:[%s3609_s10 + $0xe0] sm:$0xff]   ;;  %v3484_v39 = vld [vmem:[%s3609_s10 + $0x78] sm:$0xff]  }
  0x3a   : > { %2151 = vperm.xlu0 %3438, %v2005_v40   ;;  %v3909_v40 = vld [vmem:[%s3609_s10 + $0xf0] sm:$0xff]  }
  0x3c   : > { %2156 = vperm.xlu1 %3439, %v2006_v41   ;;  %v2040_v41 = vld [vmem:[%s4374_s2 + $0x1b8] sm:$0xff] }
  0x3e   : > { %2161 = vperm.xlu0 %3438, %v2007_v43   ;;  %3103 = vmatmul.mubr.msk.bf16.gmra.mrb[20].mxu1 %vm534_vm1, %v3456_v42  ;;  %v2041_v43 = vld [vmem:[%s4374_s2 + $0x1c0] sm:$0xff] }
  0x3f   : > { %3169 = vmatmul.mubr.msk.bf16.gmra.mrb[20].mxu0 %vm534_vm1, %v3454_v36  ;;  %3106 = vmatprep.mubr.msk.bf16.mxu1 %vm534_vm1, %v3457_v44  ;;  %v2038_v36 = vld [vmem:[%s4374_s2 + $0x1a8] sm:$0xff] }
  0x40   : > { %2166 = vperm.xlu1 %3439, %v2008_v45   ;;  %3172 = vmatprep.mubr.msk.bf16.mxu0 %vm534_vm1, %v3455_v37  ;;  %v3902_v37 = vld [vmem:[%s3609_s10 + $0xe8] sm:$0xff]   ;;  %v3928_v45 = vld [vmem:[%s3609_s10 + $0xf8] sm:$0xff]  }
  0x42   : > { %2171 = vperm.xlu0 %3438, %v2009_v46   ;;  %v2043_v46 = vld [vmem:[%s4374_s2 + $0x1d0] sm:$0xff] }
  0x44   : > { %2176 = vperm.xlu1 %3439, %v2010_v47   ;;  %v3488_v47 = vld [vmem:[%s3609_s10 + $0x88] sm:$0xff]  }
  0x46   : > { %2181 = vperm.xlu0 %3438, %v2011_v50   ;;  %3107 = vmatmul.mubr.msk.bf16.gmra.mrb[24].mxu1 %vm534_vm1, %v3458_v48  ;;  %v2044_v50 = vld [vmem:[%s4374_s2 + $0x1d8] sm:$0xff] }
  0x47   : > { %3173 = vmatmul.mubr.msk.bf16.gmra.mrb[24].mxu0 %vm534_vm1, %v3456_v42  ;;  %3110 = vmatprep.mubr.msk.bf16.mxu1 %vm534_vm1, %v3727_v49  ;;  %v3486_v42 = vld [vmem:[%s3609_s10 + $0x80] sm:$0xff]  }
  0x48   : > { %2186 = vperm.xlu1 %3439, %v2012_v51   ;;  %3176 = vmatprep.mubr.msk.bf16.mxu0 %vm534_vm1, %v3457_v44  ;;  %v2042_v44 = vld [vmem:[%s4374_s2 + $0x1c8] sm:$0xff]  ;;  %v3490_v51 = vld [vmem:[%s3609_s10 + $0x90] sm:$0xff]  }
  0x4a   : > { %2191 = vperm.xlu0 %3438, %v2013_v52   ;;  %v2045_v52 = vld [vmem:[%s4374_s2 + $0x1e0] sm:$0xff] }
  0x4c   : > { %2196 = vperm.xlu1 %3439, %v2014_v53   ;;  %v2046_v53 = vld [vmem:[%s4374_s2 + $0x1e8] sm:$0xff] }
  0x4e   : > { %2201 = vperm.xlu0 %3438, %v2015_v55   ;;  %3111 = vmatmul.mubr.msk.bf16.gmra.mrb[28].mxu1 %vm534_vm1, %v3747_v54  ;;  %v3491_v55 = vld [vmem:[%s3609_s10 + $0x108] sm:$0xff]  }
  0x4f   : > { %3177 = vmatmul.mubr.msk.bf16.gmra.mrb[28].mxu0 %vm534_vm1, %v3458_v48  ;;  %3114 = vmatprep.mubr.msk.bf16.mxu1 %vm534_vm1, %v3753_v56  ;;  %v3489_v48 = vld [vmem:[%s3609_s10 + $0x100] sm:$0xff]  }
  0x50   : > { %2206 = vperm.xlu1 %3439, %v2016_v57   ;;  %3214 = vmatprep.mubr.msk.bf16.mxu0 %vm534_vm1, %v3462_v58  ;;  %v2047_v57 = vld [vmem:[%s4374_s2 + $0x1f0] sm:$0xff]  ;;  %v3492_v58 = vld [vmem:[%s3609_s10 + $0x98] sm:$0xff]  }
  0x52   : > { %2211 = vperm.xlu0 %3438, %v2017_v59   ;;  %v2048_v59 = vld [vmem:[%s4374_s2 + $0x1f8] sm:$0xff] }
  0x54   : > { %2216 = vperm.xlu1 %3439, %v2018_v60   ;;  %v3493_v60 = vld [vmem:[%s3609_s10 + $0xa0] sm:$0xff]  }
  0x56   : > { %2221 = vperm.xlu0 %3438, %v2019_v62   ;;  %3115 = vmatmul.mubr.msk.bf16.gmra.mrb[32].mxu1 %vm534_vm1, %v3772_v61  ;;  %v3494_v62 = vld [vmem:[%s3609_s10 + $0xa8] sm:$0xff]  }
  0x57   : > { %3215 = vmatmul.mubr.msk.bf16.vlgmr.msra.gmra.mrb[0].mxu0 %vm534_vm1, %v3464_v63  ;;  %3118 = vmatprep.mubr.msk.bf16.mxu1 %vm534_vm1, %v3779_v0  ;;  %v3495_v63 = vld [vmem:[%s3609_s10 + $0xb0] sm:$0xff]  }
  0x58   : > { %2226 = vperm.xlu1 %3439, %v2020_v1   ;;  %3218 = vmatprep.mubr.msk.bf16.mxu0 %vm534_vm1, %v3466_v2  ;;  %v3496_v1 = vld [vmem:[%s3609_s10 + $0xb8] sm:$0xff]   ;;  %v3497_v2 = vld [vmem:[%s3609_s10 + $0xc0] sm:$0xff]  }
  0x5a   : > { %2231 = vperm.xlu0 %3438, %v2021_v3   ;;  %v3503_v3 = vld [vmem:[%s3609_s10 + $0xf0] sm:$0xff]  }
  0x5c   : > { %2236 = vperm.xlu1 %3439, %v2022_v4   ;;  %v3504_v4 = vld [vmem:[%s3609_s10 + $0xf8] sm:$0xff]  }
  0x5e   : > { %2241 = vperm.xlu0 %3438, %v2023_v8   ;;  %3119 = vmatmul.mubr.msk.bf16.gmra.mrb[36].mxu1 %vm534_vm1, %v3798_v5  ;;  %v3508_v8 = vld [vmem:[%s3609_s10 + $0x118] sm:$0xff]  }
  0x5f   : > { %3219 = vmatmul.mubr.msk.bf16.gmra.mrb[4].mxu0 %vm534_vm1, %v3468_v6  ;;  %3122 = vmatprep.mubr.msk.bf16.mxu1 %vm534_vm1, %v3802_v7  ;;  %v3506_v6 = vld [vmem:[%s3609_s10 + $0x108] sm:$0xff]  }
  0x60   : > { %2246 = vperm.xlu1 %3439, %v2024_v9   ;;  %3222 = vmatprep.mubr.msk.bf16.mxu0 %vm534_vm1, %v3470_v10 }
  0x62   : > { %2251 = vperm.xlu0 %3438, %v2025_v11  }
  0x64   : > { %2256 = vperm.xlu1 %3439, %v2026_v12  }
  0x66   : > { %2261 = vperm.xlu0 %3438, %v2027_v16   ;;  %3123 = vmatmul.mubr.msk.bf16.gmra.mrb[40].mxu1 %vm534_vm1, %v3824_v13 }
  0x67   : > { %3223 = vmatmul.mubr.msk.bf16.gmra.mrb[8].mxu0 %vm534_vm1, %v3472_v14  ;;  %3126 = vmatprep.mubr.msk.bf16.mxu1 %vm534_vm1, %v3828_v15 }
  0x68   : > { %2266 = vperm.xlu1 %3439, %v2028_v17   ;;  %3226 = vmatprep.mubr.msk.bf16.mxu0 %vm534_vm1, %v3474_v18 }
  0x6a   : > { %2271 = vperm.xlu0 %3438, %v2029_v19  }
  0x6c   : > { %2276 = vperm.xlu1 %3439, %v2030_v20  }
  0x6e   : > { %2281 = vperm.xlu0 %3438, %v2031_v22   ;;  %3127 = vmatmul.mubr.msk.bf16.gmra.mrb[44].mxu1 %vm534_vm1, %v3850_v21 }
  0x6f   : > { %3227 = vmatmul.mubr.msk.bf16.gmra.mrb[12].mxu0 %vm534_vm1, %v3476_v23  ;;  %3130 = vmatprep.mubr.msk.bf16.mxu1 %vm534_vm1, %v3857_v24 }
  0x70   : > { %2286 = vperm.xlu1 %3439, %v2032_v25   ;;  %3230 = vmatprep.mubr.msk.bf16.mxu0 %vm534_vm1, %v3478_v26 }
  0x72   : > { %2291 = vperm.xlu0 %3438, %v2033_v27  }
  0x74   : > { %2296 = vperm.xlu1 %3439, %v2034_v28  }
  0x76   : > { %2301 = vperm.xlu0 %3438, %v2035_v30   ;;  %3131 = vmatmul.mubr.msk.bf16.gmra.mrb[48].mxu1 %vm534_vm1, %v3876_v29 }
  0x77   : > { %3231 = vmatmul.mubr.msk.bf16.gmra.mrb[16].mxu0 %vm534_vm1, %v3480_v31  ;;  %3134 = vmatprep.mubr.msk.bf16.mxu1 %vm534_vm1, %v3883_v32 }
  0x78   : > { %2306 = vperm.xlu1 %3439, %v2036_v33   ;;  %3234 = vmatprep.mubr.msk.bf16.mxu0 %vm534_vm1, %v3482_v34 }
  0x7a   : > { %2311 = vperm.xlu0 %3438, %v2037_v35  }
  0x7c   : > { %2316 = vperm.xlu1 %3439, %v2038_v36  }
  0x7e   : > { %2321 = vperm.xlu0 %3438, %v2039_v38   ;;  %3135 = vmatmul.mubr.msk.bf16.gmra.mrb[52].mxu1 %vm534_vm1, %v3902_v37 }
  0x7f   : > { %3235 = vmatmul.mubr.msk.bf16.gmra.mrb[20].mxu0 %vm534_vm1, %v3484_v39  ;;  %3138 = vmatprep.mubr.msk.bf16.mxu1 %vm534_vm1, %v3909_v40 }
  0x80   : > { %2326 = vperm.xlu1 %3439, %v2040_v41   ;;  %3238 = vmatprep.mubr.msk.bf16.mxu0 %vm534_vm1, %v3486_v42 }
  0x82   : > { %2331 = vperm.xlu0 %3438, %v2041_v43  }
  0x84   : > { %2336 = vperm.xlu1 %3439, %v2042_v44  }
  0x86   : > { %2341 = vperm.xlu0 %3438, %v2043_v46   ;;  %3139 = vmatmul.mubr.msk.bf16.gmra.mrb[56].mxu1 %vm534_vm1, %v3928_v45 }
  0x87   : > { %3239 = vmatmul.mubr.msk.bf16.gmra.mrb[24].mxu0 %vm534_vm1, %v3488_v47  ;;  %3142 = vmatprep.mubr.msk.bf16.mxu1 %vm534_vm1, %v3489_v48 }
  0x88   : > { %2346 = vperm.xlu1 %3439, %v2044_v50   ;;  %3242 = vmatprep.mubr.msk.bf16.mxu0 %vm534_vm1, %v3490_v51 }
  0x8a   : > { %2351 = vperm.xlu0 %3438, %v2045_v52  }
  0x8c   : > { %2356 = vperm.xlu1 %3439, %v2046_v53  }
  0x8e   : > { %2361 = vperm.xlu0 %3438, %v2047_v57   ;;  %3143 = vmatmul.mubr.msk.bf16.gmra.mrb[60].mxu1 %vm534_vm1, %v3491_v55 }
  0x8f   : > { %3243 = vmatmul.mubr.msk.bf16.gmra.mrb[28].mxu0 %vm534_vm1, %v3492_v58  ;;  %3180 = vmatprep.mubr.msk.bf16.mxu1 %vm534_vm1, %v3727_v49  ;;  %v3498_v49 = vld [vmem:[%s3609_s10 + $0xc8] sm:$0xff]  }
  0x90   : > { %2366 = vperm.xlu1 %3439, %v2048_v59   ;;  %3246 = vmatprep.mubr.msk.bf16.mxu0 %vm534_vm1, %v3493_v60 }
  0x91   : > { %v4024_v9 = vpop.permute.xlu0 %2051 }
  0x93   : > { %v4026_v10 = vpop.permute.xlu1 %2061 }
  0x95   : > { %v4028_v11 = vpop.permute.xlu0 %2056 }
  0x96   : > { %3181 = vmatmul.mubr.msk.bf16.vlgmr.msra.gmra.mrb[32].mxu1 %vm534_vm1, %v3747_v54  ;;  %v3499_v54 = vld [vmem:[%s3609_s10 + $0xd0] sm:$0xff]  }
  0x97   : > { %3247 = vmatmul.mubr.msk.bf16.gmra.mrb[32].mxu0 %vm534_vm1, %v3494_v62  ;;  %3184 = vmatprep.mubr.msk.bf16.mxu1 %vm534_vm1, %v3753_v56  ;;  %v3500_v56 = vld [vmem:[%s3609_s10 + $0xd8] sm:$0xff]   ;;  %v4030_v12 = vpop.permute.xlu1 %2066 }
  0x98   : > { %3250 = vmatprep.mubr.msk.bf16.mxu0 %vm534_vm1, %v3495_v63 }
  0x99   : > { %v4032_v14 = vpop.permute.xlu0 %2071 }
  0x9b   : > { %v4034_v16 = vpop.permute.xlu1 %2076 }
  0x9d   : > { %v4038_v19 = vpop.permute.xlu0 %2081 }
  0x9e   : > { %3185 = vmatmul.mubr.msk.bf16.gmra.mrb[36].mxu1 %vm534_vm1, %v3772_v61  ;;  %v3501_v61 = vld [vmem:[%s3609_s10 + $0xe0] sm:$0xff]  }
  0x9f   : > { %3251 = vmatmul.mubr.msk.bf16.gmra.mrb[36].mxu0 %vm534_vm1, %v3496_v1  ;;  %3188 = vmatprep.mubr.msk.bf16.mxu1 %vm534_vm1, %v3779_v0  ;;  %v3502_v0 = vld [vmem:[%s3609_s10 + $0xe8] sm:$0xff]   ;;  %v4040_v20 = vpop.permute.xlu1 %2086 }
  0xa0   : > { %3254 = vmatprep.mubr.msk.bf16.mxu0 %vm534_vm1, %v3497_v2 }
  0xa1   : > { %v4050_v25 = vpop.permute.xlu0 %2091 }
  0xa3   : > { %v4052_v26 = vpop.permute.xlu1 %2096 }
  0xa5   : > { %v4060_v30 = vpop.permute.xlu0 %2101 }
  0xa6   : > { %3189 = vmatmul.mubr.msk.bf16.gmra.mrb[40].mxu1 %vm534_vm1, %v3798_v5  ;;  %v3505_v5 = vld [vmem:[%s3609_s10 + $0x100] sm:$0xff]  }
  0xa7   : > { %3255 = vmatmul.mubr.msk.bf16.gmra.mrb[40].mxu0 %vm534_vm1, %v3498_v49  ;;  %3192 = vmatprep.mubr.msk.bf16.mxu1 %vm534_vm1, %v3802_v7  ;;  %v3507_v7 = vld [vmem:[%s3609_s10 + $0x110] sm:$0xff]   ;;  %s2980_s10 = sshll.u32 %s4405_s18, 9 }
  0xa8   : > { %3258 = vmatprep.mubr.msk.bf16.mxu0 %vm534_vm1, %v3499_v54  ;;  %s4138_s17 = scalar_lea.vmem %s4375_s3, %s2980_s10 }
  0xa9   : > { %v4068_v34 = vpop.permute.xlu0 %2111 }
  0xad   : > { %v4078_v39 = vpop.permute.xlu0 %2121 }
  0xae   : > { %3193 = vmatmul.mubr.msk.bf16.gmra.mrb[44].mxu1 %vm534_vm1, %v3824_v13 }
  0xaf   : > { %3259 = vmatmul.mubr.msk.bf16.gmra.mrb[44].mxu0 %vm534_vm1, %v3500_v56  ;;  %3196 = vmatprep.mubr.msk.bf16.mxu1 %vm534_vm1, %v3828_v15 }
  0xb0   : > { %3262 = vmatprep.mubr.msk.bf16.mxu0 %vm534_vm1, %v3501_v61 }
  0xb6   : > { %3197 = vmatmul.mubr.msk.bf16.gmra.mrb[48].mxu1 %vm534_vm1, %v3850_v21 }
  0xb7   : > { %3263 = vmatmul.mubr.msk.bf16.gmra.mrb[48].mxu0 %vm534_vm1, %v3502_v0  ;;  %3200 = vmatprep.mubr.msk.bf16.mxu1 %vm534_vm1, %v3857_v24 }
  0xb8   : > { %3266 = vmatprep.mubr.msk.bf16.mxu0 %vm534_vm1, %v3503_v3 }
  0xbe   : > { %3201 = vmatmul.mubr.msk.bf16.gmra.mrb[52].mxu1 %vm534_vm1, %v3876_v29 }
  0xbf   : > { %3267 = vmatmul.mubr.msk.bf16.gmra.mrb[52].mxu0 %vm534_vm1, %v3504_v4  ;;  %3204 = vmatprep.mubr.msk.bf16.mxu1 %vm534_vm1, %v3883_v32  ;;  %v4064_v32 = vpop.permute.xlu1 %2106 }
  0xc0   : > { %3270 = vmatprep.mubr.msk.bf16.mxu0 %vm534_vm1, %v3505_v5 }
  0xc3   : > { %v4072_v36 = vpop.permute.xlu1 %2116 }
  0xc6   : > { %3205 = vmatmul.mubr.msk.bf16.gmra.mrb[56].mxu1 %vm534_vm1, %v3902_v37 }
  0xc7   : > { %3271 = vmatmul.mubr.msk.bf16.gmra.mrb[56].mxu0 %vm534_vm1, %v3506_v6  ;;  %3208 = vmatprep.mubr.msk.bf16.mxu1 %vm534_vm1, %v3909_v40  ;;  %v4080_v40 = vpop.permute.xlu1 %2126 }
  0xc8   : > { %3274 = vmatprep.mubr.msk.bf16.mxu0 %vm534_vm1, %v3507_v7 }
  0xcb   : > { %v4092_v46 = vpop.permute.xlu1 %2136 }
  0xce   : > { %3209 = vmatmul.mubr.msk.bf16.gmra.mrb[60].mxu1 %vm534_vm1, %v3928_v45  ;;  %v4090_v45 = vpop.permute.xlu0 %2131 }
  0xcf   : > { %3275 = vmatmul.mubr.msk.bf16.gmra.mrb[60].mxu0 %vm534_vm1, %v3508_v8  ;;  %v4104_v53 = vpop.permute.xlu1 %2146 }
  0xd2   : > { %v4100_v51 = vpop.permute.xlu0 %2141 }
  0xd3   : > { %v4112_v59 = vpop.permute.xlu1 %2156 }
  0xd6   : > { %v4108_v57 = vpop.permute.xlu0 %2151 }
  0xd7   : > { %v4120_v1 = vpop.permute.xlu1 %2166 }
  0xda   : > { %v4118_v63 = vpop.permute.xlu0 %2161 }
  0xdb   : > { %v4132_v0 = vpop.permute.xlu1 %2176 }
  0xdc   : > { %4385 = vst [vmem:[#allocation9_spill] sm:$0xff] %v4132_v0 }
  0xde   : > { %v4130_v61 = vpop.permute.xlu0 %2171 }
  0xdf   : > { %4384 = vst [vmem:[#allocation8_spill] sm:$0xff] %v4130_v61 }
  0xe2   : > { %v4140_v6 = vpop.permute.xlu0 %2181 }
  0xe3   : > { %4386 = vst [vmem:[#allocation10_spill] sm:$0xff] %v4140_v6 }
  0xe9   : > { %v3084_v13 = vpop.f32.mrb[0].mxu1 }
  0xea   : > { %v669_v15 = vpop.f32.mrb[1].mxu1 }
  0xeb   : > { %v3085_v17 = vpop.f32.mrb[2].mxu1 }
  0xec   : > { %v4036_v18 = vpop.f32.mrb[3].mxu1 }
  0xf1   : > { %v4042_v21 = vpop.f32.mrb[4].mxu1 }
  0xf2   : > { %v4044_v22 = vpop.f32.mrb[5].mxu1 }
  0xf3   : > { %v4046_v23 = vpop.f32.mrb[6].mxu1 }
  0xf4   : > { %v4048_v24 = vpop.f32.mrb[7].mxu1 }
  0xf9   : > { %v4054_v27 = vpop.f32.mrb[8].mxu1 }
  0xfa   : > { %v4056_v28 = vpop.f32.mrb[9].mxu1 }
  0xfb   : > { %v4058_v29 = vpop.f32.mrb[10].mxu1 }
  0xfc   : > { %v4062_v31 = vpop.f32.mrb[11].mxu1 }
 0x101   : > { %v4066_v33 = vpop.f32.mrb[12].mxu1 }
 0x102   : > { %v4070_v35 = vpop.f32.mrb[13].mxu1 }
 0x103   : > { %v4074_v37 = vpop.f32.mrb[14].mxu1 }
 0x104   : > { %v4076_v38 = vpop.f32.mrb[15].mxu1 }
 0x109   : > { %v4082_v41 = vpop.f32.mrb[16].mxu1 }
 0x10a   : > { %v4084_v42 = vpop.f32.mrb[17].mxu1 }
 0x10b   : > { %v4086_v43 = vpop.f32.mrb[18].mxu1 }
 0x10c   : > { %v4088_v44 = vpop.f32.mrb[19].mxu1 }
 0x111   : > { %v4094_v47 = vpop.f32.mrb[20].mxu1 }
 0x112   : > { %v4096_v48 = vpop.f32.mrb[21].mxu1 }
 0x113   : > { %v4098_v50 = vpop.f32.mrb[22].mxu1 }
 0x114   : > { %v4102_v52 = vpop.f32.mrb[23].mxu1 }
 0x119   : > { %v4106_v55 = vpop.f32.mrb[24].mxu1 }
 0x11a   : > { %v4110_v58 = vpop.f32.mrb[25].mxu1 }
 0x11b   : > { %v4114_v60 = vpop.f32.mrb[26].mxu1 }
 0x11c   : > { %4378 = vst [vmem:[#allocation2_spill] sm:$0xff] %v4114_v60  ;;  %v4116_v62 = vpop.f32.mrb[27].mxu1 }
 0x11d   : > { %4379 = vst [vmem:[#allocation3_spill] sm:$0xff] %v4116_v62 }
 0x121   : > { %v4122_v2 = vpop.f32.mrb[28].mxu1 }
 0x122   : > { %4380 = vst [vmem:[#allocation4_spill] sm:$0xff] %v4122_v2  ;;  %v4124_v49 = vpop.f32.mrb[29].mxu1 }
 0x123   : > { %4381 = vst [vmem:[#allocation5_spill] sm:$0xff] %v4124_v49  ;;  %v4126_v54 = vpop.f32.mrb[30].mxu1 }
 0x124   : > { %4382 = vst [vmem:[#allocation6_spill] sm:$0xff] %v4126_v54  ;;  %v4128_v56 = vpop.f32.mrb[31].mxu1 }
 0x125   : > { %4383 = vst [vmem:[#allocation7_spill] sm:$0xff] %v4128_v56  ;;  %v4142_v56 = vpop.permute.xlu1 %2186 }
 0x126   : > { %4387 = vst [vmem:[#allocation11_spill] sm:$0xff] %v4142_v56 }
 0x129   : > { %v4155_v6 = vpop.permute.xlu1 %2196 }
 0x12a   : > { %v3216_v3 = vpop.f32.mrb[0].mxu0  ;;  %4388 = vst [vmem:[#allocation12_spill] sm:$0xff] %v4155_v6 }
 0x12b   : > { %v3280_v4 = vadd.f32 %v3216_v3, %v3084_v13  ;;  %v1602_v5 = vpop.f32.mrb[1].mxu0  ;;  %v4153_v3 = vpop.permute.xlu0 %2191 }
 0x12c   : > { %v3281_v7 = vadd.f32 %v1602_v5, %v669_v15  ;;  %v3217_v8 = vpop.f32.mrb[2].mxu0 }
 0x12d   : > { %1923 = vst [vmem:[%s4138_s17 + $0x10] sm:$0xff] %v3280_v4  ;;  %v3282_v54 = vadd.f32 %v3217_v8, %v3085_v17  ;;  %v1605_v49 = vpop.f32.mrb[3].mxu0  ;;  %v2371_v62 = vmul.f32 %v3280_v4, %v4026_v10 }
 0x12e   : > { %1921 = vst [vmem:[%s4138_s17] sm:$0xff] %v3281_v7  ;;  %v2369_v2 = vmul.f32 %v3281_v7, %v4024_v9  ;;  %v3283_v0 = vadd.f32 %v1605_v49, %v4036_v18 }
 0x12f   : > { %1924 = vst [vmem:[%s4138_s17 + $0x18] sm:$0xff] %v3282_v54  ;;  %v2372_v15 = vmul.f32 %v3282_v54, %v4030_v12  ;;  %v2505_v10 = vmul.f32 %v3280_v4, %v2371_v62 }
 0x130   : > { %1922 = vst [vmem:[%s4138_s17 + $0x8] sm:$0xff] %v3283_v0  ;;  %v2370_v13 = vmul.f32 %v3283_v0, %v4028_v11  ;;  %v2503_v5 = vmul.f32 %v3281_v7, %v2369_v2 }
 0x131   : > { %v2506_v12 = vmul.f32 %v3282_v54, %v2372_v15 }
 0x132   : > { %v2433_v56 = vadd.f32 %v2370_v13, %v2369_v2  ;;  %v2504_v17 = vmul.f32 %v3283_v0, %v2370_v13  ;;  %v3220_v8 = vpop.f32.mrb[4].mxu0 }
 0x133   : > { %v3284_v9 = vadd.f32 %v3220_v8, %v4042_v21  ;;  %v1618_v18 = vpop.f32.mrb[5].mxu0 }
 0x134   : > { %v2434_v49 = vadd.f32 %v2433_v56, %v2371_v62  ;;  %v2567_v61 = vadd.f32 %v2504_v17, %v2503_v5  ;;  %v3285_v11 = vadd.f32 %v1618_v18, %v4044_v22  ;;  %v3221_v60 = vpop.f32.mrb[6].mxu0  ;;  %v4166_v62 = vpop.permute.xlu0 %2201 }
 0x135   : > { %1927 = vst [vmem:[%s4138_s17 + $0x30] sm:$0xff] %v3284_v9  ;;  %v3286_v2 = vadd.f32 %v3221_v60, %v4046_v23  ;;  %v1621_v7 = vpop.f32.mrb[7].mxu0  ;;  %v2375_v4 = vmul.f32 %v3284_v9, %v4038_v19  ;;  %v4170_v60 = vpop.permute.xlu1 %2206 }
 0x136   : > { %v2568_v0 = vadd.f32 %v2567_v61, %v2505_v10  ;;  %1925 = vst [vmem:[%s4138_s17 + $0x20] sm:$0xff] %v3285_v11  ;;  %v2373_v13 = vmul.f32 %v3285_v11, %v4032_v14  ;;  %v2435_v6 = vadd.f32 %v2434_v49, %v2372_v15  ;;  %v3287_v21 = vadd.f32 %v1621_v7, %v4048_v24 }
 0x137   : > { %1928 = vst [vmem:[%s4138_s17 + $0x38] sm:$0xff] %v3286_v2  ;;  %v2376_v54 = vmul.f32 %v3286_v2, %v4040_v20  ;;  %v2509_v8 = vmul.f32 %v3284_v9, %v2375_v4 }
 0x138   : > { %v2436_v22 = vadd.f32 %v2435_v6, %v2373_v13  ;;  %v2507_v56 = vmul.f32 %v3285_v11, %v2373_v13  ;;  %v2569_v5 = vadd.f32 %v2568_v0, %v2506_v12  ;;  %1926 = vst [vmem:[%s4138_s17 + $0x28] sm:$0xff] %v3287_v21  ;;  %v2374_v23 = vmul.f32 %v3287_v21, %v4034_v16  ;;  %v4177_v12 = vpop.permute.xlu0 %2211 }
 0x139   : > { %v2510_v16 = vmul.f32 %v3286_v2, %v2376_v54  ;;  %v4182_v13 = vpop.permute.xlu1 %2216 }
 0x13a   : > { %v2570_v14 = vadd.f32 %v2569_v5, %v2507_v56  ;;  %v2437_v61 = vadd.f32 %v2436_v22, %v2374_v23  ;;  %v2508_v24 = vmul.f32 %v3287_v21, %v2374_v23  ;;  %v3224_v15 = vpop.f32.mrb[8].mxu0 }
 0x13b   : > { %v3288_v19 = vadd.f32 %v3224_v15, %v4054_v27  ;;  %v1634_v17 = vpop.f32.mrb[9].mxu0 }
 0x13c   : > { %v2438_v6 = vadd.f32 %v2437_v61, %v2375_v4  ;;  %v2571_v18 = vadd.f32 %v2570_v14, %v2508_v24  ;;  %v3289_v10 = vadd.f32 %v1634_v17, %v4056_v28  ;;  %v3225_v49 = vpop.f32.mrb[10].mxu0  ;;  %v4190_v14 = vpop.permute.xlu0 %2221 }
 0x13d   : > { %1931 = vst [vmem:[%s4138_s17 + $0x50] sm:$0xff] %v3288_v19  ;;  %v3290_v20 = vadd.f32 %v3225_v49, %v4058_v29  ;;  %v1637_v11 = vpop.f32.mrb[11].mxu0  ;;  %v2379_v28 = vmul.f32 %v3288_v19, %v4060_v30  ;;  %v4193_v17 = vpop.permute.xlu1 %2226 }
 0x13e   : > { %v2572_v7 = vadd.f32 %v2571_v18, %v2509_v8  ;;  %1929 = vst [vmem:[%s4138_s17 + $0x40] sm:$0xff] %v3289_v10  ;;  %v2377_v27 = vmul.f32 %v3289_v10, %v4050_v25  ;;  %v2439_v0 = vadd.f32 %v2438_v6, %v2376_v54  ;;  %v3291_v9 = vadd.f32 %v1637_v11, %v4062_v31 }
 0x13f   : > { %1932 = vst [vmem:[%s4138_s17 + $0x58] sm:$0xff] %v3290_v20  ;;  %v2380_v22 = vmul.f32 %v3290_v20, %v4064_v32  ;;  %v2513_v30 = vmul.f32 %v3288_v19, %v2379_v28 }
 0x140   : > { %v2440_v2 = vadd.f32 %v2439_v0, %v2377_v27  ;;  %v2511_v21 = vmul.f32 %v3289_v10, %v2377_v27  ;;  %v2573_v4 = vadd.f32 %v2572_v7, %v2510_v16  ;;  %1930 = vst [vmem:[%s4138_s17 + $0x48] sm:$0xff] %v3291_v9  ;;  %v2378_v29 = vmul.f32 %v3291_v9, %v4052_v26  ;;  %v4205_v7 = vpop.permute.xlu0 %2231 }
 0x141   : > { %v2514_v32 = vmul.f32 %v3290_v20, %v2380_v22 }
 0x142   : > { %v2574_v56 = vadd.f32 %v2573_v4, %v2511_v21  ;;  %v2441_v5 = vadd.f32 %v2440_v2, %v2378_v29  ;;  %v2512_v25 = vmul.f32 %v3291_v9, %v2378_v29  ;;  %v3228_v23 = vpop.f32.mrb[12].mxu0 }
 0x143   : > { %v3292_v31 = vadd.f32 %v3228_v23, %v4066_v33  ;;  %v1650_v54 = vpop.f32.mrb[13].mxu0 }
 0x144   : > { %v2442_v61 = vadd.f32 %v2441_v5, %v2379_v28  ;;  %v2575_v24 = vadd.f32 %v2574_v56, %v2512_v25  ;;  %v3293_v15 = vadd.f32 %v1650_v54, %v4070_v35  ;;  %v3229_v26 = vpop.f32.mrb[14].mxu0  ;;  %v4218_v54 = vpop.permute.xlu0 %2241 }
 0x145   : > { %1935 = vst [vmem:[%s4138_s17 + $0x70] sm:$0xff] %v3292_v31  ;;  %v3294_v8 = vadd.f32 %v3229_v26, %v4074_v37  ;;  %v1653_v6 = vpop.f32.mrb[15].mxu0  ;;  %v2383_v49 = vmul.f32 %v3292_v31, %v4078_v39 }
 0x146   : > { %v2576_v18 = vadd.f32 %v2575_v24, %v2513_v30  ;;  %1933 = vst [vmem:[%s4138_s17 + $0x60] sm:$0xff] %v3293_v15  ;;  %v2381_v33 = vmul.f32 %v3293_v15, %v4068_v34  ;;  %v2443_v10 = vadd.f32 %v2442_v61, %v2380_v22  ;;  %v3295_v19 = vadd.f32 %v1653_v6, %v4076_v38  ;;  %v4207_v38 = vpop.permute.xlu1 %2236 }
 0x147   : > { %1936 = vst [vmem:[%s4138_s17 + $0x78] sm:$0xff] %v3294_v8  ;;  %v2384_v37 = vmul.f32 %v3294_v8, %v4080_v40  ;;  %v2517_v2 = vmul.f32 %v3292_v31, %v2383_v49 }
 0x148   : > { %v2444_v35 = vadd.f32 %v2443_v10, %v2381_v33  ;;  %v2515_v16 = vmul.f32 %v3293_v15, %v2381_v33  ;;  %v2577_v11 = vadd.f32 %v2576_v18, %v2514_v32  ;;  %1934 = vst [vmem:[%s4138_s17 + $0x68] sm:$0xff] %v3295_v19  ;;  %v2382_v20 = vmul.f32 %v3295_v19, %v4072_v36 }
 0x149   : > { %v2518_v40 = vmul.f32 %v3294_v8, %v2384_v37 }
 0x14a   : > { %v2578_v27 = vadd.f32 %v2577_v11, %v2515_v16  ;;  %v2445_v0 = vadd.f32 %v2444_v35, %v2382_v20  ;;  %v2516_v34 = vmul.f32 %v3295_v19, %v2382_v20  ;;  %v3232_v9 = vpop.f32.mrb[16].mxu0  ;;  %v4222_v24 = vpop.permute.xlu1 %2246 }
 0x14b   : > { %v3296_v39 = vadd.f32 %v3232_v9, %v4082_v41  ;;  %v1666_v28 = vpop.f32.mrb[17].mxu0  ;;  %v4229_v35 = vpop.permute.xlu0 %2251 }
 0x14c   : > { %v2446_v21 = vadd.f32 %v2445_v0, %v2383_v49  ;;  %v2579_v4 = vadd.f32 %v2578_v27, %v2516_v34  ;;  %v3297_v36 = vadd.f32 %v1666_v28, %v4084_v42  ;;  %v3233_v29 = vpop.f32.mrb[18].mxu0 }
 0x14d   : > { %1939 = vst [vmem:[%s4138_s17 + $0x90] sm:$0xff] %v3296_v39  ;;  %v3298_v22 = vadd.f32 %v3233_v29, %v4086_v43  ;;  %v1669_v56 = vpop.f32.mrb[19].mxu0  ;;  %v2387_v31 = vmul.f32 %v3296_v39, %v4100_v51 }
 0x14e   : > { %v2580_v5 = vadd.f32 %v2579_v4, %v2517_v2  ;;  %1937 = vst [vmem:[%s4138_s17 + $0x80] sm:$0xff] %v3297_v36  ;;  %v2385_v25 = vmul.f32 %v3297_v36, %v4090_v45  ;;  %v2447_v23 = vadd.f32 %v2446_v21, %v2384_v37  ;;  %v3299_v41 = vadd.f32 %v1669_v56, %v4088_v44  ;;  %v4234_v37 = vpop.permute.xlu1 %2256  ;;  %v4389_v56 = vld [vmem:[#allocation2_spill] sm:$0xff] }
 0x14f   : > { %1940 = vst [vmem:[%s4138_s17 + $0x98] sm:$0xff] %v3298_v22  ;;  %v2388_v15 = vmul.f32 %v3298_v22, %v4104_v53  ;;  %v2521_v6 = vmul.f32 %v3296_v39, %v2387_v31  ;;  %v4242_v4 = vpop.permute.xlu0 %2261 }
 0x150   : > { %v2448_v42 = vadd.f32 %v2447_v23, %v2385_v25  ;;  %v2519_v30 = vmul.f32 %v3297_v36, %v2385_v25  ;;  %v2581_v61 = vadd.f32 %v2580_v5, %v2518_v40  ;;  %1938 = vst [vmem:[%s4138_s17 + $0x88] sm:$0xff] %v3299_v41  ;;  %v2386_v43 = vmul.f32 %v3299_v41, %v4092_v46 }
 0x151   : > { %v2522_v46 = vmul.f32 %v3298_v22, %v2388_v15 }
 0x152   : > { %v2582_v45 = vadd.f32 %v2581_v61, %v2519_v30  ;;  %v2449_v26 = vadd.f32 %v2448_v42, %v2386_v43  ;;  %v2520_v44 = vmul.f32 %v3299_v41, %v2386_v43  ;;  %v3236_v32 = vpop.f32.mrb[20].mxu0  ;;  %v4245_v22 = vpop.permute.xlu1 %2266  ;;  %v4391_v42 = vld [vmem:[#allocation3_spill] sm:$0xff]  ;;  %v4392_v61 = vld [vmem:[#allocation10_spill] sm:$0xff] }
 0x153   : > { %v3300_v51 = vadd.f32 %v3236_v32, %v4094_v47  ;;  %v1682_v8 = vpop.f32.mrb[21].mxu0  ;;  %v4394_v32 = vld [vmem:[#allocation11_spill] sm:$0xff] }
 0x154   : > { %v2450_v18 = vadd.f32 %v2449_v26, %v2387_v31  ;;  %v2583_v33 = vadd.f32 %v2582_v45, %v2520_v44  ;;  %v3301_v10 = vadd.f32 %v1682_v8, %v4096_v48  ;;  %v3237_v19 = vpop.f32.mrb[22].mxu0  ;;  %v4393_v26 = vld [vmem:[#allocation9_spill] sm:$0xff]  ;;  %v4257_v8 = vpop.permute.xlu0 %2271 }
 0x155   : > { %1943 = vst [vmem:[%s4138_s17 + $0xb0] sm:$0xff] %v3300_v51  ;;  %v3302_v53 = vadd.f32 %v3237_v19, %v4098_v50  ;;  %v1685_v49 = vpop.f32.mrb[23].mxu0  ;;  %v2391_v48 = vmul.f32 %v3300_v51, %v4118_v63 }
 0x156   : > { %v2584_v16 = vadd.f32 %v2583_v33, %v2521_v6  ;;  %1941 = vst [vmem:[%s4138_s17 + $0xa0] sm:$0xff] %v3301_v10  ;;  %v2389_v47 = vmul.f32 %v3301_v10, %v4108_v57  ;;  %v2451_v11 = vadd.f32 %v2450_v18, %v2388_v15  ;;  %v3303_v20 = vadd.f32 %v1685_v49, %v4102_v52  ;;  %v4259_v19 = vpop.permute.xlu1 %2276 }
 0x157   : > { %1944 = vst [vmem:[%s4138_s17 + $0xb8] sm:$0xff] %v3302_v53  ;;  %v2392_v9 = vmul.f32 %v3302_v53, %v4120_v1  ;;  %v2525_v63 = vmul.f32 %v3300_v51, %v2391_v48 }
 0x158   : > { %v2452_v27 = vadd.f32 %v2451_v11, %v2389_v47  ;;  %v2523_v0 = vmul.f32 %v3301_v10, %v2389_v47  ;;  %v2585_v34 = vadd.f32 %v2584_v16, %v2522_v46  ;;  %1942 = vst [vmem:[%s4138_s17 + $0xa8] sm:$0xff] %v3303_v20  ;;  %v2390_v50 = vmul.f32 %v3303_v20, %v4112_v59  ;;  %v4395_v46 = vld [vmem:[#allocation4_spill] sm:$0xff] }
 0x159   : > { %v2526_v1 = vmul.f32 %v3302_v53, %v2392_v9 }
 0x15a   : > { %v2586_v39 = vadd.f32 %v2585_v34, %v2523_v0  ;;  %v2453_v28 = vadd.f32 %v2452_v27, %v2390_v50  ;;  %v2524_v57 = vmul.f32 %v3303_v20, %v2390_v50  ;;  %v3240_v2 = vpop.f32.mrb[24].mxu0  ;;  %v4396_v20 = vld [vmem:[#allocation5_spill] sm:$0xff]  ;;  %v4397_v34 = vld [vmem:[#allocation6_spill] sm:$0xff] }
 0x15b   : > { %v3304_v52 = vadd.f32 %v3240_v2, %v4106_v55  ;;  %v1698_v21 = vpop.f32.mrb[25].mxu0  ;;  %v4390_v55 = vld [vmem:[#allocation8_spill] sm:$0xff]  ;;  %v4398_v2 = vld [vmem:[#allocation7_spill] sm:$0xff] }
 0x15c   : > { %v2454_v36 = vadd.f32 %v2453_v28, %v2391_v48  ;;  %v2587_v29 = vadd.f32 %v2586_v39, %v2524_v57  ;;  %v3305_v40 = vadd.f32 %v1698_v21, %v4110_v58  ;;  %v3241_v59 = vpop.f32.mrb[26].mxu0 }
 0x15d   : > { %1947 = vst [vmem:[%s4138_s17 + $0xd0] sm:$0xff] %v3304_v52  ;;  %v3306_v5 = vadd.f32 %v3241_v59, %v4389_v56  ;;  %v1701_v25 = vpop.f32.mrb[27].mxu0  ;;  %v2395_v43 = vmul.f32 %v3304_v52, %v4392_v61  ;;  %v4399_v59 = vld [vmem:[#allocation12_spill] sm:$0xff]  ;;  %v4274_v56 = vpop.permute.xlu1 %2286 }
 0x15e   : > { %v2588_v23 = vadd.f32 %v2587_v29, %v2525_v63  ;;  %1945 = vst [vmem:[%s4138_s17 + $0xc0] sm:$0xff] %v3305_v40  ;;  %v2393_v41 = vmul.f32 %v3305_v40, %v4390_v55  ;;  %v2455_v31 = vadd.f32 %v2454_v36, %v2392_v9  ;;  %v3307_v30 = vadd.f32 %v1701_v25, %v4391_v42  ;;  %v4270_v63 = vpop.permute.xlu0 %2281 }
 0x15f   : > { %1948 = vst [vmem:[%s4138_s17 + $0xd8] sm:$0xff] %v3306_v5  ;;  %v2396_v51 = vmul.f32 %v3306_v5, %v4394_v32  ;;  %v2529_v16 = vmul.f32 %v3304_v52, %v2395_v43 }
 0x160   : > { %v2456_v58 = vadd.f32 %v2455_v31, %v2393_v41  ;;  %v2527_v15 = vmul.f32 %v3305_v40, %v2393_v41  ;;  %v2589_v45 = vadd.f32 %v2588_v23, %v2526_v1  ;;  %1946 = vst [vmem:[%s4138_s17 + $0xc8] sm:$0xff] %v3307_v30  ;;  %v2394_v44 = vmul.f32 %v3307_v30, %v4393_v26 }
 0x161   : > { %v2530_v0 = vmul.f32 %v3306_v5, %v2396_v51 }
 0x162   : > { %v2590_v6 = vadd.f32 %v2589_v45, %v2527_v15  ;;  %v2457_v18 = vadd.f32 %v2456_v58, %v2394_v44  ;;  %v2528_v33 = vmul.f32 %v3307_v30, %v2394_v44  ;;  %v3244_v10 = vpop.f32.mrb[28].mxu0 }
 0x163   : > { %v3308_v53 = vadd.f32 %v3244_v10, %v4395_v46  ;;  %v1714_v49 = vpop.f32.mrb[29].mxu0  ;;  %v4282_v46 = vpop.permute.xlu0 %2291 }
 0x164   : > { %v2458_v47 = vadd.f32 %v2457_v18, %v2395_v43  ;;  %v2591_v11 = vadd.f32 %v2590_v6, %v2528_v33  ;;  %v3309_v48 = vadd.f32 %v1714_v49, %v4396_v20  ;;  %v3245_v27 = vpop.f32.mrb[30].mxu0 }
 0x165   : > { %1951 = vst [vmem:[%s4138_s17 + $0xf0] sm:$0xff] %v3308_v53  ;;  %v3310_v50 = vadd.f32 %v3245_v27, %v4397_v34  ;;  %v1717_v9 = vpop.f32.mrb[31].mxu0  ;;  %v2399_v52 = vmul.f32 %v3308_v53, %v4166_v62 }
 0x166   : > { %v2592_v39 = vadd.f32 %v2591_v11, %v2529_v16  ;;  %1949 = vst [vmem:[%s4138_s17 + $0xe0] sm:$0xff] %v3309_v48  ;;  %v2397_v28 = vmul.f32 %v3309_v48, %v4153_v3  ;;  %v2459_v57 = vadd.f32 %v2458_v47, %v2396_v51  ;;  %v3311_v21 = vadd.f32 %v1717_v9, %v4398_v2  ;;  %v4286_v11 = vpop.permute.xlu1 %2296 }
 0x167   : > { %1952 = vst [vmem:[%s4138_s17 + $0xf8] sm:$0xff] %v3310_v50  ;;  %v2400_v5 = vmul.f32 %v3310_v50, %v4170_v60  ;;  %v2533_v61 = vmul.f32 %v3308_v53, %v2399_v52 }
 0x168   : > { %v2460_v36 = vadd.f32 %v2459_v57, %v2397_v28  ;;  %v2531_v29 = vmul.f32 %v3309_v48, %v2397_v28  ;;  %v2593_v40 = vadd.f32 %v2592_v39, %v2530_v0  ;;  %1950 = vst [vmem:[%s4138_s17 + $0xe8] sm:$0xff] %v3311_v21  ;;  %v2398_v1 = vmul.f32 %v3311_v21, %v4399_v59 }
 0x169   : > { %v3182_v25 = vpop.f32.mrb[32].mxu1  ;;  %v2534_v60 = vmul.f32 %v3310_v50, %v2400_v5 }
 0x16a   : > { %v2594_v3 = vadd.f32 %v2593_v40, %v2531_v29  ;;  %v2461_v23 = vadd.f32 %v2460_v36, %v2398_v1  ;;  %v2532_v55 = vmul.f32 %v3311_v21, %v2398_v1  ;;  %v3248_v41 = vpop.f32.mrb[32].mxu0  ;;  %v1110_v62 = vpop.f32.mrb[33].mxu1 }
 0x16b   : > { %v3312_v31 = vadd.f32 %v3248_v41, %v3182_v25  ;;  %v1730_v42 = vpop.f32.mrb[33].mxu0  ;;  %v3183_v30 = vpop.f32.mrb[34].mxu1 }
 0x16c   : > { %v2462_v43 = vadd.f32 %v2461_v23, %v2399_v52  ;;  %v2595_v58 = vadd.f32 %v2594_v3, %v2532_v55  ;;  %v3313_v15 = vadd.f32 %v1730_v42, %v1110_v62  ;;  %v3249_v45 = vpop.f32.mrb[34].mxu0  ;;  %v1113_v26 = vpop.f32.mrb[35].mxu1 }
 0x16d   : > { %1955 = vst [vmem:[%s4138_s17 + $0x110] sm:$0xff] %v3312_v31  ;;  %v3314_v44 = vadd.f32 %v3249_v45, %v3183_v30  ;;  %v1733_v32 = vpop.f32.mrb[35].mxu0  ;;  %v2403_v10 = vmul.f32 %v3312_v31, %v4190_v14  ;;  %v4294_v3 = vpop.permute.xlu0 %2301 }
 0x16e   : > { %v2596_v51 = vadd.f32 %v2595_v58, %v2533_v61  ;;  %1953 = vst [vmem:[%s4138_s17 + $0x100] sm:$0xff] %v3313_v15  ;;  %v2401_v6 = vmul.f32 %v3313_v15, %v4177_v12  ;;  %v2463_v18 = vadd.f32 %v2462_v43, %v2400_v5  ;;  %v3315_v33 = vadd.f32 %v1733_v32, %v1113_v26 }
 0x16f   : > { %1956 = vst [vmem:[%s4138_s17 + $0x118] sm:$0xff] %v3314_v44  ;;  %v2404_v20 = vmul.f32 %v3314_v44, %v4193_v17  ;;  %v2537_v28 = vmul.f32 %v3312_v31, %v2403_v10  ;;  %v4298_v31 = vpop.permute.xlu1 %2306 }
 0x170   : > { %v2464_v53 = vadd.f32 %v2463_v18, %v2401_v6  ;;  %v2535_v49 = vmul.f32 %v3313_v15, %v2401_v6  ;;  %v2597_v16 = vadd.f32 %v2596_v51, %v2534_v60  ;;  %1954 = vst [vmem:[%s4138_s17 + $0x108] sm:$0xff] %v3315_v33  ;;  %v2402_v47 = vmul.f32 %v3315_v33, %v4182_v13 }
 0x171   : > { %v3186_v48 = vpop.f32.mrb[36].mxu1  ;;  %v2538_v17 = vmul.f32 %v3314_v44, %v2404_v20 }
 0x172   : > { %v2598_v12 = vadd.f32 %v2597_v16, %v2535_v49  ;;  %v2465_v27 = vadd.f32 %v2464_v53, %v2402_v47  ;;  %v2536_v0 = vmul.f32 %v3315_v33, %v2402_v47  ;;  %v3252_v34 = vpop.f32.mrb[36].mxu0  ;;  %v1126_v14 = vpop.f32.mrb[37].mxu1 }
 0x173   : > { %v3316_v50 = vadd.f32 %v3252_v34, %v3186_v48  ;;  %v1746_v9 = vpop.f32.mrb[37].mxu0  ;;  %v3187_v39 = vpop.f32.mrb[38].mxu1 }
 0x174   : > { %v2466_v57 = vadd.f32 %v2465_v27, %v2403_v10  ;;  %v2599_v2 = vadd.f32 %v2598_v12, %v2536_v0  ;;  %v3317_v13 = vadd.f32 %v1746_v9, %v1126_v14  ;;  %v3253_v21 = vpop.f32.mrb[38].mxu0  ;;  %v1129_v52 = vpop.f32.mrb[39].mxu1 }
 0x175   : > { %1959 = vst [vmem:[%s4138_s17 + $0x130] sm:$0xff] %v3316_v50  ;;  %v3318_v36 = vadd.f32 %v3253_v21, %v3187_v39  ;;  %v1749_v29 = vpop.f32.mrb[39].mxu0  ;;  %v2407_v25 = vmul.f32 %v3316_v50, %v4218_v54  ;;  %v4310_v34 = vpop.permute.xlu1 %2316 }
 0x176   : > { %v2600_v40 = vadd.f32 %v2599_v2, %v2537_v28  ;;  %1957 = vst [vmem:[%s4138_s17 + $0x120] sm:$0xff] %v3317_v13  ;;  %v2405_v59 = vmul.f32 %v3317_v13, %v4205_v7  ;;  %v2467_v1 = vadd.f32 %v2466_v57, %v2404_v20  ;;  %v3319_v5 = vadd.f32 %v1749_v29, %v1129_v52  ;;  %v4306_v20 = vpop.permute.xlu0 %2311 }
 0x177   : > { %1960 = vst [vmem:[%s4138_s17 + $0x138] sm:$0xff] %v3318_v36  ;;  %v2408_v42 = vmul.f32 %v3318_v36, %v4222_v24  ;;  %v2541_v60 = vmul.f32 %v3316_v50, %v2407_v25 }
 0x178   : > { %v2468_v23 = vadd.f32 %v2467_v1, %v2405_v59  ;;  %v2539_v55 = vmul.f32 %v3317_v13, %v2405_v59  ;;  %v2601_v41 = vadd.f32 %v2600_v40, %v2538_v17  ;;  %1958 = vst [vmem:[%s4138_s17 + $0x128] sm:$0xff] %v3319_v5  ;;  %v2406_v62 = vmul.f32 %v3319_v5, %v4207_v38 }
 0x179   : > { %v3190_v30 = vpop.f32.mrb[40].mxu1  ;;  %v2542_v24 = vmul.f32 %v3318_v36, %v2408_v42 }
 0x17a   : > { %v2602_v7 = vadd.f32 %v2601_v41, %v2539_v55  ;;  %v2469_v61 = vadd.f32 %v2468_v23, %v2406_v62  ;;  %v2540_v43 = vmul.f32 %v3319_v5, %v2406_v62  ;;  %v3256_v58 = vpop.f32.mrb[40].mxu0  ;;  %v1142_v54 = vpop.f32.mrb[41].mxu1 }
 0x17b   : > { %v3320_v15 = vadd.f32 %v3256_v58, %v3190_v30  ;;  %v1762_v45 = vpop.f32.mrb[41].mxu0  ;;  %v3191_v26 = vpop.f32.mrb[42].mxu1 }
 0x17c   : > { %v2470_v44 = vadd.f32 %v2469_v61, %v2407_v25  ;;  %v2603_v32 = vadd.f32 %v2602_v7, %v2540_v43  ;;  %v3321_v38 = vadd.f32 %v1762_v45, %v1142_v54  ;;  %v3257_v51 = vpop.f32.mrb[42].mxu0  ;;  %v1145_v6 = vpop.f32.mrb[43].mxu1 }
 0x17d   : > { %1963 = vst [vmem:[%s4138_s17 + $0x150] sm:$0xff] %v3320_v15  ;;  %v3322_v18 = vadd.f32 %v3257_v51, %v3191_v26  ;;  %v1765_v33 = vpop.f32.mrb[43].mxu0  ;;  %v2411_v47 = vmul.f32 %v3320_v15, %v4242_v4  ;;  %v4318_v41 = vpop.permute.xlu0 %2321 }
 0x17e   : > { %v2604_v10 = vadd.f32 %v2603_v32, %v2541_v60  ;;  %1961 = vst [vmem:[%s4138_s17 + $0x140] sm:$0xff] %v3321_v38  ;;  %v2409_v53 = vmul.f32 %v3321_v38, %v4229_v35  ;;  %v2471_v49 = vadd.f32 %v2470_v44, %v2408_v42  ;;  %v3323_v16 = vadd.f32 %v1765_v33, %v1145_v6  ;;  %v4322_v61 = vpop.permute.xlu1 %2326 }
 0x17f   : > { %1964 = vst [vmem:[%s4138_s17 + $0x158] sm:$0xff] %v3322_v18  ;;  %v2412_v14 = vmul.f32 %v3322_v18, %v4245_v22  ;;  %v2545_v21 = vmul.f32 %v3320_v15, %v2411_v47 }
 0x180   : > { %v2472_v48 = vadd.f32 %v2471_v49, %v2409_v53  ;;  %v2543_v12 = vmul.f32 %v3321_v38, %v2409_v53  ;;  %v2605_v27 = vadd.f32 %v2604_v10, %v2542_v24  ;;  %1962 = vst [vmem:[%s4138_s17 + $0x148] sm:$0xff] %v3323_v16  ;;  %v2410_v0 = vmul.f32 %v3323_v16, %v4234_v37 }
 0x181   : > { %v3194_v50 = vpop.f32.mrb[44].mxu1  ;;  %v2546_v22 = vmul.f32 %v3322_v18, %v2412_v14 }
 0x182   : > { %v2606_v35 = vadd.f32 %v2605_v27, %v2543_v12  ;;  %v2473_v9 = vadd.f32 %v2472_v48, %v2410_v0  ;;  %v2544_v39 = vmul.f32 %v3323_v16, %v2410_v0  ;;  %v3260_v28 = vpop.f32.mrb[44].mxu0  ;;  %v1158_v4 = vpop.f32.mrb[45].mxu1 }
 0x183   : > { %v3324_v57 = vadd.f32 %v3260_v28, %v3194_v50  ;;  %v1778_v2 = vpop.f32.mrb[45].mxu0  ;;  %v3195_v13 = vpop.f32.mrb[46].mxu1 }
 0x184   : > { %v2474_v52 = vadd.f32 %v2473_v9, %v2411_v47  ;;  %v2607_v17 = vadd.f32 %v2606_v35, %v2544_v39  ;;  %v3325_v37 = vadd.f32 %v1778_v2, %v1158_v4  ;;  %v3261_v36 = vpop.f32.mrb[46].mxu0  ;;  %v1161_v29 = vpop.f32.mrb[47].mxu1 }
 0x185   : > { %1967 = vst [vmem:[%s4138_s17 + $0x170] sm:$0xff] %v3324_v57  ;;  %v3326_v40 = vadd.f32 %v3261_v36, %v3195_v13  ;;  %v1781_v59 = vpop.f32.mrb[47].mxu0  ;;  %v2415_v55 = vmul.f32 %v3324_v57, %v4270_v63  ;;  %v4330_v48 = vpop.permute.xlu0 %2331 }
 0x186   : > { %v2608_v1 = vadd.f32 %v2607_v17, %v2545_v21  ;;  %1965 = vst [vmem:[%s4138_s17 + $0x160] sm:$0xff] %v3325_v37  ;;  %v2413_v5 = vmul.f32 %v3325_v37, %v4257_v8  ;;  %v2475_v25 = vadd.f32 %v2474_v52, %v2412_v14  ;;  %v3327_v23 = vadd.f32 %v1781_v59, %v1161_v29  ;;  %v4334_v50 = vpop.permute.xlu1 %2336 }
 0x187   : > { %1968 = vst [vmem:[%s4138_s17 + $0x178] sm:$0xff] %v3326_v40  ;;  %v2416_v43 = vmul.f32 %v3326_v40, %v4274_v56  ;;  %v2549_v32 = vmul.f32 %v3324_v57, %v2415_v55 }
 0x188   : > { %v2476_v62 = vadd.f32 %v2475_v25, %v2413_v5  ;;  %v2547_v42 = vmul.f32 %v3325_v37, %v2413_v5  ;;  %v2609_v30 = vadd.f32 %v2608_v1, %v2546_v22  ;;  %1966 = vst [vmem:[%s4138_s17 + $0x168] sm:$0xff] %v3327_v23  ;;  %v2414_v7 = vmul.f32 %v3327_v23, %v4259_v19 }
 0x189   : > { %v3198_v58 = vpop.f32.mrb[48].mxu1  ;;  %v2550_v56 = vmul.f32 %v3326_v40, %v2416_v43 }
 0x18a   : > { %v2610_v8 = vadd.f32 %v2609_v30, %v2547_v42  ;;  %v2477_v54 = vadd.f32 %v2476_v62, %v2414_v7  ;;  %v2548_v15 = vmul.f32 %v3327_v23, %v2414_v7  ;;  %v3264_v45 = vpop.f32.mrb[48].mxu0  ;;  %v1174_v63 = vpop.f32.mrb[49].mxu1 }
 0x18b   : > { %v3328_v26 = vadd.f32 %v3264_v45, %v3198_v58  ;;  %v1794_v60 = vpop.f32.mrb[49].mxu0  ;;  %v3199_v44 = vpop.f32.mrb[50].mxu1 }
 0x18c   : > { %v2478_v38 = vadd.f32 %v2477_v54, %v2415_v55  ;;  %v2611_v51 = vadd.f32 %v2610_v8, %v2548_v15  ;;  %v3329_v19 = vadd.f32 %v1794_v60, %v1174_v63  ;;  %v3265_v6 = vpop.f32.mrb[50].mxu0  ;;  %v1177_v24 = vpop.f32.mrb[51].mxu1 }
 0x18d   : > { %1971 = vst [vmem:[%s4138_s17 + $0x190] sm:$0xff] %v3328_v26  ;;  %v3330_v18 = vadd.f32 %v3265_v6, %v3199_v44  ;;  %v1797_v33 = vpop.f32.mrb[51].mxu0  ;;  %v2419_v47 = vmul.f32 %v3328_v26, %v4294_v3  ;;  %v2342_v23 = vpop.permute.xlu0 %2341 }
 0x18e   : > { %v2612_v10 = vadd.f32 %v2611_v51, %v2549_v32  ;;  %1969 = vst [vmem:[%s4138_s17 + $0x180] sm:$0xff] %v3329_v19  ;;  %v2417_v53 = vmul.f32 %v3329_v19, %v4282_v46  ;;  %v2479_v49 = vadd.f32 %v2478_v38, %v2416_v43  ;;  %v3331_v16 = vadd.f32 %v1797_v33, %v1177_v24  ;;  %v2347_v7 = vpop.permute.xlu1 %2346 }
 0x18f   : > { %1972 = vst [vmem:[%s4138_s17 + $0x198] sm:$0xff] %v3330_v18  ;;  %v2420_v35 = vmul.f32 %v3330_v18, %v4298_v31  ;;  %v2553_v21 = vmul.f32 %v3328_v26, %v2419_v47 }
 0x190   : > { %v2480_v12 = vadd.f32 %v2479_v49, %v2417_v53  ;;  %v2551_v27 = vmul.f32 %v3329_v19, %v2417_v53  ;;  %v2613_v0 = vadd.f32 %v2612_v10, %v2550_v56  ;;  %1970 = vst [vmem:[%s4138_s17 + $0x188] sm:$0xff] %v3331_v16  ;;  %v2418_v14 = vmul.f32 %v3331_v16, %v4286_v11 }
 0x191   : > { %v3202_v9 = vpop.f32.mrb[52].mxu1  ;;  %v2554_v31 = vmul.f32 %v3330_v18, %v2420_v35  ;;  %v2352_v53 = vpop.permute.xlu0 %2351 }
 0x192   : > { %v2614_v46 = vadd.f32 %v2613_v0, %v2551_v27  ;;  %v2481_v39 = vadd.f32 %v2480_v12, %v2418_v14  ;;  %v2552_v28 = vmul.f32 %v3331_v16, %v2418_v14  ;;  %v3268_v4 = vpop.f32.mrb[52].mxu0  ;;  %v1190_v3 = vpop.f32.mrb[53].mxu1 }
 0x193   : > { %v3332_v57 = vadd.f32 %v3268_v4, %v3202_v9  ;;  %v1810_v2 = vpop.f32.mrb[53].mxu0  ;;  %v3203_v13 = vpop.f32.mrb[54].mxu1 }
 0x194   : > { %v2482_v52 = vadd.f32 %v2481_v39, %v2419_v47  ;;  %v2615_v17 = vadd.f32 %v2614_v46, %v2552_v28  ;;  %v3333_v11 = vadd.f32 %v1810_v2, %v1190_v3  ;;  %v3269_v37 = vpop.f32.mrb[54].mxu0  ;;  %v1193_v36 = vpop.f32.mrb[55].mxu1 }
 0x195   : > { %1975 = vst [vmem:[%s4138_s17 + $0x1b0] sm:$0xff] %v3332_v57  ;;  %v3334_v29 = vadd.f32 %v3269_v37, %v3203_v13  ;;  %v1813_v22 = vpop.f32.mrb[55].mxu0  ;;  %v2423_v25 = vmul.f32 %v3332_v57, %v4318_v41  ;;  %v2357_v27 = vpop.permute.xlu1 %2356 }
 0x196   : > { %v2616_v40 = vadd.f32 %v2615_v17, %v2553_v21  ;;  %1973 = vst [vmem:[%s4138_s17 + $0x1a0] sm:$0xff] %v3333_v11  ;;  %v2421_v59 = vmul.f32 %v3333_v11, %v4306_v20  ;;  %v2483_v1 = vadd.f32 %v2482_v52, %v2420_v35  ;;  %v3335_v5 = vadd.f32 %v1813_v22, %v1193_v36  ;;  %v2362_v36 = vpop.permute.xlu0 %2361 }
 0x197   : > { %1976 = vst [vmem:[%s4138_s17 + $0x1b8] sm:$0xff] %v3334_v29  ;;  %v2424_v43 = vmul.f32 %v3334_v29, %v4322_v61  ;;  %v2557_v60 = vmul.f32 %v3332_v57, %v2423_v25 }
 0x198   : > { %v2484_v55 = vadd.f32 %v2483_v1, %v2421_v59  ;;  %v2555_v62 = vmul.f32 %v3333_v11, %v2421_v59  ;;  %v2617_v42 = vadd.f32 %v2616_v40, %v2554_v31  ;;  %1974 = vst [vmem:[%s4138_s17 + $0x1a8] sm:$0xff] %v3335_v5  ;;  %v2422_v30 = vmul.f32 %v3335_v5, %v4310_v34 }
 0x199   : > { %v3206_v58 = vpop.f32.mrb[56].mxu1  ;;  %v2558_v61 = vmul.f32 %v3334_v29, %v2424_v43 }
 0x19a   : > { %v2618_v8 = vadd.f32 %v2617_v42, %v2555_v62  ;;  %v2485_v54 = vadd.f32 %v2484_v55, %v2422_v30  ;;  %v2556_v20 = vmul.f32 %v3335_v5, %v2422_v30  ;;  %v3272_v15 = vpop.f32.mrb[56].mxu0  ;;  %v1206_v45 = vpop.f32.mrb[57].mxu1 }
 0x19b   : > { %v3336_v41 = vadd.f32 %v3272_v15, %v3206_v58  ;;  %v1826_v63 = vpop.f32.mrb[57].mxu0  ;;  %v3207_v26 = vpop.f32.mrb[58].mxu1 }
 0x19c   : > { %v2486_v44 = vadd.f32 %v2485_v54, %v2423_v25  ;;  %v2619_v32 = vadd.f32 %v2618_v8, %v2556_v20  ;;  %v3337_v38 = vadd.f32 %v1826_v63, %v1206_v45  ;;  %v3273_v34 = vpop.f32.mrb[58].mxu0  ;;  %v1209_v51 = vpop.f32.mrb[59].mxu1 }
 0x19d   : > { %1979 = vst [vmem:[%s4138_s17 + $0x1d0] sm:$0xff] %v3336_v41  ;;  %v3338_v19 = vadd.f32 %v3273_v34, %v3207_v26  ;;  %v1829_v6 = vpop.f32.mrb[59].mxu0  ;;  %v2427_v10 = vmul.f32 %v3336_v41, %v2342_v23  ;;  %v2367_v55 = vpop.permute.xlu1 %2366 }
 0x19e   : > { %v2620_v24 = vadd.f32 %v2619_v32, %v2557_v60  ;;  %1977 = vst [vmem:[%s4138_s17 + $0x1c0] sm:$0xff] %v3337_v38  ;;  %v2425_v56 = vmul.f32 %v3337_v38, %v4330_v48  ;;  %v2487_v18 = vadd.f32 %v2486_v44, %v2424_v43  ;;  %v3339_v33 = vadd.f32 %v1829_v6, %v1209_v51 }
 0x19f   : > { %1980 = vst [vmem:[%s4138_s17 + $0x1d8] sm:$0xff] %v3338_v19  ;;  %v2428_v0 = vmul.f32 %v3338_v19, %v2347_v7  ;;  %v2561_v57 = vmul.f32 %v3336_v41, %v2427_v10 }
 0x1a0   : > { %v2488_v49 = vadd.f32 %v2487_v18, %v2425_v56  ;;  %v2559_v16 = vmul.f32 %v3337_v38, %v2425_v56  ;;  %v2621_v47 = vadd.f32 %v2620_v24, %v2558_v61  ;;  %1978 = vst [vmem:[%s4138_s17 + $0x1c8] sm:$0xff] %v3339_v33  ;;  %v2426_v12 = vmul.f32 %v3339_v33, %v4334_v50 }
 0x1a1   : > { %v3210_v14 = vpop.f32.mrb[60].mxu1  ;;  %v2562_v17 = vmul.f32 %v3338_v19, %v2428_v0 }
 0x1a2   : > { %v2622_v35 = vadd.f32 %v2621_v47, %v2559_v16  ;;  %v2489_v9 = vadd.f32 %v2488_v49, %v2426_v12  ;;  %v2560_v46 = vmul.f32 %v3339_v33, %v2426_v12  ;;  %v3276_v39 = vpop.f32.mrb[60].mxu0  ;;  %v1222_v48 = vpop.f32.mrb[61].mxu1 }
 0x1a3   : > { %v3340_v28 = vadd.f32 %v3276_v39, %v3210_v14  ;;  %v1842_v4 = vpop.f32.mrb[61].mxu0  ;;  %v3211_v3 = vpop.f32.mrb[62].mxu1 }
 0x1a4   : > { %v2490_v2 = vadd.f32 %v2489_v9, %v2427_v10  ;;  %v2623_v13 = vadd.f32 %v2622_v35, %v2560_v46  ;;  %v3341_v21 = vadd.f32 %v1842_v4, %v1222_v48  ;;  %v3277_v52 = vpop.f32.mrb[62].mxu0  ;;  %v1225_v50 = vpop.f32.mrb[63].mxu1 }
 0x1a5   : > { %1983 = vst [vmem:[%s4138_s17 + $0x1f0] sm:$0xff] %v3340_v28  ;;  %v3342_v11 = vadd.f32 %v3277_v52, %v3211_v3  ;;  %v1845_v37 = vpop.f32.mrb[63].mxu0  ;;  %v2431_v59 = vmul.f32 %v3340_v28, %v2362_v36 }
 0x1a6   : > { %v2624_v31 = vadd.f32 %v2623_v13, %v2561_v57  ;;  %1981 = vst [vmem:[%s4138_s17 + $0x1e0] sm:$0xff] %v3341_v21  ;;  %v2429_v29 = vmul.f32 %v3341_v21, %v2352_v53  ;;  %v2491_v22 = vadd.f32 %v2490_v2, %v2428_v0  ;;  %v3343_v40 = vadd.f32 %v1845_v37, %v1225_v50 }
 0x1a7   : > { %1984 = vst [vmem:[%s4138_s17 + $0x1f8] sm:$0xff] %v3342_v11  ;;  %v2432_v42 = vmul.f32 %v3342_v11, %v2367_v55  ;;  %v2565_v43 = vmul.f32 %v3340_v28, %v2431_v59 }
 0x1a8   : > { %v2492_v1 = vadd.f32 %v2491_v22, %v2429_v29  ;;  %v2563_v5 = vmul.f32 %v3341_v21, %v2429_v29  ;;  %v2625_v25 = vadd.f32 %v2624_v31, %v2562_v17  ;;  %1982 = vst [vmem:[%s4138_s17 + $0x1e8] sm:$0xff] %v3343_v40  ;;  %v2430_v23 = vmul.f32 %v3343_v40, %v2357_v27 }
 0x1a9   : > { %v2566_v54 = vmul.f32 %v3342_v11, %v2432_v42 }
 0x1aa   : > { %v2626_v62 = vadd.f32 %v2625_v25, %v2563_v5  ;;  %v2493_v30 = vadd.f32 %v2492_v1, %v2430_v23  ;;  %v2564_v7 = vmul.f32 %v3343_v40, %v2430_v23 }
 0x1ac   : > { %v2494_v58 = vadd.f32 %v2493_v30, %v2431_v59  ;;  %v2627_v8 = vadd.f32 %v2626_v62, %v2564_v7 }
 0x1ae   : > { %v2495_v20 = vadd.f32 %v2494_v58, %v2432_v42  ;;  %v2628_v15 = vadd.f32 %v2627_v8, %v2565_v43 }
 0x1b0   : > { %v2496_v45 = vrot.slane %v2495_v20, 4  ;;  %v2629_v41 = vadd.f32 %v2628_v15, %v2566_v54 }
 0x1b2   : > { %v2497_v63 = vadd.f32 %v2496_v45, %v2495_v20  ;;  %v2630_v26 = vrot.slane %v2629_v41, 4 }
 0x1b4   : > { %v2498_v60 = vrot.slane %v2497_v63, 2  ;;  %v2631_v44 = vadd.f32 %v2630_v26, %v2629_v41 }
 0x1b6   : > { %v2499_v32 = vadd.f32 %v2498_v60, %v2497_v63  ;;  %v2632_v38 = vrot.slane %v2631_v44, 2 }
 0x1b8   : > { %v2500_v34 = vrot.slane %v2499_v32, 1  ;;  %v2633_v51 = vadd.f32 %v2632_v38, %v2631_v44 }
 0x1ba   : > { %v2501_v61 = vadd.f32 %v2500_v34, %v2499_v32  ;;  %v2634_v19 = vrot.slane %v2633_v51, 1 }
 0x1bc   : > { %2502 = vst [vmem:[%s288_s24] sm:$0x1] %v2501_v61  ;;  %v2635_v6 = vadd.f32 %v2634_v19, %v2633_v51 }
 0x1be   : > { %2636 = vst [vmem:[%s294_s27] sm:$0x1] %v2635_v6 }
 0x1bf PF: > { %s16_s20 = sadd.s32 1, %s3531_s20   ;;  %s4400_s18 = smov %s3527_s19 }
 0x1c0   : > { %p13_p5 = scmp.ge.s32.totalorder %s16_s20, 4   ;;  %s4401_s19 = smov %s4403_s21 }
 0x1c2   :  { %15 = sbr.rel (!%p13_p5) target bundleno = 2 (0x2), region = 91 }

</bundles_post_ra>
